<compile_context>
chip_gen: v6e
topology: v6e:2x2x1
jax: 0.10.0
libtpu: 0.0.40
codegen_flags: <defaults>
</compile_context>

<pallas_src>
import functools

import jax
import jax.numpy as jnp
from jax import lax
from jax.experimental import pallas as pl
from jax.experimental.pallas import tpu as pltpu

EPS = 1e-5


def _round_up(x, m):
    return (x + m - 1) // m * m


# ----------------------------------------------------------------------------
# Pallas kernels
# ----------------------------------------------------------------------------
def _matmul_kernel(*refs, has_affine):
    """One (tm, tn) output tile; K is the innermost ("arbitrary") grid axis."""
    if has_affine:
        x_ref, w_ref, s_ref, b_ref, o_ref, acc_ref = refs
    else:
        x_ref, w_ref, o_ref, acc_ref = refs

    @pl.when(pl.program_id(2) == 0)
    def _():
        acc_ref[...] = jnp.zeros_like(acc_ref)

    acc_ref[...] += jnp.dot(x_ref[...], w_ref[...],
                            preferred_element_type=jnp.float32)

    @pl.when(pl.program_id(2) == pl.num_programs(2) - 1)
    def _():
        y = acc_ref[...]
        if has_affine:
            y = y * s_ref[...] + b_ref[...]   # folded Conv1d bias + BatchNorm (eval)
        o_ref[...] = y.astype(o_ref.dtype)


def matmul_affine(x, w, scale=None, bias=None, *, out_dtype=jnp.bfloat16,
                  tm=256, tn=256, tk=512):
    """y = (x @ w) * scale + bias   (scale/bias per output channel, optional).

    x: [M, K], w: [K, N].  Inputs are cast to bf16 for the MXU; accumulation
    and the affine epilogue run in f32.  Operands are zero-padded to tile
    multiples so partial K blocks never contribute garbage.
    """
    M, K = x.shape
    K2, N = w.shape
    assert K == K2, (x.shape, w.shape)
    has_affine = scale is not None

    tm = min(tm, _round_up(M, 8))
    tn = min(tn, _round_up(N, 128))
    tk = min(tk, _round_up(K, 128))
    Mp, Np, Kp = _round_up(M, tm), _round_up(N, tn), _round_up(K, tk)

    xb = x.astype(jnp.bfloat16)
    wb = w.astype(jnp.bfloat16)
    if (Mp, Kp) != (M, K):
        xb = jnp.pad(xb, ((0, Mp - M), (0, Kp - K)))
    if (Kp, Np) != (K, N):
        wb = jnp.pad(wb, ((0, Kp - K), (0, Np - N)))

    in_specs = [pl.BlockSpec((tm, tk), lambda i, j, k: (i, k)),
                pl.BlockSpec((tk, tn), lambda i, j, k: (k, j))]
    operands = [xb, wb]
    if has_affine:
        s2 = jnp.pad(scale.astype(jnp.float32), (0, Np - N)).reshape(1, Np)
        b2 = jnp.pad(bias.astype(jnp.float32), (0, Np - N)).reshape(1, Np)
        in_specs += [pl.BlockSpec((1, tn), lambda i, j, k: (0, j)),
                     pl.BlockSpec((1, tn), lambda i, j, k: (0, j))]
        operands += [s2, b2]

    out = pl.pallas_call(
        functools.partial(_matmul_kernel, has_affine=has_affine),
        out_shape=jax.ShapeDtypeStruct((Mp, Np), out_dtype),
        grid=(Mp // tm, Np // tn, Kp // tk),
        in_specs=in_specs,
        out_specs=pl.BlockSpec((tm, tn), lambda i, j, k: (i, j)),
        scratch_shapes=[pltpu.VMEM((tm, tn), jnp.float32)],
        compiler_params=pltpu.CompilerParams(
            dimension_semantics=("parallel", "parallel", "arbitrary")),
    )(*operands)

    if (Mp, Np) != (M, N):
        out = out[:M, :N]
    return out


def _attention_kernel(q_ref, k_ref, v_ref, o_ref):
    """Softmax attention for every head of one batch element.

    q/k/v blocks: [1, H, n, D] (attention scale already folded into q).
    Output block: [1, n, H*D] — lane-dense 'b n (h d)' layout written once.
    """
    _, H, n, D = q_ref.shape
    outs = []
    for h in range(H):                                   # static unroll over heads
        q = q_ref[0, h]                                  # [n, D]
        k = k_ref[0, h]
        v = v_ref[0, h]
        s = lax.dot_general(q, k, (((1,), (1,)), ((), ())),
                            preferred_element_type=jnp.float32)   # [n, n]
        m = jnp.max(s, axis=-1, keepdims=True)
        p = jnp.exp(s - m)
        l = jnp.sum(p, axis=-1, keepdims=True)
        o = jnp.dot(p.astype(v.dtype), v, preferred_element_type=jnp.float32)
        outs.append(o * pl.reciprocal(l, approx=True))   # EUP reciprocal
    o_ref[0] = jnp.concatenate(outs, axis=-1).astype(o_ref.dtype)


def attention_core(q, k, v):
    """q, k, v: [B, H, n, D]  ->  [B, n, H*D]  (per-batch, all heads per step)."""
    # TODO(synk): flash-tile the key axis for very long sequences (the [n, n]
    # score tile is held fully in VMEM here; fine for PointMLP-scale n).
    B, H, n, D = q.shape
    return pl.pallas_call(
        _attention_kernel,
        out_shape=jax.ShapeDtypeStruct((B, n, H * D), q.dtype),
        grid=(B,),
        in_specs=[pl.BlockSpec((1, H, n, D), lambda b: (b, 0, 0, 0))] * 3,
        out_specs=pl.BlockSpec((1, n, H * D), lambda b: (b, 0, 0)),
        compiler_params=pltpu.CompilerParams(
            dimension_semantics=("parallel",)),
    )(q, k, v)


# ----------------------------------------------------------------------------
# Attention module (forward, eval mode)
# ----------------------------------------------------------------------------
def make_attention_params(key, dim, heads=4, dim_head=32):
    """Deterministic parameters matching the PyTorch module structure."""
    inner = heads * dim_head
    k1, k2, k3 = jax.random.split(key, 3)
    wqkv = jax.random.normal(k1, (dim, 3 * inner), jnp.float32) * 0.05
    # fold the softmax scale dim_head**-0.5 into the query projection columns
    wqkv = wqkv.at[:, :inner].multiply(dim_head ** -0.5)
    wo = jax.random.normal(k2, (inner, dim), jnp.float32) * 0.05      # Conv1d(inner, dim, 1)
    conv_bias = jax.random.normal(k3, (dim,), jnp.float32) * 0.01
    # BatchNorm1d eval with PyTorch-default running stats (mean 0, var 1,
    # gamma 1, beta 0) folds to a uniform 1/sqrt(1+eps) scale.
    s = jnp.full((dim,), (1.0 + EPS) ** -0.5, jnp.float32)
    return {"heads": heads, "dim_head": dim_head,
            "wqkv": wqkv, "wo": wo, "so": s, "bo": conv_bias * s}


def attention_forward(params, x):
    """PyTorch Attention.forward: x [B, dim, N] -> [B, dim, N]."""
    B, dim, N = x.shape
    H, D = params["heads"], params["dim_head"]
    inner = H * D

    # single channels-first -> channels-last transpose at the module boundary
    xt = jnp.transpose(x, (0, 2, 1)).reshape(B * N, dim)

    # to_qkv: bias-free Linear; identity BN affine dropped, scale folded into Wq
    qkv = matmul_affine(xt, params["wqkv"], out_dtype=jnp.bfloat16)   # [B*N, 3*inner]
    qkv = qkv.reshape(B, N, 3, H, D)
    q = jnp.transpose(qkv[:, :, 0], (0, 2, 1, 3))    # 'b n (h d) -> b h n d'
    k = jnp.transpose(qkv[:, :, 1], (0, 2, 1, 3))
    v = jnp.transpose(qkv[:, :, 2], (0, 2, 1, 3))

    out = attention_core(q, k, v)                    # [B, N, inner] == 'b n (h d)'

    # to_out: 1x1 Conv1d + BatchNorm1d (eval) fused into the matmul epilogue
    y = matmul_affine(out.reshape(B * N, inner), params["wo"],
                      params["so"], params["bo"], out_dtype=jnp.float32)
    return jnp.transpose(y.reshape(B, N, dim), (0, 2, 1))    # back to [B, dim, N]


# ----------------------------------------------------------------------------
if __name__ == "__main__":
    B, DIM, N_PTS = 2, 64, 128
    HEADS, DIM_HEAD = 4, 32          # as used by model22's TransformerBlock

    key = jax.random.PRNGKey(0)
    pkey, xkey = jax.random.split(key)
    params = make_attention_params(pkey, DIM, heads=HEADS, dim_head=DIM_HEAD)
    x = jax.random.normal(xkey, (B, DIM, N_PTS), jnp.float32)

    fwd = jax.jit(lambda inp: attention_forward(params, inp))
    out = jax.block_until_ready(fwd(x))

    assert out.shape == (B, DIM, N_PTS), out.shape
    assert bool(jnp.all(jnp.isfinite(out)))
    print("KERNEL_OK")
</pallas_src>

<mosaic_0001>
module attributes {stable_mosaic.version = 11 : i64} {
  func.func @_matmul_kernel(%arg0: i32, %arg1: i32, %arg2: i32, %arg3: memref<256x128xbf16, #tpu.memory_space<vmem>>, %arg4: memref<128x256xbf16, #tpu.memory_space<vmem>>, %arg5: memref<256x256xbf16, #tpu.memory_space<vmem>>, %arg6: memref<256x256xf32, #tpu.memory_space<vmem>>) attributes {dimension_semantics = [#tpu.dimension_semantics<parallel>, #tpu.dimension_semantics<parallel>, #tpu.dimension_semantics<arbitrary>], iteration_bounds = array<i64: 1, 2, 1>, scalar_prefetch = 0 : i64, scratch_operands = 1 : i64, tpu.core_type = #tpu.core_type<tc>, window_params = [{transform_indices = @transform_0, window_bounds = array<i64: 256, 128>}, {transform_indices = @transform_1, window_bounds = array<i64: 128, 256>}, {transform_indices = @transform_2, window_bounds = array<i64: 256, 256>}]} {
    %c0_i32 = arith.constant 0 : i32
    %0 = arith.cmpi eq, %arg2, %c0_i32 : i32
    %1 = arith.extui %0 : i1 to i32
    %c0_i32_0 = arith.constant 0 : i32
    %2 = arith.cmpi ne, %1, %c0_i32_0 : i32
    scf.if %2 {
      %cst_10 = arith.constant 0.000000e+00 : f32
      %12 = vector.broadcast %cst_10 : f32 to vector<256x256xf32>
      %c0_11 = arith.constant 0 : index
      %c0_12 = arith.constant 0 : index
      %13 = vector.load %arg6[%c0_11, %c0_12] : memref<256x256xf32, #tpu.memory_space<vmem>>, vector<256x256xf32>
      tpu.vector_store %arg6[%c0_11, %c0_12], %12 {strides = array<i32>} : memref<256x256xf32, #tpu.memory_space<vmem>>, vector<256x256xf32>,
    } else {
    }
    %c0 = arith.constant 0 : index
    %c0_1 = arith.constant 0 : index
    %3 = vector.load %arg6[%c0, %c0_1] : memref<256x256xf32, #tpu.memory_space<vmem>>, vector<256x256xf32>
    %c0_2 = arith.constant 0 : index
    %c0_3 = arith.constant 0 : index
    %4 = vector.load %arg3[%c0_2, %c0_3] : memref<256x128xbf16, #tpu.memory_space<vmem>>, vector<256x128xbf16>
    %c0_4 = arith.constant 0 : index
    %c0_5 = arith.constant 0 : index
    %5 = vector.load %arg4[%c0_4, %c0_5] : memref<128x256xbf16, #tpu.memory_space<vmem>>, vector<128x256xbf16>
    %cst = arith.constant dense<0.000000e+00> : vector<256x256xf32>
    %6 = tpu.matmul %4, %5, %cst {dimension_numbers = #tpu.dot_dimension_numbers<[1], [0], [0], [1], [0, 0, 1, 1], [], []>} : vector<256x128xbf16>, vector<128x256xbf16>, vector<256x256xf32> -> vector<256x256xf32>
    %7 = arith.addf %3, %6 : vector<256x256xf32>
    %c0_6 = arith.constant 0 : index
    %c0_7 = arith.constant 0 : index
    %8 = vector.load %arg6[%c0_6, %c0_7] : memref<256x256xf32, #tpu.memory_space<vmem>>, vector<256x256xf32>
    tpu.vector_store %arg6[%c0_6, %c0_7], %7 {strides = array<i32>} : memref<256x256xf32, #tpu.memory_space<vmem>>, vector<256x256xf32>,
    %c0_i32_8 = arith.constant 0 : i32
    %9 = arith.cmpi eq, %arg2, %c0_i32_8 : i32
    %10 = arith.extui %9 : i1 to i32
    %c0_i32_9 = arith.constant 0 : i32
    %11 = arith.cmpi ne, %10, %c0_i32_9 : i32
    scf.if %11 {
      %c0_10 = arith.constant 0 : index
      %c0_11 = arith.constant 0 : index
      %12 = vector.load %arg6[%c0_10, %c0_11] : memref<256x256xf32, #tpu.memory_space<vmem>>, vector<256x256xf32>
      %13 = arith.truncf %12 : vector<256x256xf32> to vector<256x256xbf16>
      %c0_12 = arith.constant 0 : index
      %c0_13 = arith.constant 0 : index
      %14 = vector.load %arg5[%c0_12, %c0_13] : memref<256x256xbf16, #tpu.memory_space<vmem>>, vector<256x256xbf16>
      tpu.vector_store %arg5[%c0_12, %c0_13], %13 {strides = array<i32>} : memref<256x256xbf16, #tpu.memory_space<vmem>>, vector<256x256xbf16>,
    } else {
    }
    return
  }
  func.func @transform_0(%arg0: i32, %arg1: i32, %arg2: i32) -> (i32, i32) {
    %c0_i32 = arith.constant 0 : i32
    return %arg0, %arg2 : i32, i32
  }
  func.func @transform_1(%arg0: i32, %arg1: i32, %arg2: i32) -> (i32, i32) {
    %c0_i32 = arith.constant 0 : i32
    return %arg2, %arg1 : i32, i32
  }
  func.func @transform_2(%arg0: i32, %arg1: i32, %arg2: i32) -> (i32, i32) {
    %c0_i32 = arith.constant 0 : i32
    return %arg0, %arg1 : i32, i32
  }
}

module attributes {stable_mosaic.version = 11 : i64} {
  func.func @_attention_kernel(%arg0: i32, %arg1: memref<1x4x128x32xbf16, #tpu.memory_space<vmem>>, %arg2: memref<1x4x128x32xbf16, #tpu.memory_space<vmem>>, %arg3: memref<1x4x128x32xbf16, #tpu.memory_space<vmem>>, %arg4: memref<1x128x128xbf16, #tpu.memory_space<vmem>>) attributes {dimension_semantics = [#tpu.dimension_semantics<parallel>], iteration_bounds = array<i64: 2>, scalar_prefetch = 0 : i64, scratch_operands = 0 : i64, tpu.core_type = #tpu.core_type<tc>, window_params = [{transform_indices = @transform_0, window_bounds = array<i64: 1, 4, 128, 32>}, {transform_indices = @transform_1, window_bounds = array<i64: 1, 4, 128, 32>}, {transform_indices = @transform_2, window_bounds = array<i64: 1, 4, 128, 32>}, {transform_indices = @transform_3, window_bounds = array<i64: 1, 128, 128>}]} {
    %c0 = arith.constant 0 : index
    %c0_0 = arith.constant 0 : index
    %c0_1 = arith.constant 0 : index
    %c0_2 = arith.constant 0 : index
    %0 = vector.load %arg1[%c0, %c0_0, %c0_1, %c0_2] : memref<1x4x128x32xbf16, #tpu.memory_space<vmem>>, vector<1x1x128x32xbf16>
    %1 = vector.shape_cast %0 : vector<1x1x128x32xbf16> to vector<128x32xbf16>
    %c0_3 = arith.constant 0 : index
    %c0_4 = arith.constant 0 : index
    %c0_5 = arith.constant 0 : index
    %c0_6 = arith.constant 0 : index
    %2 = vector.load %arg2[%c0_3, %c0_4, %c0_5, %c0_6] : memref<1x4x128x32xbf16, #tpu.memory_space<vmem>>, vector<1x1x128x32xbf16>
    %3 = vector.shape_cast %2 : vector<1x1x128x32xbf16> to vector<128x32xbf16>
    %c0_7 = arith.constant 0 : index
    %c0_8 = arith.constant 0 : index
    %c0_9 = arith.constant 0 : index
    %c0_10 = arith.constant 0 : index
    %4 = vector.load %arg3[%c0_7, %c0_8, %c0_9, %c0_10] : memref<1x4x128x32xbf16, #tpu.memory_space<vmem>>, vector<1x1x128x32xbf16>
    %5 = vector.shape_cast %4 : vector<1x1x128x32xbf16> to vector<128x32xbf16>
    %cst = arith.constant dense<0.000000e+00> : vector<128x128xf32>
    %6 = tpu.matmul %1, %3, %cst {dimension_numbers = #tpu.dot_dimension_numbers<[1], [1], [0], [0], [0, 0, 1, 0], [], []>} : vector<128x32xbf16>, vector<128x32xbf16>, vector<128x128xf32> -> vector<128x128xf32>
    %cst_11 = arith.constant dense<0xFF800000> : vector<128xf32>
    %7 = vector.multi_reduction <maximumf>, %6, %cst_11 [1] : vector<128x128xf32> to vector<128xf32>
    %8 = vector.shape_cast %7 : vector<128xf32> to vector<128x1xf32>
    %9 = vector.broadcast %8 : vector<128x1xf32> to vector<128x128xf32>
    %10 = arith.subf %6, %9 : vector<128x128xf32>
    %11 = math.exp %10 : vector<128x128xf32>
    %cst_12 = arith.constant dense<0.000000e+00> : vector<128xf32>
    %12 = vector.multi_reduction <add>, %11, %cst_12 [1] : vector<128x128xf32> to vector<128xf32>
    %13 = vector.shape_cast %12 : vector<128xf32> to vector<128x1xf32>
    %14 = arith.truncf %11 : vector<128x128xf32> to vector<128x128xbf16>
    %cst_13 = arith.constant dense<0.000000e+00> : vector<128x32xf32>
    %15 = tpu.matmul %14, %5, %cst_13 {dimension_numbers = #tpu.dot_dimension_numbers<[1], [0], [0], [1], [0, 0, 1, 1], [], []>} : vector<128x128xbf16>, vector<128x32xbf16>, vector<128x32xf32> -> vector<128x32xf32>
    %16 = tpu.reciprocal %13 {approx = true} : vector<128x1xf32> -> vector<128x1xf32>
    %17 = vector.broadcast %16 : vector<128x1xf32> to vector<128x32xf32>
    %18 = arith.mulf %15, %17 : vector<128x32xf32>
    %c0_14 = arith.constant 0 : index
    %c1 = arith.constant 1 : index
    %c0_15 = arith.constant 0 : index
    %c0_16 = arith.constant 0 : index
    %19 = vector.load %arg1[%c0_14, %c1, %c0_15, %c0_16] : memref<1x4x128x32xbf16, #tpu.memory_space<vmem>>, vector<1x1x128x32xbf16>
    %20 = vector.shape_cast %19 : vector<1x1x128x32xbf16> to vector<128x32xbf16>
    %c0_17 = arith.constant 0 : index
    %c1_18 = arith.constant 1 : index
    %c0_19 = arith.constant 0 : index
    %c0_20 = arith.constant 0 : index
    %21 = vector.load %arg2[%c0_17, %c1_18, %c0_19, %c0_20] : memref<1x4x128x32xbf16, #tpu.memory_space<vmem>>, vector<1x1x128x32xbf16>
    %22 = vector.shape_cast %21 : vector<1x1x128x32xbf16> to vector<128x32xbf16>
    %c0_21 = arith.constant 0 : index
    %c1_22 = arith.constant 1 : index
    %c0_23 = arith.constant 0 : index
    %c0_24 = arith.constant 0 : index
    %23 = vector.load %arg3[%c0_21, %c1_22, %c0_23, %c0_24] : memref<1x4x128x32xbf16, #tpu.memory_space<vmem>>, vector<1x1x128x32xbf16>
    %24 = vector.shape_cast %23 : vector<1x1x128x32xbf16> to vector<128x32xbf16>
    %cst_25 = arith.constant dense<0.000000e+00> : vector<128x128xf32>
    %25 = tpu.matmul %20, %22, %cst_25 {dimension_numbers = #tpu.dot_dimension_numbers<[1], [1], [0], [0], [0, 0, 1, 0], [], []>} : vector<128x32xbf16>, vector<128x32xbf16>, vector<128x128xf32> -> vector<128x128xf32>
    %cst_26 = arith.constant dense<0xFF800000> : vector<128xf32>
    %26 = vector.multi_reduction <maximumf>, %25, %cst_26 [1] : vector<128x128xf32> to vector<128xf32>
    %27 = vector.shape_cast %26 : vector<128xf32> to vector<128x1xf32>
    %28 = vector.broadcast %27 : vector<128x1xf32> to vector<128x128xf32>
    %29 = arith.subf %25, %28 : vector<128x128xf32>
    %30 = math.exp %29 : vector<128x128xf32>
    %cst_27 = arith.constant dense<0.000000e+00> : vector<128xf32>
    %31 = vector.multi_reduction <add>, %30, %cst_27 [1] : vector<128x128xf32> to vector<128xf32>
    %32 = vector.shape_cast %31 : vector<128xf32> to vector<128x1xf32>
    %33 = arith.truncf %30 : vector<128x128xf32> to vector<128x128xbf16>
    %cst_28 = arith.constant dense<0.000000e+00> : vector<128x32xf32>
    %34 = tpu.matmul %33, %24, %cst_28 {dimension_numbers = #tpu.dot_dimension_numbers<[1], [0], [0], [1], [0, 0, 1, 1], [], []>} : vector<128x128xbf16>, vector<128x32xbf16>, vector<128x32xf32> -> vector<128x32xf32>
    %35 = tpu.reciprocal %32 {approx = true} : vector<128x1xf32> -> vector<128x1xf32>
    %36 = vector.broadcast %35 : vector<128x1xf32> to vector<128x32xf32>
    %37 = arith.mulf %34, %36 : vector<128x32xf32>
    %c0_29 = arith.constant 0 : index
    %c2 = arith.constant 2 : index
    %c0_30 = arith.constant 0 : index
    %c0_31 = arith.constant 0 : index
    %38 = vector.load %arg1[%c0_29, %c2, %c0_30, %c0_31] : memref<1x4x128x32xbf16, #tpu.memory_space<vmem>>, vector<1x1x128x32xbf16>
    %39 = vector.shape_cast %38 : vector<1x1x128x32xbf16> to vector<128x32xbf16>
    %c0_32 = arith.constant 0 : index
    %c2_33 = arith.constant 2 : index
    %c0_34 = arith.constant 0 : index
    %c0_35 = arith.constant 0 : index
    %40 = vector.load %arg2[%c0_32, %c2_33, %c0_34, %c0_35] : memref<1x4x128x32xbf16, #tpu.memory_space<vmem>>, vector<1x1x128x32xbf16>
    %41 = vector.shape_cast %40 : vector<1x1x128x32xbf16> to vector<128x32xbf16>
    %c0_36 = arith.constant 0 : index
    %c2_37 = arith.constant 2 : index
    %c0_38 = arith.constant 0 : index
    %c0_39 = arith.constant 0 : index
    %42 = vector.load %arg3[%c0_36, %c2_37, %c0_38, %c0_39] : memref<1x4x128x32xbf16, #tpu.memory_space<vmem>>, vector<1x1x128x32xbf16>
    %43 = vector.shape_cast %42 : vector<1x1x128x32xbf16> to vector<128x32xbf16>
    %cst_40 = arith.constant dense<0.000000e+00> : vector<128x128xf32>
    %44 = tpu.matmul %39, %41, %cst_40 {dimension_numbers = #tpu.dot_dimension_numbers<[1], [1], [0], [0], [0, 0, 1, 0], [], []>} : vector<128x32xbf16>, vector<128x32xbf16>, vector<128x128xf32> -> vector<128x128xf32>
    %cst_41 = arith.constant dense<0xFF800000> : vector<128xf32>
    %45 = vector.multi_reduction <maximumf>, %44, %cst_41 [1] : vector<128x128xf32> to vector<128xf32>
    %46 = vector.shape_cast %45 : vector<128xf32> to vector<128x1xf32>
    %47 = vector.broadcast %46 : vector<128x1xf32> to vector<128x128xf32>
    %48 = arith.subf %44, %47 : vector<128x128xf32>
    %49 = math.exp %48 : vector<128x128xf32>
    %cst_42 = arith.constant dense<0.000000e+00> : vector<128xf32>
    %50 = vector.multi_reduction <add>, %49, %cst_42 [1] : vector<128x128xf32> to vector<128xf32>
    %51 = vector.shape_cast %50 : vector<128xf32> to vector<128x1xf32>
    %52 = arith.truncf %49 : vector<128x128xf32> to vector<128x128xbf16>
    %cst_43 = arith.constant dense<0.000000e+00> : vector<128x32xf32>
    %53 = tpu.matmul %52, %43, %cst_43 {dimension_numbers = #tpu.dot_dimension_numbers<[1], [0], [0], [1], [0, 0, 1, 1], [], []>} : vector<128x128xbf16>, vector<128x32xbf16>, vector<128x32xf32> -> vector<128x32xf32>
    %54 = tpu.reciprocal %51 {approx = true} : vector<128x1xf32> -> vector<128x1xf32>
    %55 = vector.broadcast %54 : vector<128x1xf32> to vector<128x32xf32>
    %56 = arith.mulf %53, %55 : vector<128x32xf32>
    %c0_44 = arith.constant 0 : index
    %c3 = arith.constant 3 : index
    %c0_45 = arith.constant 0 : index
    %c0_46 = arith.constant 0 : index
    %57 = vector.load %arg1[%c0_44, %c3, %c0_45, %c0_46] : memref<1x4x128x32xbf16, #tpu.memory_space<vmem>>, vector<1x1x128x32xbf16>
    %58 = vector.shape_cast %57 : vector<1x1x128x32xbf16> to vector<128x32xbf16>
    %c0_47 = arith.constant 0 : index
    %c3_48 = arith.constant 3 : index
    %c0_49 = arith.constant 0 : index
    %c0_50 = arith.constant 0 : index
    %59 = vector.load %arg2[%c0_47, %c3_48, %c0_49, %c0_50] : memref<1x4x128x32xbf16, #tpu.memory_space<vmem>>, vector<1x1x128x32xbf16>
    %60 = vector.shape_cast %59 : vector<1x1x128x32xbf16> to vector<128x32xbf16>
    %c0_51 = arith.constant 0 : index
    %c3_52 = arith.constant 3 : index
    %c0_53 = arith.constant 0 : index
    %c0_54 = arith.constant 0 : index
    %61 = vector.load %arg3[%c0_51, %c3_52, %c0_53, %c0_54] : memref<1x4x128x32xbf16, #tpu.memory_space<vmem>>, vector<1x1x128x32xbf16>
    %62 = vector.shape_cast %61 : vector<1x1x128x32xbf16> to vector<128x32xbf16>
    %cst_55 = arith.constant dense<0.000000e+00> : vector<128x128xf32>
    %63 = tpu.matmul %58, %60, %cst_55 {dimension_numbers = #tpu.dot_dimension_numbers<[1], [1], [0], [0], [0, 0, 1, 0], [], []>} : vector<128x32xbf16>, vector<128x32xbf16>, vector<128x128xf32> -> vector<128x128xf32>
    %cst_56 = arith.constant dense<0xFF800000> : vector<128xf32>
    %64 = vector.multi_reduction <maximumf>, %63, %cst_56 [1] : vector<128x128xf32> to vector<128xf32>
    %65 = vector.shape_cast %64 : vector<128xf32> to vector<128x1xf32>
    %66 = vector.broadcast %65 : vector<128x1xf32> to vector<128x128xf32>
    %67 = arith.subf %63, %66 : vector<128x128xf32>
    %68 = math.exp %67 : vector<128x128xf32>
    %cst_57 = arith.constant dense<0.000000e+00> : vector<128xf32>
    %69 = vector.multi_reduction <add>, %68, %cst_57 [1] : vector<128x128xf32> to vector<128xf32>
    %70 = vector.shape_cast %69 : vector<128xf32> to vector<128x1xf32>
    %71 = arith.truncf %68 : vector<128x128xf32> to vector<128x128xbf16>
    %cst_58 = arith.constant dense<0.000000e+00> : vector<128x32xf32>
    %72 = tpu.matmul %71, %62, %cst_58 {dimension_numbers = #tpu.dot_dimension_numbers<[1], [0], [0], [1], [0, 0, 1, 1], [], []>} : vector<128x128xbf16>, vector<128x32xbf16>, vector<128x32xf32> -> vector<128x32xf32>
    %73 = tpu.reciprocal %70 {approx = true} : vector<128x1xf32> -> vector<128x1xf32>
    %74 = vector.broadcast %73 : vector<128x1xf32> to vector<128x32xf32>
    %75 = arith.mulf %72, %74 : vector<128x32xf32>
    %76 = tpu.concatenate %18, %37, %56, %75 in 1 : vector<128x32xf32>, vector<128x32xf32>, vector<128x32xf32>, vector<128x32xf32> -> vector<128x128xf32>
    %77 = arith.truncf %76 : vector<128x128xf32> to vector<128x128xbf16>
    %c0_59 = arith.constant 0 : index
    %c0_60 = arith.constant 0 : index
    %c0_61 = arith.constant 0 : index
    %78 = vector.load %arg4[%c0_59, %c0_60, %c0_61] : memref<1x128x128xbf16, #tpu.memory_space<vmem>>, vector<1x128x128xbf16>
    %79 = vector.shape_cast %78 : vector<1x128x128xbf16> to vector<128x128xbf16>
    %80 = vector.shape_cast %77 : vector<128x128xbf16> to vector<1x128x128xbf16>
    tpu.vector_store %arg4[%c0_59, %c0_60, %c0_61], %80 {strides = array<i32>} : memref<1x128x128xbf16, #tpu.memory_space<vmem>>, vector<1x128x128xbf16>,
    return
  }
  func.func @transform_0(%arg0: i32) -> (i32, i32, i32, i32) {
    %c0_i32 = arith.constant 0 : i32
    %c0_i32_0 = arith.constant 0 : i32
    %c0_i32_1 = arith.constant 0 : i32
    %c0_i32_2 = arith.constant 0 : i32
    return %arg0, %c0_i32, %c0_i32_0, %c0_i32_1 : i32, i32, i32, i32
  }
  func.func @transform_1(%arg0: i32) -> (i32, i32, i32, i32) {
    %c0_i32 = arith.constant 0 : i32
    %c0_i32_0 = arith.constant 0 : i32
    %c0_i32_1 = arith.constant 0 : i32
    %c0_i32_2 = arith.constant 0 : i32
    return %arg0, %c0_i32, %c0_i32_0, %c0_i32_1 : i32, i32, i32, i32
  }
  func.func @transform_2(%arg0: i32) -> (i32, i32, i32, i32) {
    %c0_i32 = arith.constant 0 : i32
    %c0_i32_0 = arith.constant 0 : i32
    %c0_i32_1 = arith.constant 0 : i32
    %c0_i32_2 = arith.constant 0 : i32
    return %arg0, %c0_i32, %c0_i32_0, %c0_i32_1 : i32, i32, i32, i32
  }
  func.func @transform_3(%arg0: i32) -> (i32, i32, i32) {
    %c0_i32 = arith.constant 0 : i32
    %c0_i32_0 = arith.constant 0 : i32
    %c0_i32_1 = arith.constant 0 : i32
    return %arg0, %c0_i32, %c0_i32_0 : i32, i32, i32
  }
}

module attributes {stable_mosaic.version = 11 : i64} {
  func.func @_matmul_kernel(%arg0: i32, %arg1: i32, %arg2: i32, %arg3: memref<256x128xbf16, #tpu.memory_space<vmem>>, %arg4: memref<128x128xbf16, #tpu.memory_space<vmem>>, %arg5: memref<1x128xf32, #tpu.memory_space<vmem>>, %arg6: memref<1x128xf32, #tpu.memory_space<vmem>>, %arg7: memref<256x128xf32, #tpu.memory_space<vmem>>, %arg8: memref<256x128xf32, #tpu.memory_space<vmem>>) attributes {dimension_semantics = [#tpu.dimension_semantics<parallel>, #tpu.dimension_semantics<parallel>, #tpu.dimension_semantics<arbitrary>], iteration_bounds = array<i64: 1, 1, 1>, scalar_prefetch = 0 : i64, scratch_operands = 1 : i64, tpu.core_type = #tpu.core_type<tc>, window_params = [{transform_indices = @transform_0, window_bounds = array<i64: 256, 128>}, {transform_indices = @transform_1, window_bounds = array<i64: 128, 128>}, {transform_indices = @transform_2, window_bounds = array<i64: 1, 128>}, {transform_indices = @transform_3, window_bounds = array<i64: 1, 128>}, {transform_indices = @transform_4, window_bounds = array<i64: 256, 128>}]} {
    %c0_i32 = arith.constant 0 : i32
    %0 = arith.cmpi eq, %arg2, %c0_i32 : i32
    %1 = arith.extui %0 : i1 to i32
    %c0_i32_0 = arith.constant 0 : i32
    %2 = arith.cmpi ne, %1, %c0_i32_0 : i32
    scf.if %2 {
      %cst_10 = arith.constant 0.000000e+00 : f32
      %12 = vector.broadcast %cst_10 : f32 to vector<256x128xf32>
      %c0_11 = arith.constant 0 : index
      %c0_12 = arith.constant 0 : index
      %13 = vector.load %arg8[%c0_11, %c0_12] : memref<256x128xf32, #tpu.memory_space<vmem>>, vector<256x128xf32>
      tpu.vector_store %arg8[%c0_11, %c0_12], %12 {strides = array<i32>} : memref<256x128xf32, #tpu.memory_space<vmem>>, vector<256x128xf32>,
    } else {
    }
    %c0 = arith.constant 0 : index
    %c0_1 = arith.constant 0 : index
    %3 = vector.load %arg8[%c0, %c0_1] : memref<256x128xf32, #tpu.memory_space<vmem>>, vector<256x128xf32>
    %c0_2 = arith.constant 0 : index
    %c0_3 = arith.constant 0 : index
    %4 = vector.load %arg3[%c0_2, %c0_3] : memref<256x128xbf16, #tpu.memory_space<vmem>>, vector<256x128xbf16>
    %c0_4 = arith.constant 0 : index
    %c0_5 = arith.constant 0 : index
    %5 = vector.load %arg4[%c0_4, %c0_5] : memref<128x128xbf16, #tpu.memory_space<vmem>>, vector<128x128xbf16>
    %cst = arith.constant dense<0.000000e+00> : vector<256x128xf32>
    %6 = tpu.matmul %4, %5, %cst {dimension_numbers = #tpu.dot_dimension_numbers<[1], [0], [0], [1], [0, 0, 1, 1], [], []>} : vector<256x128xbf16>, vector<128x128xbf16>, vector<256x128xf32> -> vector<256x128xf32>
    %7 = arith.addf %3, %6 : vector<256x128xf32>
    %c0_6 = arith.constant 0 : index
    %c0_7 = arith.constant 0 : index
    %8 = vector.load %arg8[%c0_6, %c0_7] : memref<256x128xf32, #tpu.memory_space<vmem>>, vector<256x128xf32>
    tpu.vector_store %arg8[%c0_6, %c0_7], %7 {strides = array<i32>} : memref<256x128xf32, #tpu.memory_space<vmem>>, vector<256x128xf32>,
    %c0_i32_8 = arith.constant 0 : i32
    %9 = arith.cmpi eq, %arg2, %c0_i32_8 : i32
    %10 = arith.extui %9 : i1 to i32
    %c0_i32_9 = arith.constant 0 : i32
    %11 = arith.cmpi ne, %10, %c0_i32_9 : i32
    scf.if %11 {
      %c0_10 = arith.constant 0 : index
      %c0_11 = arith.constant 0 : index
      %12 = vector.load %arg8[%c0_10, %c0_11] : memref<256x128xf32, #tpu.memory_space<vmem>>, vector<256x128xf32>
      %c0_12 = arith.constant 0 : index
      %c0_13 = arith.constant 0 : index
      %13 = vector.load %arg5[%c0_12, %c0_13] : memref<1x128xf32, #tpu.memory_space<vmem>>, vector<1x128xf32>
      %14 = vector.broadcast %13 : vector<1x128xf32> to vector<256x128xf32>
      %15 = arith.mulf %12, %14 : vector<256x128xf32>
      %c0_14 = arith.constant 0 : index
      %c0_15 = arith.constant 0 : index
      %16 = vector.load %arg6[%c0_14, %c0_15] : memref<1x128xf32, #tpu.memory_space<vmem>>, vector<1x128xf32>
      %17 = vector.broadcast %16 : vector<1x128xf32> to vector<256x128xf32>
      %18 = arith.addf %15, %17 : vector<256x128xf32>
      %c0_16 = arith.constant 0 : index
      %c0_17 = arith.constant 0 : index
      %19 = vector.load %arg7[%c0_16, %c0_17] : memref<256x128xf32, #tpu.memory_space<vmem>>, vector<256x128xf32>
      tpu.vector_store %arg7[%c0_16, %c0_17], %18 {strides = array<i32>} : memref<256x128xf32, #tpu.memory_space<vmem>>, vector<256x128xf32>,
    } else {
    }
    return
  }
  func.func @transform_0(%arg0: i32, %arg1: i32, %arg2: i32) -> (i32, i32) {
    %c0_i32 = arith.constant 0 : i32
    return %arg0, %arg2 : i32, i32
  }
  func.func @transform_1(%arg0: i32, %arg1: i32, %arg2: i32) -> (i32, i32) {
    %c0_i32 = arith.constant 0 : i32
    return %arg2, %arg1 : i32, i32
  }
  func.func @transform_2(%arg0: i32, %arg1: i32, %arg2: i32) -> (i32, i32) {
    %c0_i32 = arith.constant 0 : i32
    %c0_i32_0 = arith.constant 0 : i32
    return %c0_i32, %arg1 : i32, i32
  }
  func.func @transform_3(%arg0: i32, %arg1: i32, %arg2: i32) -> (i32, i32) {
    %c0_i32 = arith.constant 0 : i32
    %c0_i32_0 = arith.constant 0 : i32
    return %c0_i32, %arg1 : i32, i32
  }
  func.func @transform_4(%arg0: i32, %arg1: i32, %arg2: i32) -> (i32, i32) {
    %c0_i32 = arith.constant 0 : i32
    return %arg0, %arg1 : i32, i32
  }
}

</mosaic_0001>

<bundles_post_ra>
// kernel: _lambda_.3
= control target key start
LH: loop header
LB: loop body
LE: loop exit
PB: predicated region body
PF: predicated region fallthrough
CT: control target
= control target key end

     0   :  { %s1795_s9 = smov 0   ;;  %s1797_s10 = smov 0   ;;  %s2071_s0 = inlined_call_operand.vmem [shape: bf16[256,128], index: 0, kind: input, shape index: {}]   ;;  %s2072_s1 = inlined_call_operand.vmem [shape: bf16[128,512], index: 1, kind: input, shape index: {}]   ;;  %s2073_s2 = inlined_call_operand.vmem [shape: bf16[256,512], index: 2, kind: output, shape index: {}]  }
   0x1   :  { %s1799_s11 = smov 0   ;;  %s1801_s12 = smov 0  }
   0x2   :  { %s1803_s13 = smov 0  }
   0x3 LB: > { %s27_s14 = sadd.s32 1, %s1773_s12  ;;  %s1528_s15 = sadd.s32 4294967295, %s1777_s13   ;;  %s1777_s13 = sphi %s1803_s13, %s12_s13   ;;  %s1773_s12 = sphi %s1801_s12, %s2078_s12   ;;  %s1769_s11 = sphi %s1799_s11, %s2077_s11   ;;  %s1765_s10 = sphi %s1797_s10, %s2076_s10   ;;  %s1761_s9 = sphi %s1795_s9, %s2075_s9  }
   0x4   : > { %p29_p0 = scmp.ge.s32.totalorder %s27_s14, 2  ;;  %p75_p1 = scmp.ne.s32.totalorder %s1765_s10, %s1761_s9 }
   0x5   : > { %p76_p2 = scmp.eq.s32.totalorder %s1777_s13, 0  ;;  %p107_p4 = scmp.eq.s32.totalorder %s1528_s15, 1 }
   0x6   : > { %s2080_s14 = smov (%p29_p0, %s27_s14), 0  ;;  %s68_s17 = sadd.s32 1, %s1765_s10 }
   0x7   : > { %p77_p3 = por %p76_p2, %p75_p1  ;;  %s64_s16 = ssub.s32 %s1773_s12, %s2080_s14 }
   0x8   : > { %p66_p5 = scmp.eq.s32.totalorder %s64_s16, 0  ;;  %p1830_p6 = por %p107_p4, %p75_p1 }
   0x9   : > { %p1532_p7 = scmp.ge.s32.totalorder %s1777_s13, 2 }
   0xa   : > { %s1835_s19 = scalar_select %p66_p5, %s1765_s10, %s68_s17  }
   0xb   : > { %141 = sbr.rel (%p1532_p7) target bundleno = 28 (0x1c), region = 20 }
  0x10   : > { %144 = sbr.rel (!%p77_p3) target bundleno = 28 (0x1c), region = 24  ;;  %s146_s20 = sand.u32 (%p77_p3), 1, %s1765_s10  }
  0x11   : > { %s1608_s21 = sshll.u32 (%p77_p3), %s1773_s12, 3  ;;  %s1533_s22 = sshll.u32 (%p77_p3), %s146_s20, 7 }
  0x12   : > { %s1843_s25 = scalar_lea.vmem (%p77_p3), %s2072_s1, %s1608_s21  ;;  %s148_s26 = scalar_lea.vmem (%p77_p3), [#allocation3], %s1533_s22 }
  0x13   : > { %v213_v0 = vld [vmem:[%s1843_s25] sm:$0xff] (%p77_p3)  ;;  %v215_v1 = vld [vmem:[%s1843_s25 + $0x10] sm:$0xff] (%p77_p3) }
  0x14   : > { %v217_v2 = vld [vmem:[%s1843_s25 + $0x20] sm:$0xff] (%p77_p3)  ;;  %214 = vst [vmem:[%s148_s26] sm:$0xff] (%p77_p3), %v213_v0  ;;  %216 = vst [vmem:[%s148_s26 + $0x8] sm:$0xff] (%p77_p3), %v215_v1  ;;  %v219_v3 = vld [vmem:[%s1843_s25 + $0x30] sm:$0xff] (%p77_p3) }
  0x15   : > { %218 = vst [vmem:[%s148_s26 + $0x10] sm:$0xff] %v217_v2  ;;  %v221_v4 = vld [vmem:[%s1843_s25 + $0x40] sm:$0xff]  ;;  %v223_v5 = vld [vmem:[%s1843_s25 + $0x50] sm:$0xff]  ;;  %220 = vst [vmem:[%s148_s26 + $0x18] sm:$0xff] %v219_v3 }
  0x16   : > { %222 = vst [vmem:[%s148_s26 + $0x20] sm:$0xff] %v221_v4  ;;  %224 = vst [vmem:[%s148_s26 + $0x28] sm:$0xff] %v223_v5  ;;  %v225_v6 = vld [vmem:[%s1843_s25 + $0x60] sm:$0xff]  ;;  %v227_v7 = vld [vmem:[%s1843_s25 + $0x70] sm:$0xff] }
  0x17   : > { %v229_v8 = vld [vmem:[%s1843_s25 + $0x80] sm:$0xff]  ;;  %226 = vst [vmem:[%s148_s26 + $0x30] sm:$0xff] %v225_v6  ;;  %228 = vst [vmem:[%s148_s26 + $0x38] sm:$0xff] %v227_v7  ;;  %v231_v9 = vld [vmem:[%s1843_s25 + $0x90] sm:$0xff] }
  0x18   : > { %230 = vst [vmem:[%s148_s26 + $0x40] sm:$0xff] %v229_v8  ;;  %v233_v10 = vld [vmem:[%s1843_s25 + $0xa0] sm:$0xff]  ;;  %v235_v11 = vld [vmem:[%s1843_s25 + $0xb0] sm:$0xff]  ;;  %232 = vst [vmem:[%s148_s26 + $0x48] sm:$0xff] %v231_v9 }
  0x19   : > { %234 = vst [vmem:[%s148_s26 + $0x50] sm:$0xff] %v233_v10  ;;  %236 = vst [vmem:[%s148_s26 + $0x58] sm:$0xff] %v235_v11  ;;  %v237_v12 = vld [vmem:[%s1843_s25 + $0xc0] sm:$0xff]  ;;  %v239_v13 = vld [vmem:[%s1843_s25 + $0xd0] sm:$0xff] }
  0x1a   : > { %v241_v14 = vld [vmem:[%s1843_s25 + $0xe0] sm:$0xff]  ;;  %238 = vst [vmem:[%s148_s26 + $0x60] sm:$0xff] %v237_v12  ;;  %240 = vst [vmem:[%s148_s26 + $0x68] sm:$0xff] %v239_v13  ;;  %v243_v15 = vld [vmem:[%s1843_s25 + $0xf0] sm:$0xff] }
  0x1b   : > { %242 = vst [vmem:[%s148_s26 + $0x70] sm:$0xff] %v241_v14  ;;  %244 = vst [vmem:[%s148_s26 + $0x78] sm:$0xff] %v243_v15 }
  0x1c PF: > { %p1536_p8 = scmp.ge.s32.totalorder %s1777_s13, 1  ;;  %p249_p9 = scmp.lt.s32.totalorder %s1777_s13, 3 }
  0x1e   : > { %p250_p10 = pnand %p1536_p8, %p249_p9 }
  0x1f   : > { %s256_s27 = sand.u32 (!%p250_p10), 1, %s1761_s9  }
  0x20   : > { %253 = sbr.rel (%p250_p10) target bundleno = 338 (0x152), region = 62  ;;  %s1537_s28 = sshll.u32 (!%p250_p10), %s256_s27, 7 }
  0x21   : > { %s1868_s29 = scalar_lea.vmem (!%p250_p10), [#allocation3], %s1537_s28  ;;  %s1538_s23 = sshll.u32 (!%p250_p10), %s256_s27, 8 }
  0x22   : > { %s1950_s24 = scalar_lea.vmem (!%p250_p10), [#allocation4], %s1538_s23 }
  0x25   : > { %v1779_v16 = vmov 0   ;;  %v1699_v17 = vld [vmem:[%s1868_s29 + $0x74] ss:$8 sps:$4 sm:$0xff]   ;;  %v1701_v18 = vld [vmem:[%s1868_s29 + $0x70] ss:$8 sps:$4 sm:$0xff]   ;;  %v1723_v33 = vld [vmem:[%s2071_s0] sm:$0xff]  }
  0x26   : > { %686 = vmatprep.mubr.bf16.mxu0 %v1779_v16  ;;  %766 = vmatprep.mubr.bf16.mxu1 %v1779_v16  ;;  %v1702_v19 = vld [vmem:[%s1868_s29 + $0x64] ss:$8 sps:$4 sm:$0xff]   ;;  %v1704_v20 = vld [vmem:[%s1868_s29 + $0x60] ss:$8 sps:$4 sm:$0xff]   ;;  %v1705_v21 = vld [vmem:[%s1868_s29 + $0x54] ss:$8 sps:$4 sm:$0xff]  }
  0x27   : > { %654 = vmatprep.subr.bf16.mxu0 %v1699_v17  ;;  %1642 = vmatprep.subr.bf16.mxu1 %v1699_v17  ;;  %v1707_v22 = vld [vmem:[%s1868_s29 + $0x50] ss:$8 sps:$4 sm:$0xff]   ;;  %v1708_v23 = vld [vmem:[%s1868_s29 + $0x44] ss:$8 sps:$4 sm:$0xff]   ;;  %v1710_v24 = vld [vmem:[%s1868_s29 + $0x40] ss:$8 sps:$4 sm:$0xff]  }
  0x28   : > { %655 = vmatpush1.bf16.msra.mxu0 %v1701_v18  ;;  %1650 = vmatpush1.bf16.msra.mxu1 %v1701_v18  ;;  %v1711_v25 = vld [vmem:[%s1868_s29 + $0x34] ss:$8 sps:$4 sm:$0xff]   ;;  %v1713_v26 = vld [vmem:[%s1868_s29 + $0x30] ss:$8 sps:$4 sm:$0xff]   ;;  %v1714_v27 = vld [vmem:[%s1868_s29 + $0x24] ss:$8 sps:$4 sm:$0xff]  }
  0x29   : > { %656 = vmatprep.subr.bf16.mxu0 %v1702_v19  ;;  %1643 = vmatprep.subr.bf16.mxu1 %v1702_v19  ;;  %v1716_v28 = vld [vmem:[%s1868_s29 + $0x20] ss:$8 sps:$4 sm:$0xff]   ;;  %v1717_v29 = vld [vmem:[%s1868_s29 + $0x14] ss:$8 sps:$4 sm:$0xff]   ;;  %v1719_v30 = vld [vmem:[%s1868_s29 + $0x10] ss:$8 sps:$4 sm:$0xff]  }
  0x2a   : > { %v1720_v31 = vld [vmem:[%s1868_s29 + $0x4] ss:$8 sps:$4 sm:$0xff]   ;;  %v1722_v32 = vld [vmem:[%s1868_s29] ss:$8 sps:$4 sm:$0xff]   ;;  %v1727_v37 = vld [vmem:[%s2071_s0 + $0x10] sm:$0xff]   ;;  %s1641_s9 = sshll.u32 (%p1830_p6), %s1769_s11, 3 }
  0x2b   : > { %v1724_v34 = vld [vmem:[%s2071_s0 + $0x40] sm:$0xff]   ;;  %v1725_v35 = vld [vmem:[%s2071_s0 + $0x8] sm:$0xff]   ;;  %v1728_v38 = vld [vmem:[%s2071_s0 + $0x50] sm:$0xff]   ;;  %s1993_s26 = scalar_lea.vmem (%p1830_p6), %s2073_s2, %s1641_s9 }
  0x2c   : > { %657 = vmatpush1.bf16.msra.mxu0 %v1704_v20  ;;  %1651 = vmatpush1.bf16.msra.mxu1 %v1704_v20  ;;  %v1726_v36 = vld [vmem:[%s2071_s0 + $0x48] sm:$0xff]   ;;  %v1729_v39 = vld [vmem:[%s2071_s0 + $0x18] sm:$0xff]   ;;  %v1731_v41 = vld [vmem:[%s2071_s0 + $0x20] sm:$0xff]  }
  0x2d   : > { %658 = vmatprep.subr.bf16.mxu0 %v1705_v21  ;;  %1644 = vmatprep.subr.bf16.mxu1 %v1705_v21  ;;  %v1730_v40 = vld [vmem:[%s2071_s0 + $0x58] sm:$0xff]   ;;  %v1732_v42 = vld [vmem:[%s2071_s0 + $0x60] sm:$0xff]   ;;  %v1733_v43 = vld [vmem:[%s2071_s0 + $0x28] sm:$0xff]  }
  0x2e   : > { %v1734_v44 = vld [vmem:[%s2071_s0 + $0x68] sm:$0xff]   ;;  %v1735_v45 = vld [vmem:[%s2071_s0 + $0x30] sm:$0xff]   ;;  %v1737_v47 = vld [vmem:[%s2071_s0 + $0x38] sm:$0xff]  }
  0x2f   : > { %v1736_v46 = vld [vmem:[%s2071_s0 + $0x70] sm:$0xff]   ;;  %v1738_v48 = vld [vmem:[%s2071_s0 + $0x78] sm:$0xff]  }
  0x30   : > { %659 = vmatpush1.bf16.msra.mxu0 %v1707_v22  ;;  %1652 = vmatpush1.bf16.msra.mxu1 %v1707_v22 }
  0x31   : > { %660 = vmatprep.subr.bf16.mxu0 %v1708_v23  ;;  %1645 = vmatprep.subr.bf16.mxu1 %v1708_v23 }
  0x34   : > { %661 = vmatpush1.bf16.msra.mxu0 %v1710_v24  ;;  %1653 = vmatpush1.bf16.msra.mxu1 %v1710_v24 }
  0x35   : > { %662 = vmatprep.subr.bf16.mxu0 %v1711_v25  ;;  %1646 = vmatprep.subr.bf16.mxu1 %v1711_v25 }
  0x38   : > { %663 = vmatpush1.bf16.msra.mxu0 %v1713_v26  ;;  %1654 = vmatpush1.bf16.msra.mxu1 %v1713_v26 }
  0x39   : > { %664 = vmatprep.subr.bf16.mxu0 %v1714_v27  ;;  %1647 = vmatprep.subr.bf16.mxu1 %v1714_v27 }
  0x3c   : > { %665 = vmatpush1.bf16.msra.mxu0 %v1716_v28  ;;  %1655 = vmatpush1.bf16.msra.mxu1 %v1716_v28 }
  0x3d   : > { %666 = vmatprep.subr.bf16.mxu0 %v1717_v29  ;;  %1648 = vmatprep.subr.bf16.mxu1 %v1717_v29 }
  0x40   : > { %667 = vmatpush1.bf16.msra.mxu0 %v1719_v30  ;;  %1656 = vmatpush1.bf16.msra.mxu1 %v1719_v30 }
  0x41   : > { %668 = vmatprep.subr.bf16.mxu0 %v1720_v31  ;;  %1649 = vmatprep.subr.bf16.mxu1 %v1720_v31 }
  0x44   : > { %669 = vmatpush1.bf16.msra.mxu0 %v1722_v32  ;;  %1657 = vmatpush1.bf16.msra.mxu1 %v1722_v32 }
  0x47   : > { %687 = vmatmul.mubr.bf16.vlgmr.msra.gmra.mxu0 %v1723_v33  ;;  %767 = vmatmul.mubr.bf16.vlgmr.msra.gmra.mxu1 %v1724_v34 }
  0x48   : > { %696 = vmatprep.mubr.bf16.mxu0 %v1779_v16  ;;  %776 = vmatprep.mubr.bf16.mxu1 %v1779_v16 }
  0x4f   : > { %697 = vmatmul.mubr.bf16.gmra.mxu0 %v1725_v35  ;;  %777 = vmatmul.mubr.bf16.gmra.mxu1 %v1726_v36 }
  0x50   : > { %706 = vmatprep.mubr.bf16.mxu0 %v1779_v16  ;;  %786 = vmatprep.mubr.bf16.mxu1 %v1779_v16 }
  0x57   : > { %707 = vmatmul.mubr.bf16.gmra.mxu0 %v1727_v37  ;;  %787 = vmatmul.mubr.bf16.gmra.mxu1 %v1728_v38 }
  0x58   : > { %716 = vmatprep.mubr.bf16.mxu0 %v1779_v16  ;;  %796 = vmatprep.mubr.bf16.mxu1 %v1779_v16 }
  0x5f   : > { %717 = vmatmul.mubr.bf16.gmra.mxu0 %v1729_v39  ;;  %797 = vmatmul.mubr.bf16.gmra.mxu1 %v1730_v40 }
  0x60   : > { %726 = vmatprep.mubr.bf16.mxu0 %v1779_v16  ;;  %806 = vmatprep.mubr.bf16.mxu1 %v1779_v16 }
  0x67   : > { %727 = vmatmul.mubr.bf16.gmra.mxu0 %v1731_v41  ;;  %807 = vmatmul.mubr.bf16.gmra.mxu1 %v1732_v42 }
  0x68   : > { %736 = vmatprep.mubr.bf16.mxu0 %v1779_v16  ;;  %816 = vmatprep.mubr.bf16.mxu1 %v1779_v16 }
  0x6f   : > { %737 = vmatmul.mubr.bf16.gmra.mxu0 %v1733_v43  ;;  %817 = vmatmul.mubr.bf16.gmra.mxu1 %v1734_v44 }
  0x70   : > { %746 = vmatprep.mubr.bf16.mxu0 %v1779_v16  ;;  %826 = vmatprep.mubr.bf16.mxu1 %v1779_v16 }
  0x77   : > { %747 = vmatmul.mubr.bf16.gmra.mxu0 %v1735_v45  ;;  %827 = vmatmul.mubr.bf16.gmra.mxu1 %v1736_v46 }
  0x78   : > { %756 = vmatprep.mubr.bf16.mxu0 %v1779_v16  ;;  %836 = vmatprep.mubr.bf16.mxu1 %v1779_v16 }
  0x7f   : > { %757 = vmatmul.mubr.bf16.gmra.mxu0 %v1737_v47  ;;  %837 = vmatmul.mubr.bf16.gmra.mxu1 %v1738_v48 }
 0x107   : > { %v688_v49 = vpop.f32.mrf.mxu0  ;;  %v768_v50 = vpop.f32.mrf.mxu1 }
 0x109   : > { %v690_v51 = vpop.f32.mrf.mxu0  ;;  %v770_v52 = vpop.f32.mrf.mxu1 }
 0x10a   : > { %v1609_v53 = vpack.c.bf16 %v690_v51, %v688_v49  ;;  %v1625_v54 = vpack.c.bf16 %v770_v52, %v768_v50 }
 0x10b   : > { %v692_v55 = vpop.f32.mrf.mxu0  ;;  %v772_v56 = vpop.f32.mrf.mxu1 }
 0x10c   : > { %1234 = vst [vmem:[%s1950_s24] sm:$0xff] %v1609_v53  ;;  %1250 = vst [vmem:[%s1950_s24 + $0x80] sm:$0xff] %v1625_v54 }
 0x10d   : > { %v694_v57 = vpop.f32.mrf.mxu0  ;;  %v774_v58 = vpop.f32.mrf.mxu1 }
 0x10e   : > { %v1610_v59 = vpack.c.bf16 %v694_v57, %v692_v55  ;;  %v1626_v60 = vpack.c.bf16 %v774_v58, %v772_v56 }
 0x10f   : > { %v698_v61 = vpop.f32.mrf.mxu0  ;;  %v778_v62 = vpop.f32.mrf.mxu1 }
 0x110   : > { %1235 = vst [vmem:[%s1950_s24 + $0x8] sm:$0xff] %v1610_v59  ;;  %1251 = vst [vmem:[%s1950_s24 + $0x88] sm:$0xff] %v1626_v60 }
 0x111   : > { %v700_v63 = vpop.f32.mrf.mxu0  ;;  %v780_v0 = vpop.f32.mrf.mxu1 }
 0x112   : > { %v1611_v1 = vpack.c.bf16 %v700_v63, %v698_v61  ;;  %v1627_v2 = vpack.c.bf16 %v780_v0, %v778_v62 }
 0x113   : > { %v702_v3 = vpop.f32.mrf.mxu0  ;;  %v782_v4 = vpop.f32.mrf.mxu1 }
 0x114   : > { %1236 = vst [vmem:[%s1950_s24 + $0x10] sm:$0xff] %v1611_v1  ;;  %1252 = vst [vmem:[%s1950_s24 + $0x90] sm:$0xff] %v1627_v2 }
 0x115   : > { %v704_v5 = vpop.f32.mrf.mxu0  ;;  %v784_v6 = vpop.f32.mrf.mxu1 }
 0x116   : > { %v1612_v7 = vpack.c.bf16 %v704_v5, %v702_v3  ;;  %v1628_v8 = vpack.c.bf16 %v784_v6, %v782_v4 }
 0x117   : > { %v708_v9 = vpop.f32.mrf.mxu0  ;;  %v788_v10 = vpop.f32.mrf.mxu1 }
 0x118   : > { %1237 = vst [vmem:[%s1950_s24 + $0x18] sm:$0xff] %v1612_v7  ;;  %1253 = vst [vmem:[%s1950_s24 + $0x98] sm:$0xff] %v1628_v8 }
 0x119   : > { %v710_v11 = vpop.f32.mrf.mxu0  ;;  %v790_v12 = vpop.f32.mrf.mxu1 }
 0x11a   : > { %v1613_v13 = vpack.c.bf16 %v710_v11, %v708_v9  ;;  %v1629_v14 = vpack.c.bf16 %v790_v12, %v788_v10 }
 0x11b   : > { %v712_v15 = vpop.f32.mrf.mxu0  ;;  %v792_v16 = vpop.f32.mrf.mxu1 }
 0x11c   : > { %1238 = vst [vmem:[%s1950_s24 + $0x20] sm:$0xff] %v1613_v13  ;;  %1254 = vst [vmem:[%s1950_s24 + $0xa0] sm:$0xff] %v1629_v14 }
 0x11d   : > { %v714_v17 = vpop.f32.mrf.mxu0  ;;  %v794_v18 = vpop.f32.mrf.mxu1 }
 0x11e   : > { %v1614_v19 = vpack.c.bf16 %v714_v17, %v712_v15  ;;  %v1630_v20 = vpack.c.bf16 %v794_v18, %v792_v16  ;;  %v1369_v17 = vld [vmem:[%s1950_s24] sm:$0xff] (%p1830_p6)  ;;  %v1371_v18 = vld [vmem:[%s1950_s24 + $0x8] sm:$0xff] (%p1830_p6) }
 0x11f   : > { %v718_v21 = vpop.f32.mrf.mxu0  ;;  %v798_v22 = vpop.f32.mrf.mxu1  ;;  %1370 = vst [vmem:[%s1993_s26] sm:$0xff] (%p1830_p6), %v1369_v17  ;;  %1372 = vst [vmem:[%s1993_s26 + $0x10] sm:$0xff] (%p1830_p6), %v1371_v18 }
 0x120   : > { %1239 = vst [vmem:[%s1950_s24 + $0x28] sm:$0xff] %v1614_v19  ;;  %1255 = vst [vmem:[%s1950_s24 + $0xa8] sm:$0xff] %v1630_v20  ;;  %v1373_v19 = vld [vmem:[%s1950_s24 + $0x10] sm:$0xff] (%p1830_p6)  ;;  %v1375_v20 = vld [vmem:[%s1950_s24 + $0x18] sm:$0xff] (%p1830_p6) }
 0x121   : > { %v720_v23 = vpop.f32.mrf.mxu0  ;;  %v800_v24 = vpop.f32.mrf.mxu1  ;;  %1374 = vst [vmem:[%s1993_s26 + $0x20] sm:$0xff] (%p1830_p6), %v1373_v19  ;;  %1376 = vst [vmem:[%s1993_s26 + $0x30] sm:$0xff] (%p1830_p6), %v1375_v20 }
 0x122   : > { %v1615_v25 = vpack.c.bf16 %v720_v23, %v718_v21  ;;  %v1631_v26 = vpack.c.bf16 %v800_v24, %v798_v22 }
 0x123   : > { %v722_v27 = vpop.f32.mrf.mxu0  ;;  %v802_v28 = vpop.f32.mrf.mxu1  ;;  %v1377_v21 = vld [vmem:[%s1950_s24 + $0x20] sm:$0xff] (%p1830_p6) }
 0x124   : > { %1240 = vst [vmem:[%s1950_s24 + $0x30] sm:$0xff] %v1615_v25  ;;  %1256 = vst [vmem:[%s1950_s24 + $0xb0] sm:$0xff] %v1631_v26 }
 0x125   : > { %v724_v29 = vpop.f32.mrf.mxu0  ;;  %v804_v30 = vpop.f32.mrf.mxu1  ;;  %1378 = vst [vmem:[%s1993_s26 + $0x40] sm:$0xff] (%p1830_p6), %v1377_v21 }
 0x126   : > { %v1616_v31 = vpack.c.bf16 %v724_v29, %v722_v27  ;;  %v1632_v32 = vpack.c.bf16 %v804_v30, %v802_v28 }
 0x127   : > { %v728_v33 = vpop.f32.mrf.mxu0  ;;  %v808_v34 = vpop.f32.mrf.mxu1  ;;  %v1379_v22 = vld [vmem:[%s1950_s24 + $0x28] sm:$0xff] (%p1830_p6) }
 0x128   : > { %1241 = vst [vmem:[%s1950_s24 + $0x38] sm:$0xff] %v1616_v31  ;;  %1257 = vst [vmem:[%s1950_s24 + $0xb8] sm:$0xff] %v1632_v32 }
 0x129   : > { %v730_v35 = vpop.f32.mrf.mxu0  ;;  %v810_v36 = vpop.f32.mrf.mxu1  ;;  %1380 = vst [vmem:[%s1993_s26 + $0x50] sm:$0xff] (%p1830_p6), %v1379_v22 }
 0x12a   : > { %v1617_v37 = vpack.c.bf16 %v730_v35, %v728_v33  ;;  %v1633_v38 = vpack.c.bf16 %v810_v36, %v808_v34  ;;  %v1401_v33 = vld [vmem:[%s1950_s24 + $0x80] sm:$0xff] (%p1830_p6)  ;;  %v1403_v34 = vld [vmem:[%s1950_s24 + $0x88] sm:$0xff] (%p1830_p6)  ;;  %v1405_v35 = vld [vmem:[%s1950_s24 + $0x90] sm:$0xff] (%p1830_p6) }
 0x12b   : > { %v732_v39 = vpop.f32.mrf.mxu0  ;;  %v812_v40 = vpop.f32.mrf.mxu1  ;;  %v1381_v23 = vld [vmem:[%s1950_s24 + $0x30] sm:$0xff] (%p1830_p6)  ;;  %1402 = vst [vmem:[%s1993_s26 + $0x100] sm:$0xff] (%p1830_p6), %v1401_v33  ;;  %1404 = vst [vmem:[%s1993_s26 + $0x110] sm:$0xff] (%p1830_p6), %v1403_v34  ;;  %v1407_v36 = vld [vmem:[%s1950_s24 + $0x98] sm:$0xff] (%p1830_p6) }
 0x12c   : > { %1242 = vst [vmem:[%s1950_s24 + $0x40] sm:$0xff] %v1617_v37  ;;  %1258 = vst [vmem:[%s1950_s24 + $0xc0] sm:$0xff] %v1633_v38  ;;  %v1409_v37 = vld [vmem:[%s1950_s24 + $0xa0] sm:$0xff] (%p1830_p6)  ;;  %v1411_v38 = vld [vmem:[%s1950_s24 + $0xa8] sm:$0xff] (%p1830_p6) }
 0x12d   : > { %v734_v41 = vpop.f32.mrf.mxu0  ;;  %v814_v42 = vpop.f32.mrf.mxu1  ;;  %1382 = vst [vmem:[%s1993_s26 + $0x60] sm:$0xff] (%p1830_p6), %v1381_v23  ;;  %1406 = vst [vmem:[%s1993_s26 + $0x120] sm:$0xff] (%p1830_p6), %v1405_v35 }
 0x12e   : > { %v1618_v43 = vpack.c.bf16 %v734_v41, %v732_v39  ;;  %v1634_v44 = vpack.c.bf16 %v814_v42, %v812_v40  ;;  %1408 = vst [vmem:[%s1993_s26 + $0x130] sm:$0xff] (%p1830_p6), %v1407_v36  ;;  %1410 = vst [vmem:[%s1993_s26 + $0x140] sm:$0xff] (%p1830_p6), %v1409_v37  ;;  %v1413_v39 = vld [vmem:[%s1950_s24 + $0xb0] sm:$0xff] (%p1830_p6) }
 0x12f   : > { %v738_v45 = vpop.f32.mrf.mxu0  ;;  %v818_v46 = vpop.f32.mrf.mxu1  ;;  %v1383_v24 = vld [vmem:[%s1950_s24 + $0x38] sm:$0xff] (%p1830_p6)  ;;  %1412 = vst [vmem:[%s1993_s26 + $0x150] sm:$0xff] (%p1830_p6), %v1411_v38  ;;  %1414 = vst [vmem:[%s1993_s26 + $0x160] sm:$0xff] (%p1830_p6), %v1413_v39 }
 0x130   : > { %1243 = vst [vmem:[%s1950_s24 + $0x48] sm:$0xff] %v1618_v43  ;;  %1259 = vst [vmem:[%s1950_s24 + $0xc8] sm:$0xff] %v1634_v44  ;;  %v1415_v40 = vld [vmem:[%s1950_s24 + $0xb8] sm:$0xff] (%p1830_p6) }
 0x131   : > { %v740_v47 = vpop.f32.mrf.mxu0  ;;  %v820_v48 = vpop.f32.mrf.mxu1  ;;  %1384 = vst [vmem:[%s1993_s26 + $0x70] sm:$0xff] (%p1830_p6), %v1383_v24  ;;  %1416 = vst [vmem:[%s1993_s26 + $0x170] sm:$0xff] (%p1830_p6), %v1415_v40 }
 0x132   : > { %v1619_v49 = vpack.c.bf16 %v740_v47, %v738_v45  ;;  %v1635_v50 = vpack.c.bf16 %v820_v48, %v818_v46 }
 0x133   : > { %v742_v51 = vpop.f32.mrf.mxu0  ;;  %v822_v52 = vpop.f32.mrf.mxu1  ;;  %v1385_v25 = vld [vmem:[%s1950_s24 + $0x40] sm:$0xff] (%p1830_p6) }
 0x134   : > { %1244 = vst [vmem:[%s1950_s24 + $0x50] sm:$0xff] %v1619_v49  ;;  %1260 = vst [vmem:[%s1950_s24 + $0xd0] sm:$0xff] %v1635_v50  ;;  %v1417_v41 = vld [vmem:[%s1950_s24 + $0xc0] sm:$0xff] (%p1830_p6) }
 0x135   : > { %v744_v53 = vpop.f32.mrf.mxu0  ;;  %v824_v54 = vpop.f32.mrf.mxu1  ;;  %1386 = vst [vmem:[%s1993_s26 + $0x80] sm:$0xff] (%p1830_p6), %v1385_v25  ;;  %1418 = vst [vmem:[%s1993_s26 + $0x180] sm:$0xff] (%p1830_p6), %v1417_v41 }
 0x136   : > { %v1620_v55 = vpack.c.bf16 %v744_v53, %v742_v51  ;;  %v1636_v56 = vpack.c.bf16 %v824_v54, %v822_v52 }
 0x137   : > { %v748_v57 = vpop.f32.mrf.mxu0  ;;  %v828_v58 = vpop.f32.mrf.mxu1  ;;  %v1387_v26 = vld [vmem:[%s1950_s24 + $0x48] sm:$0xff] (%p1830_p6) }
 0x138   : > { %1245 = vst [vmem:[%s1950_s24 + $0x58] sm:$0xff] %v1620_v55  ;;  %1261 = vst [vmem:[%s1950_s24 + $0xd8] sm:$0xff] %v1636_v56  ;;  %v1419_v42 = vld [vmem:[%s1950_s24 + $0xc8] sm:$0xff] (%p1830_p6) }
 0x139   : > { %v750_v59 = vpop.f32.mrf.mxu0  ;;  %v830_v60 = vpop.f32.mrf.mxu1  ;;  %1388 = vst [vmem:[%s1993_s26 + $0x90] sm:$0xff] (%p1830_p6), %v1387_v26  ;;  %1420 = vst [vmem:[%s1993_s26 + $0x190] sm:$0xff] (%p1830_p6), %v1419_v42 }
 0x13a   : > { %v1621_v61 = vpack.c.bf16 %v750_v59, %v748_v57  ;;  %v1637_v62 = vpack.c.bf16 %v830_v60, %v828_v58 }
 0x13b   : > { %v752_v63 = vpop.f32.mrf.mxu0  ;;  %v832_v0 = vpop.f32.mrf.mxu1  ;;  %v1389_v27 = vld [vmem:[%s1950_s24 + $0x50] sm:$0xff] (%p1830_p6) }
 0x13c   : > { %1246 = vst [vmem:[%s1950_s24 + $0x60] sm:$0xff] %v1621_v61  ;;  %1262 = vst [vmem:[%s1950_s24 + $0xe0] sm:$0xff] %v1637_v62  ;;  %v1421_v43 = vld [vmem:[%s1950_s24 + $0xd0] sm:$0xff] (%p1830_p6) }
 0x13d   : > { %v754_v1 = vpop.f32.mrf.mxu0  ;;  %v834_v2 = vpop.f32.mrf.mxu1  ;;  %1390 = vst [vmem:[%s1993_s26 + $0xa0] sm:$0xff] (%p1830_p6), %v1389_v27  ;;  %1422 = vst [vmem:[%s1993_s26 + $0x1a0] sm:$0xff] (%p1830_p6), %v1421_v43 }
 0x13e   : > { %v1622_v3 = vpack.c.bf16 %v754_v1, %v752_v63  ;;  %v1638_v4 = vpack.c.bf16 %v834_v2, %v832_v0 }
 0x13f   : > { %v758_v5 = vpop.f32.mrf.mxu0  ;;  %v838_v6 = vpop.f32.mrf.mxu1  ;;  %v1391_v28 = vld [vmem:[%s1950_s24 + $0x58] sm:$0xff] (%p1830_p6) }
 0x140   : > { %1247 = vst [vmem:[%s1950_s24 + $0x68] sm:$0xff] %v1622_v3  ;;  %1263 = vst [vmem:[%s1950_s24 + $0xe8] sm:$0xff] %v1638_v4  ;;  %v1423_v44 = vld [vmem:[%s1950_s24 + $0xd8] sm:$0xff] (%p1830_p6) }
 0x141   : > { %v760_v7 = vpop.f32.mrf.mxu0  ;;  %v840_v8 = vpop.f32.mrf.mxu1  ;;  %1392 = vst [vmem:[%s1993_s26 + $0xb0] sm:$0xff] (%p1830_p6), %v1391_v28  ;;  %1424 = vst [vmem:[%s1993_s26 + $0x1b0] sm:$0xff] (%p1830_p6), %v1423_v44 }
 0x142   : > { %v1623_v9 = vpack.c.bf16 %v760_v7, %v758_v5  ;;  %v1639_v10 = vpack.c.bf16 %v840_v8, %v838_v6 }
 0x143   : > { %v762_v11 = vpop.f32.mrf.mxu0  ;;  %v842_v12 = vpop.f32.mrf.mxu1  ;;  %v1393_v29 = vld [vmem:[%s1950_s24 + $0x60] sm:$0xff] (%p1830_p6) }
 0x144   : > { %1248 = vst [vmem:[%s1950_s24 + $0x70] sm:$0xff] %v1623_v9  ;;  %1264 = vst [vmem:[%s1950_s24 + $0xf0] sm:$0xff] %v1639_v10  ;;  %1272 = sbr.rel (!%p1830_p6) target bundleno = 338 (0x152), region = 78  ;;  %v1425_v45 = vld [vmem:[%s1950_s24 + $0xe0] sm:$0xff] (%p1830_p6) }
 0x145   : > { %v764_v13 = vpop.f32.mrf.mxu0  ;;  %v844_v14 = vpop.f32.mrf.mxu1  ;;  %1394 = vst [vmem:[%s1993_s26 + $0xc0] sm:$0xff] (%p1830_p6), %v1393_v29  ;;  %1426 = vst [vmem:[%s1993_s26 + $0x1c0] sm:$0xff] (%p1830_p6), %v1425_v45 }
 0x146   : > { %v1624_v15 = vpack.c.bf16 %v764_v13, %v762_v11  ;;  %v1640_v16 = vpack.c.bf16 %v844_v14, %v842_v12 }
 0x147   : > { %v1395_v30 = vld [vmem:[%s1950_s24 + $0x68] sm:$0xff] (%p1830_p6) }
 0x148   : > { %1249 = vst [vmem:[%s1950_s24 + $0x78] sm:$0xff] %v1624_v15  ;;  %1265 = vst [vmem:[%s1950_s24 + $0xf8] sm:$0xff] %v1640_v16  ;;  %v1427_v46 = vld [vmem:[%s1950_s24 + $0xe8] sm:$0xff] (%p1830_p6) }
 0x149   : > { %1396 = vst [vmem:[%s1993_s26 + $0xd0] sm:$0xff] %v1395_v30  ;;  %1428 = vst [vmem:[%s1993_s26 + $0x1d0] sm:$0xff] %v1427_v46 }
 0x14b   : > { %v1397_v31 = vld [vmem:[%s1950_s24 + $0x70] sm:$0xff] }
 0x14c   : > { %1398 = vst [vmem:[%s1993_s26 + $0xe0] sm:$0xff] %v1397_v31  ;;  %v1429_v47 = vld [vmem:[%s1950_s24 + $0xf0] sm:$0xff] }
 0x14d   : > { %1430 = vst [vmem:[%s1993_s26 + $0x1e0] sm:$0xff] %v1429_v47 }
 0x14f   : > { %v1399_v32 = vld [vmem:[%s1950_s24 + $0x78] sm:$0xff] }
 0x150   : > { %1400 = vst [vmem:[%s1993_s26 + $0xf0] sm:$0xff] %v1399_v32  ;;  %v1431_v48 = vld [vmem:[%s1950_s24 + $0xf8] sm:$0xff] }
 0x151   : > { %1432 = vst [vmem:[%s1993_s26 + $0x1f0] sm:$0xff] %v1431_v48 }
 0x152 PF: > { %s12_s13 = sadd.s32 1, %s1777_s13   ;;  %s2075_s9 = smov %s1765_s10 }
 0x153   : > { %p9_p11 = scmp.ge.s32.totalorder %s12_s13, 4   ;;  %s2076_s10 = smov %s1835_s19 }
 0x154   : > { %s2077_s11 = smov %s1773_s12  ;;  %s2078_s12 = smov %s2080_s14 }
 0x155   :  { %11 = sbr.rel (!%p9_p11) target bundleno = 3 (0x3), region = 150 }

// kernel: _lambda_.5
= control target key start
LH: loop header
LB: loop body
LE: loop exit
PB: predicated region body
PF: predicated region fallthrough
CT: control target
= control target key end

     0   :  { %s1057_s1 = inlined_call_operand.vmem [shape: bf16[128,128], index: 1, kind: input, shape index: {}]   ;;  %s1058_s0 = inlined_call_operand.vmem [shape: bf16[256,128], index: 0, kind: input, shape index: {}]   ;;  %s1059_s2 = inlined_call_operand.vmem [shape: f32[1,128], index: 2, kind: input, shape index: {}]   ;;  %s1060_s3 = inlined_call_operand.vmem [shape: f32[1,128], index: 3, kind: input, shape index: {}]   ;;  %s1061_s4 = inlined_call_operand.vmem [shape: f32[256,128], index: 4, kind: output, shape index: {}]  }
   0x1   :  { %v766_v0 = vld [vmem:[%s1057_s1 + $0x38] sm:$0xff]   ;;  %v767_v1 = vld [vmem:[%s1057_s1 + $0x30] sm:$0xff]   ;;  %v768_v2 = vld [vmem:[%s1057_s1 + $0x28] sm:$0xff]  }
   0x2   :  { %702 = vmatprep.subr.bf16.mxu0 %v766_v0  ;;  %750 = vmatprep.subr.bf16.mxu1 %v766_v0  ;;  %v769_v3 = vld [vmem:[%s1057_s1 + $0x20] sm:$0xff]   ;;  %v770_v6 = vld [vmem:[%s1057_s1 + $0x18] sm:$0xff]   ;;  %v771_v7 = vld [vmem:[%s1057_s1 + $0x10] sm:$0xff]  }
   0x3   :  { %703 = vmatpush3.bf16.msra.mxu0 %v766_v0  ;;  %758 = vmatpush3.bf16.msra.mxu1 %v766_v0  ;;  %v774_v4 = vld [vmem:[%s1058_s0] sm:$0xff]   ;;  %v772_v8 = vld [vmem:[%s1057_s1 + $0x8] sm:$0xff]   ;;  %v778_v12 = vld [vmem:[%s1058_s0 + $0x10] sm:$0xff]  }
   0x4   :  { %704 = vmatprep.subr.bf16.mxu0 %v767_v1  ;;  %751 = vmatprep.subr.bf16.mxu1 %v767_v1  ;;  %v775_v5 = vld [vmem:[%s1058_s0 + $0x40] sm:$0xff]   ;;  %v776_v10 = vld [vmem:[%s1058_s0 + $0x8] sm:$0xff]   ;;  %v779_v13 = vld [vmem:[%s1058_s0 + $0x50] sm:$0xff]  }
   0x5   :  { %718 = vmatprep.mubr.bf16.mxu0 %v774_v4  ;;  %734 = vmatprep.mubr.bf16.mxu1 %v775_v5  ;;  %v773_v9 = vld [vmem:[%s1057_s1] sm:$0xff]   ;;  %v777_v11 = vld [vmem:[%s1058_s0 + $0x48] sm:$0xff]   ;;  %v780_v14 = vld [vmem:[%s1058_s0 + $0x18] sm:$0xff]  }
   0x6   :  { %v781_v15 = vld [vmem:[%s1058_s0 + $0x58] sm:$0xff]   ;;  %v782_v16 = vld [vmem:[%s1058_s0 + $0x20] sm:$0xff]   ;;  %v784_v18 = vld [vmem:[%s1058_s0 + $0x28] sm:$0xff]  }
   0x7   :  { %705 = vmatpush3.bf16.msra.mxu0 %v767_v1  ;;  %759 = vmatpush3.bf16.msra.mxu1 %v767_v1  ;;  %v783_v17 = vld [vmem:[%s1058_s0 + $0x60] sm:$0xff]   ;;  %v785_v19 = vld [vmem:[%s1058_s0 + $0x68] sm:$0xff]   ;;  %v786_v20 = vld [vmem:[%s1058_s0 + $0x30] sm:$0xff]  }
   0x8   :  { %706 = vmatprep.subr.bf16.mxu0 %v768_v2  ;;  %752 = vmatprep.subr.bf16.mxu1 %v768_v2  ;;  %v787_v21 = vld [vmem:[%s1058_s0 + $0x70] sm:$0xff]   ;;  %v788_v22 = vld [vmem:[%s1058_s0 + $0x38] sm:$0xff]   ;;  %v890_v24 = vld [vmem:[%s1059_s2] ss:$0 sm:$0xff] }
   0x9   :  { %v789_v23 = vld [vmem:[%s1058_s0 + $0x78] sm:$0xff]   ;;  %v895_v26 = vld [vmem:[%s1060_s3] ss:$0 sm:$0xff] }
   0xb   :  { %707 = vmatpush3.bf16.msra.mxu0 %v768_v2  ;;  %760 = vmatpush3.bf16.msra.mxu1 %v768_v2 }
   0xc   :  { %708 = vmatprep.subr.bf16.mxu0 %v769_v3  ;;  %753 = vmatprep.subr.bf16.mxu1 %v769_v3 }
   0xf   :  { %709 = vmatpush3.bf16.msra.mxu0 %v769_v3  ;;  %761 = vmatpush3.bf16.msra.mxu1 %v769_v3 }
  0x10   :  { %710 = vmatprep.subr.bf16.mxu0 %v770_v6  ;;  %754 = vmatprep.subr.bf16.mxu1 %v770_v6 }
  0x13   :  { %711 = vmatpush3.bf16.msra.mxu0 %v770_v6  ;;  %762 = vmatpush3.bf16.msra.mxu1 %v770_v6 }
  0x14   :  { %712 = vmatprep.subr.bf16.mxu0 %v771_v7  ;;  %755 = vmatprep.subr.bf16.mxu1 %v771_v7 }
  0x17   :  { %713 = vmatpush3.bf16.msra.mxu0 %v771_v7  ;;  %763 = vmatpush3.bf16.msra.mxu1 %v771_v7 }
  0x18   :  { %714 = vmatprep.subr.bf16.mxu0 %v772_v8  ;;  %756 = vmatprep.subr.bf16.mxu1 %v772_v8 }
  0x1b   :  { %715 = vmatpush3.bf16.msra.mxu0 %v772_v8  ;;  %764 = vmatpush3.bf16.msra.mxu1 %v772_v8 }
  0x1c   :  { %716 = vmatprep.subr.bf16.mxu0 %v773_v9  ;;  %757 = vmatprep.subr.bf16.mxu1 %v773_v9 }
  0x1f   :  { %717 = vmatpush3.bf16.msra.mxu0 %v773_v9  ;;  %765 = vmatpush3.bf16.msra.mxu1 %v773_v9 }
  0x22   :  { %719 = vmatmul.mubr.bf16.vlgmr.msra.gmra.mxu0 %v776_v10  ;;  %735 = vmatmul.mubr.bf16.vlgmr.msra.gmra.mxu1 %v777_v11 }
  0x23   :  { %722 = vmatprep.mubr.bf16.mxu0 %v778_v12  ;;  %738 = vmatprep.mubr.bf16.mxu1 %v779_v13 }
  0x2a   :  { %723 = vmatmul.mubr.bf16.gmra.mxu0 %v780_v14  ;;  %739 = vmatmul.mubr.bf16.gmra.mxu1 %v781_v15 }
  0x2b   :  { %726 = vmatprep.mubr.bf16.mxu0 %v782_v16  ;;  %742 = vmatprep.mubr.bf16.mxu1 %v783_v17 }
  0x32   :  { %727 = vmatmul.mubr.bf16.gmra.mxu0 %v784_v18  ;;  %743 = vmatmul.mubr.bf16.gmra.mxu1 %v785_v19 }
  0x33   :  { %730 = vmatprep.mubr.bf16.mxu0 %v786_v20  ;;  %746 = vmatprep.mubr.bf16.mxu1 %v787_v21 }
  0x3a   :  { %731 = vmatmul.mubr.bf16.gmra.mxu0 %v788_v22  ;;  %747 = vmatmul.mubr.bf16.gmra.mxu1 %v789_v23 }
  0xe2   :  { %v720_v25 = vpop.f32.mrf.mxu0  ;;  %v736_v27 = vpop.f32.mrf.mxu1 }
  0xe3   :  { %v547_v28 = vmul.f32 %v720_v25, %v890_v24  ;;  %v563_v29 = vmul.f32 %v736_v27, %v890_v24 }
  0xe4   :  { %v312_v30 = vpop.f32.mrf.mxu0  ;;  %v376_v31 = vpop.f32.mrf.mxu1 }
  0xe5   :  { %v586_v32 = vadd.f32 %v895_v26, %v547_v28  ;;  %v602_v33 = vadd.f32 %v895_v26, %v563_v29  ;;  %v545_v34 = vmul.f32 %v890_v24, %v312_v30  ;;  %v561_v35 = vmul.f32 %v890_v24, %v376_v31 }
  0xe6   :  { %v721_v36 = vpop.f32.mrf.mxu0  ;;  %v737_v37 = vpop.f32.mrf.mxu1 }
  0xe7   :  { %618 = vst [vmem:[%s1061_s4 + $0x10] sm:$0xff] %v586_v32  ;;  %634 = vst [vmem:[%s1061_s4 + $0x90] sm:$0xff] %v602_v33  ;;  %v584_v38 = vadd.f32 %v895_v26, %v545_v34  ;;  %v600_v39 = vadd.f32 %v895_v26, %v561_v35  ;;  %v548_v40 = vmul.f32 %v721_v36, %v890_v24 }
  0xe8   :  { %v564_v41 = vmul.f32 %v737_v37, %v890_v24  ;;  %v315_v42 = vpop.f32.mrf.mxu0  ;;  %v379_v43 = vpop.f32.mrf.mxu1 }
  0xe9   :  { %616 = vst [vmem:[%s1061_s4] sm:$0xff] %v584_v38  ;;  %632 = vst [vmem:[%s1061_s4 + $0x80] sm:$0xff] %v600_v39  ;;  %v587_v44 = vadd.f32 %v895_v26, %v548_v40  ;;  %v546_v46 = vmul.f32 %v890_v24, %v315_v42  ;;  %v562_v47 = vmul.f32 %v890_v24, %v379_v43 }
  0xea   :  { %v603_v45 = vadd.f32 %v895_v26, %v564_v41  ;;  %v724_v48 = vpop.f32.mrf.mxu0  ;;  %v740_v49 = vpop.f32.mrf.mxu1 }
  0xeb   :  { %619 = vst [vmem:[%s1061_s4 + $0x18] sm:$0xff] %v587_v44  ;;  %v585_v50 = vadd.f32 %v895_v26, %v546_v46  ;;  %v601_v51 = vadd.f32 %v895_v26, %v562_v47  ;;  %v551_v52 = vmul.f32 %v724_v48, %v890_v24  ;;  %v567_v53 = vmul.f32 %v740_v49, %v890_v24 }
  0xec   :  { %635 = vst [vmem:[%s1061_s4 + $0x98] sm:$0xff] %v603_v45  ;;  %v328_v54 = vpop.f32.mrf.mxu0  ;;  %v392_v55 = vpop.f32.mrf.mxu1 }
  0xed   :  { %617 = vst [vmem:[%s1061_s4 + $0x8] sm:$0xff] %v585_v50  ;;  %633 = vst [vmem:[%s1061_s4 + $0x88] sm:$0xff] %v601_v51  ;;  %v590_v56 = vadd.f32 %v895_v26, %v551_v52  ;;  %v606_v57 = vadd.f32 %v895_v26, %v567_v53  ;;  %v549_v58 = vmul.f32 %v890_v24, %v328_v54 }
  0xee   :  { %v565_v59 = vmul.f32 %v890_v24, %v392_v55  ;;  %v725_v60 = vpop.f32.mrf.mxu0  ;;  %v741_v61 = vpop.f32.mrf.mxu1 }
  0xef   :  { %622 = vst [vmem:[%s1061_s4 + $0x30] sm:$0xff] %v590_v56  ;;  %638 = vst [vmem:[%s1061_s4 + $0xb0] sm:$0xff] %v606_v57  ;;  %v588_v62 = vadd.f32 %v895_v26, %v549_v58  ;;  %v552_v0 = vmul.f32 %v725_v60, %v890_v24  ;;  %v568_v1 = vmul.f32 %v741_v61, %v890_v24 }
  0xf0   :  { %v604_v63 = vadd.f32 %v895_v26, %v565_v59  ;;  %v331_v2 = vpop.f32.mrf.mxu0  ;;  %v395_v3 = vpop.f32.mrf.mxu1 }
  0xf1   :  { %620 = vst [vmem:[%s1061_s4 + $0x20] sm:$0xff] %v588_v62  ;;  %v591_v4 = vadd.f32 %v895_v26, %v552_v0  ;;  %v607_v5 = vadd.f32 %v895_v26, %v568_v1  ;;  %v550_v6 = vmul.f32 %v890_v24, %v331_v2  ;;  %v566_v7 = vmul.f32 %v890_v24, %v395_v3 }
  0xf2   :  { %636 = vst [vmem:[%s1061_s4 + $0xa0] sm:$0xff] %v604_v63  ;;  %v728_v8 = vpop.f32.mrf.mxu0  ;;  %v744_v9 = vpop.f32.mrf.mxu1 }
  0xf3   :  { %623 = vst [vmem:[%s1061_s4 + $0x38] sm:$0xff] %v591_v4  ;;  %639 = vst [vmem:[%s1061_s4 + $0xb8] sm:$0xff] %v607_v5  ;;  %v589_v10 = vadd.f32 %v895_v26, %v550_v6  ;;  %v605_v11 = vadd.f32 %v895_v26, %v566_v7  ;;  %v555_v12 = vmul.f32 %v728_v8, %v890_v24 }
  0xf4   :  { %v571_v13 = vmul.f32 %v744_v9, %v890_v24  ;;  %v344_v14 = vpop.f32.mrf.mxu0  ;;  %v408_v15 = vpop.f32.mrf.mxu1 }
  0xf5   :  { %621 = vst [vmem:[%s1061_s4 + $0x28] sm:$0xff] %v589_v10  ;;  %637 = vst [vmem:[%s1061_s4 + $0xa8] sm:$0xff] %v605_v11  ;;  %v594_v16 = vadd.f32 %v895_v26, %v555_v12  ;;  %v553_v18 = vmul.f32 %v890_v24, %v344_v14  ;;  %v569_v19 = vmul.f32 %v890_v24, %v408_v15 }
  0xf6   :  { %v610_v17 = vadd.f32 %v895_v26, %v571_v13  ;;  %v729_v20 = vpop.f32.mrf.mxu0  ;;  %v745_v21 = vpop.f32.mrf.mxu1 }
  0xf7   :  { %626 = vst [vmem:[%s1061_s4 + $0x50] sm:$0xff] %v594_v16  ;;  %v592_v22 = vadd.f32 %v895_v26, %v553_v18  ;;  %v608_v23 = vadd.f32 %v895_v26, %v569_v19  ;;  %v556_v25 = vmul.f32 %v729_v20, %v890_v24  ;;  %v572_v27 = vmul.f32 %v745_v21, %v890_v24 }
  0xf8   :  { %642 = vst [vmem:[%s1061_s4 + $0xd0] sm:$0xff] %v610_v17  ;;  %v347_v28 = vpop.f32.mrf.mxu0  ;;  %v411_v29 = vpop.f32.mrf.mxu1 }
  0xf9   :  { %624 = vst [vmem:[%s1061_s4 + $0x40] sm:$0xff] %v592_v22  ;;  %640 = vst [vmem:[%s1061_s4 + $0xc0] sm:$0xff] %v608_v23  ;;  %v595_v30 = vadd.f32 %v895_v26, %v556_v25  ;;  %v611_v31 = vadd.f32 %v895_v26, %v572_v27  ;;  %v554_v32 = vmul.f32 %v890_v24, %v347_v28 }
  0xfa   :  { %v570_v33 = vmul.f32 %v890_v24, %v411_v29  ;;  %v732_v34 = vpop.f32.mrf.mxu0  ;;  %v748_v35 = vpop.f32.mrf.mxu1 }
  0xfb   :  { %627 = vst [vmem:[%s1061_s4 + $0x58] sm:$0xff] %v595_v30  ;;  %643 = vst [vmem:[%s1061_s4 + $0xd8] sm:$0xff] %v611_v31  ;;  %v593_v36 = vadd.f32 %v895_v26, %v554_v32  ;;  %v559_v38 = vmul.f32 %v732_v34, %v890_v24  ;;  %v575_v39 = vmul.f32 %v748_v35, %v890_v24 }
  0xfc   :  { %v609_v37 = vadd.f32 %v895_v26, %v570_v33  ;;  %v360_v40 = vpop.f32.mrf.mxu0  ;;  %v424_v41 = vpop.f32.mrf.mxu1 }
  0xfd   :  { %625 = vst [vmem:[%s1061_s4 + $0x48] sm:$0xff] %v593_v36  ;;  %v598_v42 = vadd.f32 %v895_v26, %v559_v38  ;;  %v614_v43 = vadd.f32 %v895_v26, %v575_v39  ;;  %v557_v44 = vmul.f32 %v890_v24, %v360_v40  ;;  %v573_v45 = vmul.f32 %v890_v24, %v424_v41 }
  0xfe   :  { %641 = vst [vmem:[%s1061_s4 + $0xc8] sm:$0xff] %v609_v37  ;;  %v733_v46 = vpop.f32.mrf.mxu0  ;;  %v749_v47 = vpop.f32.mrf.mxu1 }
  0xff   :  { %630 = vst [vmem:[%s1061_s4 + $0x70] sm:$0xff] %v598_v42  ;;  %646 = vst [vmem:[%s1061_s4 + $0xf0] sm:$0xff] %v614_v43  ;;  %v596_v48 = vadd.f32 %v895_v26, %v557_v44  ;;  %v612_v49 = vadd.f32 %v895_v26, %v573_v45  ;;  %v560_v50 = vmul.f32 %v733_v46, %v890_v24 }
 0x100   :  { %v576_v51 = vmul.f32 %v749_v47, %v890_v24  ;;  %v363_v52 = vpop.f32.mrf.mxu0  ;;  %v427_v53 = vpop.f32.mrf.mxu1 }
 0x101   :  { %628 = vst [vmem:[%s1061_s4 + $0x60] sm:$0xff] %v596_v48  ;;  %644 = vst [vmem:[%s1061_s4 + $0xe0] sm:$0xff] %v612_v49  ;;  %v599_v54 = vadd.f32 %v895_v26, %v560_v50  ;;  %v558_v56 = vmul.f32 %v890_v24, %v363_v52  ;;  %v574_v57 = vmul.f32 %v890_v24, %v427_v53 }
 0x102   :  { %v615_v55 = vadd.f32 %v895_v26, %v576_v51 }
 0x103   :  { %631 = vst [vmem:[%s1061_s4 + $0x78] sm:$0xff] %v599_v54  ;;  %v597_v58 = vadd.f32 %v895_v26, %v558_v56  ;;  %v613_v59 = vadd.f32 %v895_v26, %v574_v57 }
 0x104   :  { %647 = vst [vmem:[%s1061_s4 + $0xf8] sm:$0xff] %v615_v55 }
 0x105   :  { %629 = vst [vmem:[%s1061_s4 + $0x68] sm:$0xff] %v597_v58  ;;  %645 = vst [vmem:[%s1061_s4 + $0xe8] sm:$0xff] %v613_v59 }

// kernel: _lambda_.4
= control target key start
LH: loop header
LB: loop body
LE: loop exit
PB: predicated region body
PF: predicated region fallthrough
CT: control target
= control target key end

     0   :  { %s4203_s12 = smov 0   ;;  %s5162_s0 = inlined_call_operand.vmem [shape: bf16[2,4,128,32], index: 0, kind: input, shape index: {}]   ;;  %s5163_s1 = inlined_call_operand.vmem [shape: bf16[2,4,128,32], index: 1, kind: input, shape index: {}]   ;;  %s5164_s2 = inlined_call_operand.vmem [shape: bf16[2,4,128,32], index: 2, kind: input, shape index: {}]   ;;  %s5165_s3 = inlined_call_operand.vmem [shape: bf16[2,128,128], index: 3, kind: output, shape index: {}]  }
   0x1 LB: > { %s2903_s13 = sadd.s32 4294967295, %s4178_s12   ;;  %p2907_p0 = scmp.ge.s32.totalorder %s4178_s12, 1  ;;  %s4178_s12 = sphi %s4203_s12, %s13_s12  }
   0x2   : > { %p157_p1 = scmp.lt.s32.totalorder %s4178_s12, 3 }
   0x4   : > { %p158_p2 = pnand %p2907_p0, %p157_p1 }
   0x6   : > { %161 = sbr.rel (%p158_p2) target bundleno = 2062 (0x80e), region = 32 }
   0xb   : > { %p191_p3 = scmp.lt.s32.totalorder %s2903_s13, 1  ;;  %vm340_vm0 = vcmask 261120   ;;  %s4180_s24 = smov 32   ;;  %vm2710_vm1 = vcmask 523264   ;;  %vm2727_vm2 = vcmask 785408  }
   0xc   : > { %s4181_s25 = smov 64   ;;  %s4182_s26 = smov 96  }
   0xd   : > { %s5275_s13 = smov (!%p191_p3, %s2903_s13), 1 }
   0xe   : > { %s4214_s14 = sshll.u32 %s5275_s13, 8  ;;  %s3209_s27 = sshll.u32 %s5275_s13, 6 }
   0xf   : > { %s4220_s17 = scalar_lea.vmem %s5163_s1, %s4214_s14  ;;  %s4231_s20 = scalar_lea.vmem %s5162_s0, %s4214_s14 }
  0x10   : > { %v3820_v0 = vld [vmem:[%s4220_s17 + $0x38] sm:$0xff]   ;;  %v3821_v1 = vld [vmem:[%s4220_s17 + $0x30] sm:$0xff]   ;;  %v3822_v3 = vld [vmem:[%s4220_s17 + $0x28] sm:$0xff]   ;;  %s4272_s23 = scalar_lea.vmem %s5164_s2, %s4214_s14  ;;  %s5066_s30 = scalar_lea.vmem %s5165_s3, %s3209_s27 }
  0x11   : > { %3657 = vmatprep.subr.msk.bf16.mxu0 %vm340_vm0, %v3820_v0  ;;  %v387_v2 = vsel %vm340_vm0, %v3820_v0, 0  ;;  %v384_v4 = vsel %vm340_vm0, %v3821_v1, 0  ;;  %v3828_v5 = vld [vmem:[%s4231_s20] sm:$0xff]   ;;  %v3824_v7 = vld [vmem:[%s4220_s17 + $0x18] sm:$0xff]   ;;  %v3825_v8 = vld [vmem:[%s4220_s17 + $0x10] sm:$0xff]   ;;  %v381_v9 = vsel %vm340_vm0, %v3822_v3, 0 }
  0x12   : > { %3402 = vmatpush3.bf16.xpose.msra.mxu0 %v387_v2  ;;  %v3823_v6 = vld [vmem:[%s4220_s17 + $0x20] sm:$0xff]   ;;  %3417 = vmatprep.mubr.msk.bf16.mxu0 %vm340_vm0, %v3828_v5  ;;  %v375_v11 = vsel %vm340_vm0, %v3824_v7, 0  ;;  %v372_v12 = vsel %vm340_vm0, %v3825_v8, 0  ;;  %v3826_v13 = vld [vmem:[%s4220_s17 + $0x8] sm:$0xff]   ;;  %v3830_v18 = vld [vmem:[%s4231_s20 + $0x10] sm:$0xff]  }
  0x13   : > { %3658 = vmatprep.subr.msk.bf16.mxu0 %vm340_vm0, %v3821_v1  ;;  %v378_v10 = vsel %vm340_vm0, %v3823_v6, 0  ;;  %v369_v14 = vsel %vm340_vm0, %v3826_v13, 0  ;;  %v3827_v15 = vld [vmem:[%s4220_s17] sm:$0xff]   ;;  %v3829_v17 = vld [vmem:[%s4231_s20 + $0x8] sm:$0xff]   ;;  %v3831_v19 = vld [vmem:[%s4231_s20 + $0x18] sm:$0xff]  }
  0x14   : > { %v366_v16 = vsel %vm340_vm0, %v3827_v15, 0  ;;  %v3832_v20 = vld [vmem:[%s4231_s20 + $0x20] sm:$0xff]   ;;  %v3833_v21 = vld [vmem:[%s4231_s20 + $0x28] sm:$0xff]   ;;  %v3834_v22 = vld [vmem:[%s4231_s20 + $0x30] sm:$0xff]  }
  0x15   : > { %v3835_v23 = vld [vmem:[%s4231_s20 + $0x38] sm:$0xff]   ;;  %v3837_v25 = vld [vmem:[%s4272_s23 + $0x30] sm:$0xff]   ;;  %v3838_v32 = vld [vmem:[%s4272_s23 + $0x28] sm:$0xff]  }
  0x16   : > { %v3836_v24 = vld [vmem:[%s4272_s23 + $0x38] sm:$0xff]   ;;  %v3839_v35 = vld [vmem:[%s4272_s23 + $0x20] sm:$0xff]   ;;  %v3841_v42 = vld [vmem:[%s4272_s23 + $0x10] sm:$0xff]  }
  0x17   : > { %3433 = vmatprep.subr.bf16.mxu1 %v3836_v24  ;;  %v3840_v38 = vld [vmem:[%s4272_s23 + $0x18] sm:$0xff]   ;;  %v3842_v45 = vld [vmem:[%s4272_s23 + $0x8] sm:$0xff]   ;;  %v3843_v47 = vld [vmem:[%s4272_s23] sm:$0xff]  }
  0x18   : > { %3434 = vmatpush3.bf16.msra.mxu1 %v3836_v24  ;;  %v3844_v48 = vld [vmem:[%s4220_s17 + $0x78] sm:$0xff]  }
  0x19   : > { %3435 = vmatprep.subr.bf16.mxu1 %v3837_v25 }
  0x1a   : > { %3404 = vmatpush3.bf16.xpose.msra.mxu0 %v384_v4 }
  0x1b   : > { %3659 = vmatprep.subr.msk.bf16.mxu0 %vm340_vm0, %v3822_v3 }
  0x1c   : > { %3436 = vmatpush3.bf16.msra.mxu1 %v3837_v25 }
  0x1d   : > { %3437 = vmatprep.subr.bf16.mxu1 %v3838_v32 }
  0x20   : > { %3438 = vmatpush3.bf16.msra.mxu1 %v3838_v32 }
  0x21   : > { %3439 = vmatprep.subr.bf16.mxu1 %v3839_v35 }
  0x22   : > { %3406 = vmatpush3.bf16.xpose.msra.mxu0 %v381_v9 }
  0x23   : > { %3660 = vmatprep.subr.msk.bf16.mxu0 %vm340_vm0, %v3823_v6 }
  0x24   : > { %3440 = vmatpush3.bf16.msra.mxu1 %v3839_v35 }
  0x25   : > { %3441 = vmatprep.subr.bf16.mxu1 %v3840_v38 }
  0x28   : > { %3442 = vmatpush3.bf16.msra.mxu1 %v3840_v38 }
  0x29   : > { %3443 = vmatprep.subr.bf16.mxu1 %v3841_v42 }
  0x2a   : > { %3408 = vmatpush3.bf16.xpose.msra.mxu0 %v378_v10 }
  0x2b   : > { %3661 = vmatprep.subr.msk.bf16.mxu0 %vm340_vm0, %v3824_v7 }
  0x2c   : > { %3444 = vmatpush3.bf16.msra.mxu1 %v3841_v42 }
  0x2d   : > { %3445 = vmatprep.subr.bf16.mxu1 %v3842_v45 }
  0x30   : > { %3446 = vmatpush3.bf16.msra.mxu1 %v3842_v45  ;;  %v3846_v45 = vld [vmem:[%s4220_s17 + $0x68] sm:$0xff]  }
  0x31   : > { %3447 = vmatprep.subr.bf16.mxu1 %v3843_v47 }
  0x32   : > { %3410 = vmatpush3.bf16.xpose.msra.mxu0 %v375_v11 }
  0x33   : > { %3662 = vmatprep.subr.msk.bf16.mxu0 %vm340_vm0, %v3825_v8 }
  0x34   : > { %3448 = vmatpush3.bf16.msra.mxu1 %v3843_v47 }
  0x35   : > { %3665 = vmatprep.subr.msk.bf16.mxu1 %vm340_vm0, %v3844_v48 }
  0x3a   : > { %3412 = vmatpush3.bf16.xpose.msra.mxu0 %v372_v12 }
  0x3b   : > { %3663 = vmatprep.subr.msk.bf16.mxu0 %vm340_vm0, %v3826_v13 }
  0x42   : > { %3414 = vmatpush3.bf16.xpose.msra.mxu0 %v369_v14 }
  0x43   : > { %3664 = vmatprep.subr.msk.bf16.mxu0 %vm340_vm0, %v3827_v15 }
  0x4a   : > { %3416 = vmatpush3.bf16.xpose.msra.mxu0 %v366_v16 }
  0x51   : > { %3418 = vmatmul.mubr.msk.bf16.vlgmr.msra.gmra.mxu0 %vm340_vm0, %v3829_v17 }
  0x52   : > { %3421 = vmatprep.mubr.msk.bf16.mxu0 %vm340_vm0, %v3830_v18 }
  0x59   : > { %3422 = vmatmul.mubr.msk.bf16.gmra.mxu0 %vm340_vm0, %v3831_v19 }
  0x5a   : > { %3425 = vmatprep.mubr.msk.bf16.mxu0 %vm340_vm0, %v3832_v20 }
  0x61   : > { %3426 = vmatmul.mubr.msk.bf16.gmra.mxu0 %vm340_vm0, %v3833_v21 }
  0x62   : > { %3429 = vmatprep.mubr.msk.bf16.mxu0 %vm340_vm0, %v3834_v22 }
  0x69   : > { %3430 = vmatmul.mubr.msk.bf16.gmra.mxu0 %vm340_vm0, %v3835_v23 }
 0x111   : > { %v3419_v26 = vpop.f32.mrf.mxu0 }
 0x112   : > { %490 = vmax.xlane.f32.xlu1 %v3419_v26 }
 0x113   : > { %v423_v27 = vpop.f32.mrf.mxu0 }
 0x114   : > { %486 = vmax.xlane.f32.xlu0 %v423_v27 }
 0x115   : > { %v3420_v28 = vpop.f32.mrf.mxu0 }
 0x116   : > { %492 = vmax.xlane.f32.xlu1 %v3420_v28 }
 0x117   : > { %v426_v29 = vpop.f32.mrf.mxu0 }
 0x118   : > { %488 = vmax.xlane.f32.xlu0 %v426_v29 }
 0x119   : > { %v4276_v30 = vpop.f32.mrf.mxu0 }
 0x11b   : > { %v4278_v31 = vpop.f32.mrf.mxu0 }
 0x11c   : > { %494 = vmax.xlane.f32.xlu0 %v4278_v31 }
 0x11d   : > { %v4282_v33 = vpop.f32.mrf.mxu0 }
 0x11f   : > { %v442_v34 = vpop.f32.mrf.mxu0 }
 0x120   : > { %498 = vmax.xlane.f32.xlu0 %v4276_v30  ;;  %496 = vmax.xlane.f32.xlu1 %v442_v34 }
 0x121   : > { %v4286_v36 = vpop.f32.mrf.mxu0 }
 0x123   : > { %v4288_v37 = vpop.f32.mrf.mxu0 }
 0x124   : > { %500 = vmax.xlane.f32.xlu1 %v4282_v33  ;;  %502 = vmax.xlane.f32.xlu0 %v4288_v37 }
 0x125   : > { %v4293_v39 = vpop.f32.mrf.mxu0 }
 0x127   : > { %v4295_v40 = vpop.f32.mrf.mxu0 }
 0x128   : > { %506 = vmax.xlane.f32.xlu0 %v4286_v36  ;;  %504 = vmax.xlane.f32.xlu1 %v4295_v40 }
 0x129   : > { %v4299_v41 = vpop.f32.mrf.mxu0 }
 0x12b   : > { %v4302_v43 = vpop.f32.mrf.mxu0 }
 0x12c   : > { %508 = vmax.xlane.f32.xlu1 %v4293_v39  ;;  %510 = vmax.xlane.f32.xlu0 %v4302_v43 }
 0x12d   : > { %v4306_v44 = vpop.f32.mrf.mxu0 }
 0x12f   : > { %v4309_v46 = vpop.f32.mrf.mxu0 }
 0x130   : > { %514 = vmax.xlane.f32.xlu0 %v4299_v41  ;;  %512 = vmax.xlane.f32.xlu1 %v4309_v46 }
 0x134   : > { %516 = vmax.xlane.f32.xlu1 %v4306_v44 }
 0x19b   : > { %v491_v49 = vpop.xlane.xlu1 %490 }
 0x19c   : > { %v520_v52 = vsub.f32 %v3419_v26, %v491_v49  ;;  %v960_v26 = vsel %vm340_vm0, %v3844_v48, 0 }
 0x19d   : > { %v487_v50 = vpop.xlane.xlu0 %486 }
 0x19e   : > { %v518_v51 = vsub.f32 %v423_v27, %v487_v50  ;;  %v538_v59 = vmul.f32 1.442695, %v520_v52  ;;  %v3845_v27 = vld [vmem:[%s4220_s17 + $0x70] sm:$0xff]   ;;  %v954_v52 = vsel %vm340_vm0, %v3846_v45, 0 }
 0x19f   : > { %v493_v53 = vpop.xlane.xlu1 %492 }
 0x1a0   : > { %v534_v54 = vmul.f32 1.442695, %v518_v51  ;;  %v521_v55 = vsub.f32 %v3420_v28, %v493_v53  ;;  %v3847_v53 = vld [vmem:[%s4220_s17 + $0x60] sm:$0xff]  }
 0x1a1   : > { %v489_v56 = vpop.xlane.xlu0 %488 }
 0x1a2   : > { %v540_v57 = vmul.f32 1.442695, %v521_v55  ;;  %v519_v58 = vsub.f32 %v426_v29, %v489_v56  ;;  %3916 = vpow2.f32 %v534_v54 }
 0x1a4   : > { %v536_v60 = vmul.f32 1.442695, %v519_v58  ;;  %3918 = vpow2.f32 %v540_v57 }
 0x1a5   : > { %v495_v61 = vpop.xlane.xlu0 %494 }
 0x1a6   : > { %3920 = vpow2.f32 %v536_v60  ;;  %v522_v62 = vsub.f32 %v4278_v31, %v495_v61  ;;  %v951_v60 = vsel %vm340_vm0, %v3847_v53, 0  ;;  %v3848_v61 = vld [vmem:[%s4220_s17 + $0x58] sm:$0xff]  }
 0x1a7   : > { %3922 = vpow2.f32 %v538_v59 }
 0x1a8   : > { %v542_v1 = vmul.f32 1.442695, %v522_v62 }
 0x1a9   : > { %v499_v63 = vpop.xlane.xlu0 %498  ;;  %v497_v0 = vpop.xlane.xlu1 %496 }
 0x1aa   : > { %v524_v2 = vsub.f32 %v4276_v30, %v499_v63  ;;  %v523_v3 = vsub.f32 %v442_v34, %v497_v0  ;;  %3924 = vpow2.f32 %v542_v1  ;;  %v3852_v0 = vld [vmem:[%s4231_s20 + $0x40] sm:$0xff]  }
 0x1ac   : > { %v544_v4 = vmul.f32 1.442695, %v523_v3  ;;  %v546_v5 = vmul.f32 1.442695, %v524_v2  ;;  %v948_v2 = vsel %vm340_vm0, %v3848_v61, 0  ;;  %v3849_v3 = vld [vmem:[%s4220_s17 + $0x50] sm:$0xff]  }
 0x1ad   : > { %v501_v6 = vpop.xlane.xlu1 %500  ;;  %v503_v7 = vpop.xlane.xlu0 %502 }
 0x1ae   : > { %v525_v8 = vsub.f32 %v4282_v33, %v501_v6  ;;  %v526_v9 = vsub.f32 %v4288_v37, %v503_v7  ;;  %3926 = vpow2.f32 %v544_v4  ;;  %v945_v4 = vsel %vm340_vm0, %v3849_v3, 0  ;;  %v3851_v7 = vld [vmem:[%s4220_s17 + $0x40] sm:$0xff]  }
 0x1af   : > { %v4321_v11 = vpop.eup %3916  ;;  %3928 = vpow2.f32 %v546_v5  ;;  %v3850_v5 = vld [vmem:[%s4220_s17 + $0x48] sm:$0xff]  }
 0x1b0   : > { %v548_v10 = vmul.f32 1.442695, %v525_v8  ;;  %v550_v15 = vmul.f32 1.442695, %v526_v9  ;;  %v942_v6 = vsel %vm340_vm0, %v3850_v5, 0  ;;  %v939_v8 = vsel %vm340_vm0, %v3851_v7, 0 }
 0x1b1   : > { %v507_v12 = vpop.xlane.xlu0 %506  ;;  %v505_v13 = vpop.xlane.xlu1 %504  ;;  %v3853_v9 = vld [vmem:[%s4231_s20 + $0x48] sm:$0xff]  }
 0x1b2   : > { %v4323_v14 = vpop.eup %3918  ;;  %3930 = vpow2.f32 %v548_v10  ;;  %v528_v16 = vsub.f32 %v4286_v36, %v507_v12  ;;  %v527_v17 = vsub.f32 %v4295_v40, %v505_v13  ;;  %v3854_v10 = vld [vmem:[%s4231_s20 + $0x50] sm:$0xff]   ;;  %v3855_v12 = vld [vmem:[%s4231_s20 + $0x58] sm:$0xff]   ;;  %v3856_v13 = vld [vmem:[%s4231_s20 + $0x60] sm:$0xff]  }
 0x1b3   : > { %v4327_v18 = vpop.eup %3920  ;;  %3932 = vpow2.f32 %v550_v15  ;;  %v3857_v15 = vld [vmem:[%s4231_s20 + $0x68] sm:$0xff]  }
 0x1b4   : > { %v4329_v19 = vpop.eup %3922  ;;  %v552_v20 = vmul.f32 1.442695, %v527_v17  ;;  %v598_v21 = vpack.c.bf16 %v4327_v18, %v4321_v11  ;;  %v554_v22 = vmul.f32 1.442695, %v528_v16  ;;  %v3858_v16 = vld [vmem:[%s4231_s20 + $0x70] sm:$0xff]   ;;  %v3859_v17 = vld [vmem:[%s4231_s20 + $0x78] sm:$0xff]  }
 0x1b5   : > { %v509_v23 = vpop.xlane.xlu1 %508  ;;  %v511_v24 = vpop.xlane.xlu0 %510  ;;  %v599_v25 = vpack.c.bf16 %v4323_v14, %v4329_v19 }
 0x1b6   : > { %v529_v28 = vsub.f32 %v4293_v39, %v509_v23  ;;  %v530_v29 = vsub.f32 %v4302_v43, %v511_v24  ;;  %3449 = vmatprep.mubr.bf16.mxu1 %v598_v21  ;;  %3934 = vpow2.f32 %v552_v20  ;;  %v957_v43 = vsel %vm340_vm0, %v3845_v27, 0  ;;  %v3860_v20 = vld [vmem:[%s4272_s23 + $0x78] sm:$0xff]   ;;  %v3861_v21 = vld [vmem:[%s4272_s23 + $0x70] sm:$0xff]  }
 0x1b7   : > { %3450 = vmatmul.mubr.bf16.vlgmr.msra.gmra.mxu1 %v599_v25  ;;  %3936 = vpow2.f32 %v554_v22  ;;  %v4342_v36 = vpop.eup %3924  ;;  %3497 = vmatprep.subr.bf16.mxu0 %v3860_v20 }
 0x1b8   : > { %v556_v30 = vmul.f32 1.442695, %v529_v28  ;;  %3466 = vmatpush3.bf16.xpose.msra.mxu1 %v960_v26  ;;  %v558_v33 = vmul.f32 1.442695, %v530_v29  ;;  %3498 = vmatpush3.bf16.msra.mxu0 %v3860_v20 }
 0x1b9   : > { %v515_v31 = vpop.xlane.xlu0 %514  ;;  %v513_v32 = vpop.xlane.xlu1 %512  ;;  %3666 = vmatprep.subr.msk.bf16.mxu1 %vm340_vm0, %v3845_v27  ;;  %3499 = vmatprep.subr.bf16.mxu0 %v3861_v21 }
 0x1ba   : > { %3938 = vpow2.f32 %v556_v30  ;;  %v532_v34 = vsub.f32 %v4299_v41, %v515_v31  ;;  %v531_v35 = vsub.f32 %v4309_v46, %v513_v32 }
 0x1bb   : > { %v4344_v37 = vpop.eup %3926  ;;  %3940 = vpow2.f32 %v558_v33 }
 0x1bc   : > { %v560_v38 = vmul.f32 1.442695, %v531_v35  ;;  %v562_v39 = vmul.f32 1.442695, %v532_v34  ;;  %v600_v42 = vpack.c.bf16 %v4344_v37, %v4342_v36  ;;  %v4350_v47 = vpop.eup %3928  ;;  %3500 = vmatpush3.bf16.msra.mxu0 %v3861_v21 }
 0x1bd   : > { %v517_v40 = vpop.xlane.xlu1 %516 }
 0x1be   : > { %v533_v41 = vsub.f32 %v4306_v44, %v517_v40  ;;  %3942 = vpow2.f32 %v560_v38  ;;  %3453 = vmatprep.mubr.bf16.mxu1 %v600_v42 }
 0x1bf   : > { %v4353_v46 = vpop.eup %3930  ;;  %3944 = vpow2.f32 %v562_v39 }
 0x1c0   : > { %v564_v48 = vmul.f32 1.442695, %v533_v41  ;;  %3468 = vmatpush3.bf16.xpose.msra.mxu1 %v957_v43  ;;  %v601_v49 = vpack.c.bf16 %v4353_v46, %v4350_v47  ;;  %v4358_v50 = vpop.eup %3932 }
 0x1c1   : > { %3667 = vmatprep.subr.msk.bf16.mxu1 %vm340_vm0, %v3846_v45 }
 0x1c2   : > { %3946 = vpow2.f32 %v564_v48  ;;  %3454 = vmatmul.mubr.bf16.gmra.mxu1 %v601_v49 }
 0x1c3   : > { %v4360_v51 = vpop.eup %3934 }
 0x1c4   : > { %v602_v44 = vpack.c.bf16 %v4360_v51, %v4358_v50  ;;  %v4366_v54 = vpop.eup %3936 }
 0x1c6   : > { %3457 = vmatprep.mubr.bf16.mxu1 %v602_v44 }
 0x1c7   : > { %v4368_v55 = vpop.eup %3938 }
 0x1c8   : > { %3470 = vmatpush3.bf16.xpose.msra.mxu1 %v954_v52  ;;  %v603_v56 = vpack.c.bf16 %v4368_v55, %v4366_v54  ;;  %v4373_v57 = vpop.eup %3940  ;;  %v3862_v52 = vld [vmem:[%s4272_s23 + $0x68] sm:$0xff]  }
 0x1c9   : > { %3668 = vmatprep.subr.msk.bf16.mxu1 %vm340_vm0, %v3847_v53  ;;  %3501 = vmatprep.subr.bf16.mxu0 %v3862_v52 }
 0x1ca   : > { %3458 = vmatmul.mubr.bf16.gmra.mxu1 %v603_v56  ;;  %3502 = vmatpush3.bf16.msra.mxu0 %v3862_v52 }
 0x1cb   : > { %v4375_v58 = vpop.eup %3942 }
 0x1cc   : > { %v604_v59 = vpack.c.bf16 %v4375_v58, %v4373_v57  ;;  %v4381_v62 = vpop.eup %3944 }
 0x1ce   : > { %3461 = vmatprep.mubr.bf16.mxu1 %v604_v59  ;;  %v3863_v59 = vld [vmem:[%s4272_s23 + $0x60] sm:$0xff]  }
 0x1cf   : > { %v4383_v63 = vpop.eup %3946  ;;  %3503 = vmatprep.subr.bf16.mxu0 %v3863_v59 }
 0x1d0   : > { %3472 = vmatpush3.bf16.xpose.msra.mxu1 %v951_v60  ;;  %v605_v1 = vpack.c.bf16 %v4383_v63, %v4381_v62  ;;  %3504 = vmatpush3.bf16.msra.mxu0 %v3863_v59 }
 0x1d1   : > { %3669 = vmatprep.subr.msk.bf16.mxu1 %vm340_vm0, %v3848_v61 }
 0x1d2   : > { %3462 = vmatmul.mubr.bf16.gmra.mxu1 %v605_v1 }
 0x1d3   : > { %3481 = vmatprep.mubr.msk.bf16.mxu1 %vm340_vm0, %v3852_v0  ;;  %v3864_v0 = vld [vmem:[%s4272_s23 + $0x58] sm:$0xff]  }
 0x1d4   : > { %3505 = vmatprep.subr.bf16.mxu0 %v3864_v0 }
 0x1d5   : > { %3506 = vmatpush3.bf16.msra.mxu0 %v3864_v0 }
 0x1d8   : > { %3474 = vmatpush3.bf16.xpose.msra.mxu1 %v948_v2 }
 0x1d9   : > { %3670 = vmatprep.subr.msk.bf16.mxu1 %vm340_vm0, %v3849_v3  ;;  %v3865_v3 = vld [vmem:[%s4272_s23 + $0x50] sm:$0xff]  }
 0x1da   : > { %3507 = vmatprep.subr.bf16.mxu0 %v3865_v3 }
 0x1db   : > { %3508 = vmatpush3.bf16.msra.mxu0 %v3865_v3 }
 0x1e0   : > { %3476 = vmatpush3.bf16.xpose.msra.mxu1 %v945_v4 }
 0x1e1   : > { %3671 = vmatprep.subr.msk.bf16.mxu1 %vm340_vm0, %v3850_v5 }
 0x1e8   : > { %3478 = vmatpush3.bf16.xpose.msra.mxu1 %v942_v6  ;;  %v3866_v6 = vld [vmem:[%s4272_s23 + $0x48] sm:$0xff]  }
 0x1e9   : > { %3672 = vmatprep.subr.msk.bf16.mxu1 %vm340_vm0, %v3851_v7  ;;  %3509 = vmatprep.subr.bf16.mxu0 %v3866_v6  ;;  %v3867_v7 = vld [vmem:[%s4272_s23 + $0x40] sm:$0xff]  }
 0x1ea   : > { %3510 = vmatpush3.bf16.msra.mxu0 %v3866_v6 }
 0x1eb   : > { %3511 = vmatprep.subr.bf16.mxu0 %v3867_v7 }
 0x1ee   : > { %3512 = vmatpush3.bf16.msra.mxu0 %v3867_v7 }
 0x1f0   : > { %3480 = vmatpush3.bf16.xpose.msra.mxu1 %v939_v8  ;;  %v3868_v8 = vld [vmem:[%s4220_s17 + $0xb8] sm:$0xff]  }
 0x1f1   : > { %3673 = vmatprep.subr.msk.bf16.mxu0 %vm340_vm0, %v3868_v8 }
 0x1f7   : > { %3482 = vmatmul.mubr.msk.bf16.vlgmr.msra.gmra.mxu1 %vm340_vm0, %v3853_v9 }
 0x1f8   : > { %3485 = vmatprep.mubr.msk.bf16.mxu1 %vm340_vm0, %v3854_v10 }
 0x1ff   : > { %3486 = vmatmul.mubr.msk.bf16.gmra.mxu1 %vm340_vm0, %v3855_v12 }
 0x200   : > { %3489 = vmatprep.mubr.msk.bf16.mxu1 %vm340_vm0, %v3856_v13 }
 0x207   : > { %3490 = vmatmul.mubr.msk.bf16.gmra.mxu1 %vm340_vm0, %v3857_v15 }
 0x208   : > { %3493 = vmatprep.mubr.msk.bf16.mxu1 %vm340_vm0, %v3858_v16 }
 0x20f   : > { %3494 = vmatmul.mubr.msk.bf16.gmra.mxu1 %vm340_vm0, %v3859_v17 }
 0x277   : > { %v4416_v22 = vpop.f32.mrf.mxu1 }
 0x278   : > { %5170 = vst [vmem:[#allocation2_spill] sm:$0xff] %v4416_v22 }
 0x279   : > { %v4418_v23 = vpop.f32.mrf.mxu1 }
 0x27a   : > { %5171 = vst [vmem:[#allocation3_spill] sm:$0xff] %v4418_v23 }
 0x27b   : > { %v4420_v24 = vpop.f32.mrf.mxu1 }
 0x27c   : > { %5172 = vst [vmem:[#allocation4_spill] sm:$0xff] %v4420_v24 }
 0x27d   : > { %v4422_v25 = vpop.f32.mrf.mxu1 }
 0x27e   : > { %5173 = vst [vmem:[#allocation5_spill] sm:$0xff] %v4422_v25 }
 0x282   : > { %v4424_v26 = vpop.f32.mrf.mxu1 }
 0x283   : > { %5174 = vst [vmem:[#allocation6_spill] sm:$0xff] %v4424_v26 }
 0x284   : > { %v4426_v27 = vpop.f32.mrf.mxu1 }
 0x285   : > { %5175 = vst [vmem:[#allocation7_spill] sm:$0xff] %v4426_v27  ;;  %v3887_v27 = vld [vmem:[%s4272_s23 + $0xa0] sm:$0xff]  }
 0x286   : > { %v4428_v28 = vpop.f32.mrf.mxu1 }
 0x287   : > { %5176 = vst [vmem:[#allocation8_spill] sm:$0xff] %v4428_v28 }
 0x288   : > { %v4430_v29 = vpop.f32.mrf.mxu1 }
 0x289   : > { %5177 = vst [vmem:[#allocation9_spill] sm:$0xff] %v4430_v29  ;;  %v3886_v29 = vld [vmem:[%s4272_s23 + $0xa8] sm:$0xff]  }
 0x28a   : > { %v4432_v30 = vpop.f32.mrf.mxu1 }
 0x28b   : > { %5178 = vst [vmem:[#allocation10_spill] sm:$0xff] %v4432_v30 }
 0x28c   : > { %v4434_v31 = vpop.f32.mrf.mxu1 }
 0x28d   : > { %5179 = vst [vmem:[#allocation11_spill] sm:$0xff] %v4434_v31 }
 0x28e   : > { %v4436_v32 = vpop.f32.mrf.mxu1 }
 0x28f   : > { %5180 = vst [vmem:[#allocation12_spill] sm:$0xff] %v4436_v32 }
 0x290   : > { %v4438_v33 = vpop.f32.mrf.mxu1 }
 0x291   : > { %5181 = vst [vmem:[#allocation13_spill] sm:$0xff] %v4438_v33 }
 0x292   : > { %v4440_v34 = vpop.f32.mrf.mxu1 }
 0x293   : > { %5182 = vst [vmem:[#allocation14_spill] sm:$0xff] %v4440_v34 }
 0x294   : > { %v4442_v35 = vpop.f32.mrf.mxu1 }
 0x295   : > { %5183 = vst [vmem:[#allocation15_spill] sm:$0xff] %v4442_v35 }
 0x296   : > { %v4444_v38 = vpop.f32.mrf.mxu1 }
 0x297   : > { %5184 = vst [vmem:[#allocation16_spill] sm:$0xff] %v4444_v38 }
 0x298   : > { %v4446_v39 = vpop.f32.mrf.mxu1 }
 0x299   : > { %5185 = vst [vmem:[#allocation17_spill] sm:$0xff] %v4446_v39 }
 0x2b7   : > { %v3483_v40 = vpop.f32.mrf.mxu1 }
 0x2b9   : > { %v996_v42 = vpop.f32.mrf.mxu1 }
 0x2ba   : > { %1059 = vmax.xlane.f32.xlu0 %v996_v42 }
 0x2bb   : > { %v4448_v43 = vpop.f32.mrf.mxu1 }
 0x2bd   : > { %v999_v45 = vpop.f32.mrf.mxu1 }
 0x2be   : > { %1063 = vmax.xlane.f32.xlu0 %v3483_v40  ;;  %1061 = vmax.xlane.f32.xlu1 %v999_v45 }
 0x2bf   : > { %v4450_v41 = vpop.f32.mrf.mxu1 }
 0x2c1   : > { %v4452_v48 = vpop.f32.mrf.mxu1 }
 0x2c2   : > { %1065 = vmax.xlane.f32.xlu1 %v4448_v43  ;;  %1067 = vmax.xlane.f32.xlu0 %v4452_v48 }
 0x2c3   : > { %v4456_v49 = vpop.f32.mrf.mxu1 }
 0x2c5   : > { %v4458_v44 = vpop.f32.mrf.mxu1 }
 0x2c6   : > { %1071 = vmax.xlane.f32.xlu0 %v4450_v41  ;;  %1069 = vmax.xlane.f32.xlu1 %v4458_v44 }
 0x2c7   : > { %v4463_v53 = vpop.f32.mrf.mxu1 }
 0x2c9   : > { %v4465_v56 = vpop.f32.mrf.mxu1 }
 0x2ca   : > { %1073 = vmax.xlane.f32.xlu1 %v4456_v49  ;;  %1075 = vmax.xlane.f32.xlu0 %v4465_v56 }
 0x2cb   : > { %v4470_v60 = vpop.f32.mrf.mxu1 }
 0x2cd   : > { %v4472_v61 = vpop.f32.mrf.mxu1 }
 0x2ce   : > { %1079 = vmax.xlane.f32.xlu0 %v4463_v53  ;;  %1077 = vmax.xlane.f32.xlu1 %v4472_v61 }
 0x2cf   : > { %v4477_v1 = vpop.f32.mrf.mxu1 }
 0x2d1   : > { %v4479_v2 = vpop.f32.mrf.mxu1 }
 0x2d2   : > { %1081 = vmax.xlane.f32.xlu1 %v4470_v60  ;;  %1083 = vmax.xlane.f32.xlu0 %v4479_v2 }
 0x2d3   : > { %v4484_v4 = vpop.f32.mrf.mxu1 }
 0x2d5   : > { %v4486_v5 = vpop.f32.mrf.mxu1 }
 0x2d6   : > { %1087 = vmax.xlane.f32.xlu0 %v4477_v1  ;;  %1085 = vmax.xlane.f32.xlu1 %v4486_v5 }
 0x2da   : > { %1089 = vmax.xlane.f32.xlu1 %v4484_v4 }
 0x343   : > { %v1060_v9 = vpop.xlane.xlu0 %1059 }
 0x344   : > { %v1091_v10 = vsub.f32 %v996_v42, %v1060_v9 }
 0x346   : > { %v1107_v15 = vmul.f32 1.442695, %v1091_v10 }
 0x347   : > { %v1064_v12 = vpop.xlane.xlu0 %1063  ;;  %v1062_v13 = vpop.xlane.xlu1 %1061 }
 0x348   : > { %v1093_v16 = vsub.f32 %v3483_v40, %v1064_v12  ;;  %v1092_v17 = vsub.f32 %v999_v45, %v1062_v13  ;;  %3948 = vpow2.f32 %v1107_v15 }
 0x34a   : > { %v1109_v20 = vmul.f32 1.442695, %v1092_v17  ;;  %v1111_v21 = vmul.f32 1.442695, %v1093_v16 }
 0x34b   : > { %v1066_v52 = vpop.xlane.xlu1 %1065  ;;  %v1068_v59 = vpop.xlane.xlu0 %1067 }
 0x34c   : > { %v1094_v0 = vsub.f32 %v4448_v43, %v1066_v52  ;;  %v1095_v3 = vsub.f32 %v4452_v48, %v1068_v59  ;;  %3950 = vpow2.f32 %v1109_v20 }
 0x34d   : > { %3952 = vpow2.f32 %v1111_v21 }
 0x34e   : > { %v1113_v6 = vmul.f32 1.442695, %v1094_v0  ;;  %v1115_v42 = vmul.f32 1.442695, %v1095_v3 }
 0x34f   : > { %v1072_v7 = vpop.xlane.xlu0 %1071  ;;  %v1070_v39 = vpop.xlane.xlu1 %1069 }
 0x350   : > { %3954 = vpow2.f32 %v1113_v6  ;;  %v1097_v9 = vsub.f32 %v4450_v41, %v1072_v7  ;;  %v1096_v40 = vsub.f32 %v4458_v44, %v1070_v39 }
 0x351   : > { %3956 = vpow2.f32 %v1115_v42 }
 0x352   : > { %v1117_v45 = vmul.f32 1.442695, %v1096_v40  ;;  %v1119_v10 = vmul.f32 1.442695, %v1097_v9  ;;  %v1533_v9 = vsel %vm340_vm0, %v3868_v8, 0  ;;  %v3869_v40 = vld [vmem:[%s4220_s17 + $0xb0] sm:$0xff]  }
 0x353   : > { %v1074_v12 = vpop.xlane.xlu1 %1073  ;;  %v1076_v13 = vpop.xlane.xlu0 %1075 }
 0x354   : > { %v1098_v43 = vsub.f32 %v4456_v49, %v1074_v12  ;;  %v1099_v48 = vsub.f32 %v4465_v56, %v1076_v13  ;;  %3958 = vpow2.f32 %v1117_v45 }
 0x355   : > { %3960 = vpow2.f32 %v1119_v10  ;;  %v4503_v44 = vpop.eup %3948 }
 0x356   : > { %v1121_v15 = vmul.f32 1.442695, %v1098_v43  ;;  %v1123_v20 = vmul.f32 1.442695, %v1099_v48 }
 0x357   : > { %v1080_v16 = vpop.xlane.xlu0 %1079  ;;  %v1078_v17 = vpop.xlane.xlu1 %1077 }
 0x358   : > { %3962 = vpow2.f32 %v1121_v15  ;;  %v1101_v41 = vsub.f32 %v4463_v53, %v1080_v16  ;;  %v1100_v39 = vsub.f32 %v4472_v61, %v1078_v17 }
 0x359   : > { %v4505_v21 = vpop.eup %3950  ;;  %3964 = vpow2.f32 %v1123_v20 }
 0x35a   : > { %v1125_v52 = vmul.f32 1.442695, %v1100_v39  ;;  %v1127_v49 = vmul.f32 1.442695, %v1101_v41  ;;  %v1171_v0 = vpack.c.bf16 %v4505_v21, %v4503_v44  ;;  %v4509_v3 = vpop.eup %3952  ;;  %v1530_v39 = vsel %vm340_vm0, %v3869_v40, 0 }
 0x35b   : > { %v1082_v59 = vpop.xlane.xlu1 %1081  ;;  %v1084_v56 = vpop.xlane.xlu0 %1083 }
 0x35c   : > { %v1102_v6 = vsub.f32 %v4470_v60, %v1082_v59  ;;  %v1103_v53 = vsub.f32 %v4479_v2, %v1084_v56  ;;  %3966 = vpow2.f32 %v1125_v52  ;;  %3513 = vmatprep.mubr.bf16.mxu0 %v1171_v0  ;;  %v3870_v52 = vld [vmem:[%s4220_s17 + $0xa8] sm:$0xff]  }
 0x35d   : > { %v4513_v61 = vpop.eup %3954  ;;  %3968 = vpow2.f32 %v1127_v49 }
 0x35e   : > { %v1129_v7 = vmul.f32 1.442695, %v1102_v6  ;;  %v1172_v42 = vpack.c.bf16 %v4513_v61, %v4509_v3  ;;  %v1131_v12 = vmul.f32 1.442695, %v1103_v53  ;;  %v4521_v13 = vpop.eup %3956  ;;  %v1527_v53 = vsel %vm340_vm0, %v3870_v52, 0 }
 0x35f   : > { %v1088_v45 = vpop.xlane.xlu0 %1087  ;;  %v1086_v10 = vpop.xlane.xlu1 %1085 }
 0x360   : > { %3970 = vpow2.f32 %v1129_v7  ;;  %v1105_v60 = vsub.f32 %v4477_v1, %v1088_v45  ;;  %v1104_v2 = vsub.f32 %v4486_v5, %v1086_v10  ;;  %3514 = vmatmul.mubr.bf16.vlgmr.msra.gmra.mxu0 %v1172_v42  ;;  %v3871_v7 = vld [vmem:[%s4220_s17 + $0xa0] sm:$0xff]  }
 0x361   : > { %3530 = vmatpush3.bf16.xpose.msra.mxu0 %v1533_v9  ;;  %v4523_v43 = vpop.eup %3958  ;;  %3972 = vpow2.f32 %v1131_v12  ;;  %v3876_v12 = vld [vmem:[%s4231_s20 + $0x80] sm:$0xff]  }
 0x362   : > { %v1133_v48 = vmul.f32 1.442695, %v1104_v2  ;;  %3674 = vmatprep.subr.msk.bf16.mxu0 %vm340_vm0, %v3869_v40  ;;  %v1135_v8 = vmul.f32 1.442695, %v1105_v60  ;;  %v1173_v16 = vpack.c.bf16 %v4523_v43, %v4521_v13  ;;  %v4528_v17 = vpop.eup %3960  ;;  %v1524_v2 = vsel %vm340_vm0, %v3871_v7, 0 }
 0x363   : > { %v1090_v15 = vpop.xlane.xlu1 %1089 }
 0x364   : > { %v1106_v1 = vsub.f32 %v4484_v4, %v1090_v15  ;;  %3974 = vpow2.f32 %v1133_v48  ;;  %3517 = vmatprep.mubr.bf16.mxu0 %v1173_v16  ;;  %v3872_v48 = vld [vmem:[%s4220_s17 + $0x98] sm:$0xff]   ;;  %v3873_v15 = vld [vmem:[%s4220_s17 + $0x90] sm:$0xff]  }
 0x365   : > { %v4531_v5 = vpop.eup %3962  ;;  %3976 = vpow2.f32 %v1135_v8  ;;  %v1521_v8 = vsel %vm340_vm0, %v3872_v48, 0  ;;  %v1518_v16 = vsel %vm340_vm0, %v3873_v15, 0 }
 0x366   : > { %v1137_v20 = vmul.f32 1.442695, %v1106_v1  ;;  %v1174_v41 = vpack.c.bf16 %v4531_v5, %v4528_v17  ;;  %v4537_v49 = vpop.eup %3964  ;;  %v3874_v1 = vld [vmem:[%s4220_s17 + $0x88] sm:$0xff]  }
 0x368   : > { %3978 = vpow2.f32 %v1137_v20  ;;  %3518 = vmatmul.mubr.bf16.gmra.mxu0 %v1174_v41  ;;  %v1515_v20 = vsel %vm340_vm0, %v3874_v1, 0  ;;  %v3875_v41 = vld [vmem:[%s4220_s17 + $0x80] sm:$0xff]  }
 0x369   : > { %3532 = vmatpush3.bf16.xpose.msra.mxu0 %v1530_v39  ;;  %v4539_v59 = vpop.eup %3966  ;;  %v1512_v39 = vsel %vm340_vm0, %v3875_v41, 0 }
 0x36a   : > { %3675 = vmatprep.subr.msk.bf16.mxu0 %vm340_vm0, %v3870_v52  ;;  %v1175_v4 = vpack.c.bf16 %v4539_v59, %v4537_v49  ;;  %v4544_v56 = vpop.eup %3968  ;;  %v3877_v52 = vld [vmem:[%s4231_s20 + $0x88] sm:$0xff]  }
 0x36c   : > { %3521 = vmatprep.mubr.bf16.mxu0 %v1175_v4  ;;  %v3878_v4 = vld [vmem:[%s4231_s20 + $0x90] sm:$0xff]  }
 0x36d   : > { %v4546_v0 = vpop.eup %3970 }
 0x36e   : > { %v1176_v6 = vpack.c.bf16 %v4546_v0, %v4544_v56  ;;  %v4552_v42 = vpop.eup %3972 }
 0x370   : > { %3522 = vmatmul.mubr.bf16.gmra.mxu0 %v1176_v6  ;;  %v3879_v6 = vld [vmem:[%s4231_s20 + $0x98] sm:$0xff]  }
 0x371   : > { %3534 = vmatpush3.bf16.xpose.msra.mxu0 %v1527_v53  ;;  %v4554_v9 = vpop.eup %3974  ;;  %v3880_v53 = vld [vmem:[%s4231_s20 + $0xa0] sm:$0xff]  }
 0x372   : > { %3676 = vmatprep.subr.msk.bf16.mxu0 %vm340_vm0, %v3871_v7  ;;  %v1177_v40 = vpack.c.bf16 %v4554_v9, %v4552_v42  ;;  %v4559_v45 = vpop.eup %3976  ;;  %v3881_v7 = vld [vmem:[%s4231_s20 + $0xa8] sm:$0xff]  }
 0x374   : > { %3525 = vmatprep.mubr.bf16.mxu0 %v1177_v40  ;;  %v3882_v40 = vld [vmem:[%s4231_s20 + $0xb0] sm:$0xff]  }
 0x375   : > { %v4561_v10 = vpop.eup %3978 }
 0x376   : > { %5186 = vst [vmem:[#allocation18_spill] sm:$0xff] %v4561_v10  ;;  %v1178_v60 = vpack.c.bf16 %v4561_v10, %v4559_v45 }
 0x378   : > { %3526 = vmatmul.mubr.bf16.gmra.mxu0 %v1178_v60  ;;  %v3884_v60 = vld [vmem:[%s4272_s23 + $0xb8] sm:$0xff]  }
 0x379   : > { %3536 = vmatpush3.bf16.xpose.msra.mxu0 %v1524_v2  ;;  %3545 = vmatprep.mubr.msk.bf16.mxu0 %vm340_vm0, %v3876_v12  ;;  %v3883_v12 = vld [vmem:[%s4231_s20 + $0xb8] sm:$0xff]   ;;  %v3885_v2 = vld [vmem:[%s4272_s23 + $0xb0] sm:$0xff]  }
 0x37a   : > { %3677 = vmatprep.subr.msk.bf16.mxu0 %vm340_vm0, %v3872_v48  ;;  %3561 = vmatprep.subr.bf16.mxu1 %v3884_v60 }
 0x37b   : > { %3562 = vmatpush3.bf16.msra.mxu1 %v3884_v60 }
 0x37c   : > { %3563 = vmatprep.subr.bf16.mxu1 %v3885_v2 }
 0x37f   : > { %3564 = vmatpush3.bf16.msra.mxu1 %v3885_v2 }
 0x380   : > { %3565 = vmatprep.subr.bf16.mxu1 %v3886_v29 }
 0x381   : > { %3538 = vmatpush3.bf16.xpose.msra.mxu0 %v1521_v8 }
 0x382   : > { %3678 = vmatprep.subr.msk.bf16.mxu0 %vm340_vm0, %v3873_v15 }
 0x383   : > { %3566 = vmatpush3.bf16.msra.mxu1 %v3886_v29  ;;  %v3888_v29 = vld [vmem:[%s4272_s23 + $0x98] sm:$0xff]  }
 0x384   : > { %3567 = vmatprep.subr.bf16.mxu1 %v3887_v27 }
 0x387   : > { %3568 = vmatpush3.bf16.msra.mxu1 %v3887_v27 }
 0x388   : > { %3569 = vmatprep.subr.bf16.mxu1 %v3888_v29 }
 0x389   : > { %3540 = vmatpush3.bf16.xpose.msra.mxu0 %v1518_v16 }
 0x38a   : > { %3679 = vmatprep.subr.msk.bf16.mxu0 %vm340_vm0, %v3874_v1 }
 0x38b   : > { %3570 = vmatpush3.bf16.msra.mxu1 %v3888_v29  ;;  %v3891_v29 = vld [vmem:[%s4272_s23 + $0x80] sm:$0xff]  }
 0x391   : > { %3542 = vmatpush3.bf16.xpose.msra.mxu0 %v1515_v20 }
 0x392   : > { %3680 = vmatprep.subr.msk.bf16.mxu0 %vm340_vm0, %v3875_v41 }
 0x399   : > { %3544 = vmatpush3.bf16.xpose.msra.mxu0 %v1512_v39 }
 0x3a0   : > { %3546 = vmatmul.mubr.msk.bf16.vlgmr.msra.gmra.mxu0 %vm340_vm0, %v3877_v52 }
 0x3a1   : > { %3549 = vmatprep.mubr.msk.bf16.mxu0 %vm340_vm0, %v3878_v4 }
 0x3a8   : > { %3550 = vmatmul.mubr.msk.bf16.gmra.mxu0 %vm340_vm0, %v3879_v6 }
 0x3a9   : > { %3553 = vmatprep.mubr.msk.bf16.mxu0 %vm340_vm0, %v3880_v53 }
 0x3b0   : > { %3554 = vmatmul.mubr.msk.bf16.gmra.mxu0 %vm340_vm0, %v3881_v7 }
 0x3b1   : > { %3557 = vmatprep.mubr.msk.bf16.mxu0 %vm340_vm0, %v3882_v40 }
 0x3b8   : > { %3558 = vmatmul.mubr.msk.bf16.gmra.mxu0 %vm340_vm0, %v3883_v12 }
 0x420   : > { %v4596_v48 = vpop.f32.mrf.mxu0 }
 0x421   : > { %5187 = vst [vmem:[#allocation19_spill] sm:$0xff] %v4596_v48 }
 0x422   : > { %v4598_v8 = vpop.f32.mrf.mxu0 }
 0x423   : > { %5188 = vst [vmem:[#allocation20_spill] sm:$0xff] %v4598_v8 }
 0x424   : > { %v4600_v15 = vpop.f32.mrf.mxu0 }
 0x425   : > { %5189 = vst [vmem:[#allocation21_spill] sm:$0xff] %v4600_v15 }
 0x426   : > { %v4602_v16 = vpop.f32.mrf.mxu0 }
 0x427   : > { %5190 = vst [vmem:[#allocation22_spill] sm:$0xff] %v4602_v16 }
 0x428   : > { %v4604_v1 = vpop.f32.mrf.mxu0 }
 0x429   : > { %5191 = vst [vmem:[#allocation23_spill] sm:$0xff] %v4604_v1 }
 0x42a   : > { %v4606_v20 = vpop.f32.mrf.mxu0 }
 0x42b   : > { %5192 = vst [vmem:[#allocation24_spill] sm:$0xff] %v4606_v20 }
 0x42c   : > { %v4608_v41 = vpop.f32.mrf.mxu0 }
 0x42d   : > { %5193 = vst [vmem:[#allocation25_spill] sm:$0xff] %v4608_v41 }
 0x42e   : > { %v4610_v39 = vpop.f32.mrf.mxu0 }
 0x42f   : > { %5194 = vst [vmem:[#allocation26_spill] sm:$0xff] %v4610_v39 }
 0x430   : > { %v4612_v52 = vpop.f32.mrf.mxu0 }
 0x431   : > { %5195 = vst [vmem:[#allocation27_spill] sm:$0xff] %v4612_v52 }
 0x432   : > { %v4614_v4 = vpop.f32.mrf.mxu0 }
 0x433   : > { %5196 = vst [vmem:[#allocation28_spill] sm:$0xff] %v4614_v4 }
 0x434   : > { %v4616_v6 = vpop.f32.mrf.mxu0 }
 0x435   : > { %5197 = vst [vmem:[#allocation29_spill] sm:$0xff] %v4616_v6 }
 0x436   : > { %v4618_v53 = vpop.f32.mrf.mxu0 }
 0x437   : > { %5198 = vst [vmem:[#allocation30_spill] sm:$0xff] %v4618_v53 }
 0x438   : > { %v4620_v7 = vpop.f32.mrf.mxu0 }
 0x439   : > { %5199 = vst [vmem:[#allocation31_spill] sm:$0xff] %v4620_v7 }
 0x43a   : > { %v4622_v40 = vpop.f32.mrf.mxu0 }
 0x43b   : > { %5200 = vst [vmem:[#allocation32_spill] sm:$0xff] %v4622_v40  ;;  %v3892_v40 = vld [vmem:[%s4220_s17 + $0xf8] sm:$0xff]  }
 0x43c   : > { %v4624_v12 = vpop.f32.mrf.mxu0 }
 0x43d   : > { %5201 = vst [vmem:[#allocation33_spill] sm:$0xff] %v4624_v12  ;;  %v3889_v12 = vld [vmem:[%s4272_s23 + $0x90] sm:$0xff]  }
 0x43e   : > { %v4626_v60 = vpop.f32.mrf.mxu0  ;;  %3571 = vmatprep.subr.bf16.mxu1 %v3889_v12 }
 0x43f   : > { %5202 = vst [vmem:[#allocation34_spill] sm:$0xff] %v4626_v60  ;;  %3572 = vmatpush3.bf16.msra.mxu1 %v3889_v12  ;;  %v3890_v60 = vld [vmem:[%s4272_s23 + $0x88] sm:$0xff]  }
 0x440   : > { %3573 = vmatprep.subr.bf16.mxu1 %v3890_v60 }
 0x443   : > { %3574 = vmatpush3.bf16.msra.mxu1 %v3890_v60 }
 0x444   : > { %3575 = vmatprep.subr.bf16.mxu1 %v3891_v29 }
 0x447   : > { %3576 = vmatpush3.bf16.msra.mxu1 %v3891_v29 }
 0x448   : > { %3681 = vmatprep.subr.msk.bf16.mxu1 %vm340_vm0, %v3892_v40 }
 0x460   : > { %v3547_v2 = vpop.f32.mrf.mxu0 }
 0x462   : > { %v1569_v35 = vpop.f32.mrf.mxu0 }
 0x463   : > { %1632 = vmax.xlane.f32.xlu0 %v1569_v35 }
 0x464   : > { %v4628_v38 = vpop.f32.mrf.mxu0 }
 0x466   : > { %v1572_v34 = vpop.f32.mrf.mxu0 }
 0x467   : > { %1636 = vmax.xlane.f32.xlu0 %v3547_v2  ;;  %1634 = vmax.xlane.f32.xlu1 %v1572_v34 }
 0x468   : > { %v4630_v33 = vpop.f32.mrf.mxu0 }
 0x46a   : > { %v4632_v31 = vpop.f32.mrf.mxu0 }
 0x46b   : > { %1638 = vmax.xlane.f32.xlu1 %v4628_v38  ;;  %1640 = vmax.xlane.f32.xlu0 %v4632_v31 }
 0x46c   : > { %v4636_v32 = vpop.f32.mrf.mxu0 }
 0x46e   : > { %v4638_v30 = vpop.f32.mrf.mxu0 }
 0x46f   : > { %1644 = vmax.xlane.f32.xlu0 %v4630_v33  ;;  %1642 = vmax.xlane.f32.xlu1 %v4638_v30 }
 0x470   : > { %v4643_v28 = vpop.f32.mrf.mxu0 }
 0x472   : > { %v4645_v26 = vpop.f32.mrf.mxu0 }
 0x473   : > { %1646 = vmax.xlane.f32.xlu1 %v4636_v32  ;;  %1648 = vmax.xlane.f32.xlu0 %v4645_v26 }
 0x474   : > { %v4650_v24 = vpop.f32.mrf.mxu0 }
 0x476   : > { %v4652_v22 = vpop.f32.mrf.mxu0 }
 0x477   : > { %1652 = vmax.xlane.f32.xlu0 %v4643_v28  ;;  %1650 = vmax.xlane.f32.xlu1 %v4652_v22 }
 0x478   : > { %v4657_v25 = vpop.f32.mrf.mxu0 }
 0x47a   : > { %v4659_v23 = vpop.f32.mrf.mxu0 }
 0x47b   : > { %1654 = vmax.xlane.f32.xlu1 %v4650_v24  ;;  %1656 = vmax.xlane.f32.xlu0 %v4659_v23 }
 0x47c   : > { %v4664_v27 = vpop.f32.mrf.mxu0 }
 0x47e   : > { %v4666_v7 = vpop.f32.mrf.mxu0 }
 0x47f   : > { %1660 = vmax.xlane.f32.xlu0 %v4657_v25  ;;  %1658 = vmax.xlane.f32.xlu1 %v4666_v7 }
 0x483   : > { %1662 = vmax.xlane.f32.xlu1 %v4664_v27 }
 0x4ec   : > { %v1633_v6 = vpop.xlane.xlu0 %1632 }
 0x4ed   : > { %v1664_v52 = vsub.f32 %v1569_v35, %v1633_v6 }
 0x4ef   : > { %v1680_v12 = vmul.f32 1.442695, %v1664_v52 }
 0x4f0   : > { %v1637_v53 = vpop.xlane.xlu0 %1636  ;;  %v1635_v4 = vpop.xlane.xlu1 %1634 }
 0x4f1   : > { %v1666_v41 = vsub.f32 %v3547_v2, %v1637_v53  ;;  %v1665_v1 = vsub.f32 %v1572_v34, %v1635_v4  ;;  %3980 = vpow2.f32 %v1680_v12 }
 0x4f3   : > { %v1682_v39 = vmul.f32 1.442695, %v1665_v1  ;;  %v1684_v20 = vmul.f32 1.442695, %v1666_v41 }
 0x4f4   : > { %v1639_v15 = vpop.xlane.xlu1 %1638  ;;  %v1641_v48 = vpop.xlane.xlu0 %1640 }
 0x4f5   : > { %v1667_v60 = vsub.f32 %v4628_v38, %v1639_v15  ;;  %v1668_v16 = vsub.f32 %v4632_v31, %v1641_v48  ;;  %3982 = vpow2.f32 %v1682_v39 }
 0x4f6   : > { %3984 = vpow2.f32 %v1684_v20 }
 0x4f7   : > { %v1686_v29 = vmul.f32 1.442695, %v1667_v60  ;;  %v1688_v35 = vmul.f32 1.442695, %v1668_v16 }
 0x4f8   : > { %v1645_v8 = vpop.xlane.xlu0 %1644  ;;  %v1643_v10 = vpop.xlane.xlu1 %1642 }
 0x4f9   : > { %3986 = vpow2.f32 %v1686_v29  ;;  %v1670_v52 = vsub.f32 %v4630_v33, %v1645_v8  ;;  %v1669_v34 = vsub.f32 %v4638_v30, %v1643_v10 }
 0x4fa   : > { %3988 = vpow2.f32 %v1688_v35 }
 0x4fb   : > { %v1690_v1 = vmul.f32 1.442695, %v1669_v34  ;;  %v1692_v41 = vmul.f32 1.442695, %v1670_v52  ;;  %v2106_v52 = vsel %vm340_vm0, %v3892_v40, 0  ;;  %v3893_v34 = vld [vmem:[%s4220_s17 + $0xf0] sm:$0xff]  }
 0x4fc   : > { %v1647_v4 = vpop.xlane.xlu1 %1646  ;;  %v1649_v6 = vpop.xlane.xlu0 %1648 }
 0x4fd   : > { %v1671_v38 = vsub.f32 %v4636_v32, %v1647_v4  ;;  %v1672_v31 = vsub.f32 %v4645_v26, %v1649_v6  ;;  %3990 = vpow2.f32 %v1690_v1 }
 0x4fe   : > { %3992 = vpow2.f32 %v1692_v41  ;;  %v4683_v10 = vpop.eup %3980 }
 0x4ff   : > { %v1694_v48 = vmul.f32 1.442695, %v1671_v38  ;;  %v1696_v16 = vmul.f32 1.442695, %v1672_v31 }
 0x500   : > { %v1653_v15 = vpop.xlane.xlu0 %1652  ;;  %v1651_v20 = vpop.xlane.xlu1 %1650 }
 0x501   : > { %3994 = vpow2.f32 %v1694_v48  ;;  %v1674_v33 = vsub.f32 %v4643_v28, %v1653_v15  ;;  %v1673_v30 = vsub.f32 %v4652_v22, %v1651_v20 }
 0x502   : > { %v4685_v8 = vpop.eup %3982  ;;  %3996 = vpow2.f32 %v1696_v16 }
 0x503   : > { %v1698_v39 = vmul.f32 1.442695, %v1673_v30  ;;  %v1700_v32 = vmul.f32 1.442695, %v1674_v33  ;;  %v1744_v2 = vpack.c.bf16 %v4685_v8, %v4683_v10  ;;  %v4689_v12 = vpop.eup %3984  ;;  %v2103_v30 = vsel %vm340_vm0, %v3893_v34, 0 }
 0x504   : > { %v1655_v53 = vpop.xlane.xlu1 %1654  ;;  %v1657_v26 = vpop.xlane.xlu0 %1656 }
 0x505   : > { %v1675_v60 = vsub.f32 %v4650_v24, %v1655_v53  ;;  %v1676_v28 = vsub.f32 %v4659_v23, %v1657_v26  ;;  %3998 = vpow2.f32 %v1698_v39  ;;  %3577 = vmatprep.mubr.bf16.mxu1 %v1744_v2  ;;  %v3894_v39 = vld [vmem:[%s4220_s17 + $0xe8] sm:$0xff]  }
 0x506   : > { %v4693_v22 = vpop.eup %3986  ;;  %4000 = vpow2.f32 %v1700_v32 }
 0x507   : > { %v1702_v29 = vmul.f32 1.442695, %v1675_v60  ;;  %v1745_v35 = vpack.c.bf16 %v4693_v22, %v4689_v12  ;;  %v1704_v4 = vmul.f32 1.442695, %v1676_v28  ;;  %v4701_v6 = vpop.eup %3988  ;;  %v2100_v28 = vsel %vm340_vm0, %v3894_v39, 0 }
 0x508   : > { %v1661_v1 = vpop.xlane.xlu0 %1660  ;;  %v1659_v41 = vpop.xlane.xlu1 %1658 }
 0x509   : > { %4002 = vpow2.f32 %v1702_v29  ;;  %v1678_v24 = vsub.f32 %v4657_v25, %v1661_v1  ;;  %v1677_v23 = vsub.f32 %v4666_v7, %v1659_v41  ;;  %3578 = vmatmul.mubr.bf16.vlgmr.msra.gmra.mxu1 %v1745_v35  ;;  %v3895_v29 = vld [vmem:[%s4220_s17 + $0xe0] sm:$0xff]  }
 0x50a   : > { %3594 = vmatpush3.bf16.xpose.msra.mxu1 %v2106_v52  ;;  %v4703_v38 = vpop.eup %3990  ;;  %4004 = vpow2.f32 %v1704_v4  ;;  %v3900_v4 = vld [vmem:[%s4231_s20 + $0xc0] sm:$0xff]  }
 0x50b   : > { %v1706_v31 = vmul.f32 1.442695, %v1677_v23  ;;  %3682 = vmatprep.subr.msk.bf16.mxu1 %vm340_vm0, %v3893_v34  ;;  %v1708_v40 = vmul.f32 1.442695, %v1678_v24  ;;  %v1746_v15 = vpack.c.bf16 %v4703_v38, %v4701_v6  ;;  %v4708_v20 = vpop.eup %3992  ;;  %v2097_v23 = vsel %vm340_vm0, %v3895_v29, 0 }
 0x50c   : > { %v1663_v48 = vpop.xlane.xlu1 %1662 }
 0x50d   : > { %v1679_v25 = vsub.f32 %v4664_v27, %v1663_v48  ;;  %4006 = vpow2.f32 %v1706_v31  ;;  %3581 = vmatprep.mubr.bf16.mxu1 %v1746_v15  ;;  %v3896_v31 = vld [vmem:[%s4220_s17 + $0xd8] sm:$0xff]   ;;  %v3897_v48 = vld [vmem:[%s4220_s17 + $0xd0] sm:$0xff]  }
 0x50e   : > { %v4711_v7 = vpop.eup %3994  ;;  %4008 = vpow2.f32 %v1708_v40  ;;  %v2094_v40 = vsel %vm340_vm0, %v3896_v31, 0  ;;  %v2091_v15 = vsel %vm340_vm0, %v3897_v48, 0 }
 0x50f   : > { %v1710_v16 = vmul.f32 1.442695, %v1679_v25  ;;  %v1747_v33 = vpack.c.bf16 %v4711_v7, %v4708_v20  ;;  %v4717_v32 = vpop.eup %3996  ;;  %v3898_v25 = vld [vmem:[%s4220_s17 + $0xc8] sm:$0xff]  }
 0x511   : > { %4010 = vpow2.f32 %v1710_v16  ;;  %3582 = vmatmul.mubr.bf16.gmra.mxu1 %v1747_v33  ;;  %v2088_v16 = vsel %vm340_vm0, %v3898_v25, 0  ;;  %v3899_v33 = vld [vmem:[%s4220_s17 + $0xc0] sm:$0xff]  }
 0x512   : > { %3596 = vmatpush3.bf16.xpose.msra.mxu1 %v2103_v30  ;;  %v4719_v53 = vpop.eup %3998  ;;  %v2085_v30 = vsel %vm340_vm0, %v3899_v33, 0 }
 0x513   : > { %3683 = vmatprep.subr.msk.bf16.mxu1 %vm340_vm0, %v3894_v39  ;;  %v1748_v27 = vpack.c.bf16 %v4719_v53, %v4717_v32  ;;  %v4724_v26 = vpop.eup %4000  ;;  %v3901_v39 = vld [vmem:[%s4231_s20 + $0xc8] sm:$0xff]  }
 0x515   : > { %3585 = vmatprep.mubr.bf16.mxu1 %v1748_v27  ;;  %v3902_v27 = vld [vmem:[%s4231_s20 + $0xd0] sm:$0xff]  }
 0x516   : > { %v4726_v2 = vpop.eup %4002 }
 0x517   : > { %v1749_v60 = vpack.c.bf16 %v4726_v2, %v4724_v26  ;;  %v4732_v35 = vpop.eup %4004 }
 0x519   : > { %3586 = vmatmul.mubr.bf16.gmra.mxu1 %v1749_v60  ;;  %v3903_v60 = vld [vmem:[%s4231_s20 + $0xd8] sm:$0xff]  }
 0x51a   : > { %3598 = vmatpush3.bf16.xpose.msra.mxu1 %v2100_v28  ;;  %v4734_v52 = vpop.eup %4006  ;;  %v3904_v28 = vld [vmem:[%s4231_s20 + $0xe0] sm:$0xff]  }
 0x51b   : > { %3684 = vmatprep.subr.msk.bf16.mxu1 %vm340_vm0, %v3895_v29  ;;  %v1750_v34 = vpack.c.bf16 %v4734_v52, %v4732_v35  ;;  %v4739_v1 = vpop.eup %4008  ;;  %v3905_v29 = vld [vmem:[%s4231_s20 + $0xe8] sm:$0xff]  }
 0x51d   : > { %3589 = vmatprep.mubr.bf16.mxu1 %v1750_v34  ;;  %v3906_v34 = vld [vmem:[%s4231_s20 + $0xf0] sm:$0xff]  }
 0x51e   : > { %v4741_v41 = vpop.eup %4010 }
 0x51f   : > { %v1751_v24 = vpack.c.bf16 %v4741_v41, %v4739_v1 }
 0x521   : > { %3590 = vmatmul.mubr.bf16.gmra.mxu1 %v1751_v24 }
 0x522   : > { %3600 = vmatpush3.bf16.xpose.msra.mxu1 %v2097_v23  ;;  %3609 = vmatprep.mubr.msk.bf16.mxu1 %vm340_vm0, %v3900_v4  ;;  %v3907_v4 = vld [vmem:[%s4231_s20 + $0xf8] sm:$0xff]  }
 0x523   : > { %3685 = vmatprep.subr.msk.bf16.mxu1 %vm340_vm0, %v3896_v31 }
 0x52a   : > { %3602 = vmatpush3.bf16.xpose.msra.mxu1 %v2094_v40 }
 0x52b   : > { %3686 = vmatprep.subr.msk.bf16.mxu1 %vm340_vm0, %v3897_v48 }
 0x532   : > { %3604 = vmatpush3.bf16.xpose.msra.mxu1 %v2091_v15 }
 0x533   : > { %3687 = vmatprep.subr.msk.bf16.mxu1 %vm340_vm0, %v3898_v25 }
 0x53a   : > { %3606 = vmatpush3.bf16.xpose.msra.mxu1 %v2088_v16 }
 0x53b   : > { %3688 = vmatprep.subr.msk.bf16.mxu1 %vm340_vm0, %v3899_v33 }
 0x542   : > { %3608 = vmatpush3.bf16.xpose.msra.mxu1 %v2085_v30 }
 0x549   : > { %3610 = vmatmul.mubr.msk.bf16.vlgmr.msra.gmra.mxu1 %vm340_vm0, %v3901_v39 }
 0x54a   : > { %3613 = vmatprep.mubr.msk.bf16.mxu1 %vm340_vm0, %v3902_v27 }
 0x551   : > { %3614 = vmatmul.mubr.msk.bf16.gmra.mxu1 %vm340_vm0, %v3903_v60 }
 0x552   : > { %3617 = vmatprep.mubr.msk.bf16.mxu1 %vm340_vm0, %v3904_v28 }
 0x559   : > { %3618 = vmatmul.mubr.msk.bf16.gmra.mxu1 %vm340_vm0, %v3905_v29 }
 0x55a   : > { %3621 = vmatprep.mubr.msk.bf16.mxu1 %vm340_vm0, %v3906_v34 }
 0x561   : > { %3622 = vmatmul.mubr.msk.bf16.gmra.mxu1 %vm340_vm0, %v3907_v4 }
 0x5c9   : > { %v4774_v24 = vpop.f32.mrf.mxu1 }
 0x5ca   : > { %5203 = vst [vmem:[#allocation35_spill] sm:$0xff] %v4774_v24 }
 0x5cb   : > { %v4776_v23 = vpop.f32.mrf.mxu1 }
 0x5cc   : > { %5204 = vst [vmem:[#allocation36_spill] sm:$0xff] %v4776_v23 }
 0x5cd   : > { %v4778_v31 = vpop.f32.mrf.mxu1 }
 0x5ce   : > { %5205 = vst [vmem:[#allocation37_spill] sm:$0xff] %v4778_v31 }
 0x5cf   : > { %v4780_v40 = vpop.f32.mrf.mxu1 }
 0x5d0   : > { %5206 = vst [vmem:[#allocation38_spill] sm:$0xff] %v4780_v40 }
 0x5d1   : > { %v4782_v48 = vpop.f32.mrf.mxu1 }
 0x5d2   : > { %5207 = vst [vmem:[#allocation39_spill] sm:$0xff] %v4782_v48 }
 0x5d3   : > { %v4784_v15 = vpop.f32.mrf.mxu1 }
 0x5d4   : > { %5208 = vst [vmem:[#allocation40_spill] sm:$0xff] %v4784_v15  ;;  %v3911_v15 = vld [vmem:[%s4272_s23 + $0xe0] sm:$0xff]  }
 0x5d5   : > { %v4786_v25 = vpop.f32.mrf.mxu1 }
 0x5d6   : > { %5209 = vst [vmem:[#allocation41_spill] sm:$0xff] %v4786_v25 }
 0x5d7   : > { %v4788_v16 = vpop.f32.mrf.mxu1 }
 0x5d8   : > { %5210 = vst [vmem:[#allocation42_spill] sm:$0xff] %v4788_v16 }
 0x5d9   : > { %v4790_v33 = vpop.f32.mrf.mxu1 }
 0x5da   : > { %5211 = vst [vmem:[#allocation43_spill] sm:$0xff] %v4790_v33  ;;  %v3908_v33 = vld [vmem:[%s4272_s23 + $0xf8] sm:$0xff]  }
 0x5db   : > { %v4792_v30 = vpop.f32.mrf.mxu1  ;;  %3625 = vmatprep.subr.bf16.mxu0 %v3908_v33 }
 0x5dc   : > { %5212 = vst [vmem:[#allocation44_spill] sm:$0xff] %v4792_v30  ;;  %3626 = vmatpush3.bf16.msra.mxu0 %v3908_v33  ;;  %v3910_v33 = vld [vmem:[%s4272_s23 + $0xe8] sm:$0xff]  }
 0x5dd   : > { %v4794_v39 = vpop.f32.mrf.mxu1 }
 0x5de   : > { %5213 = vst [vmem:[#allocation45_spill] sm:$0xff] %v4794_v39  ;;  %v3909_v39 = vld [vmem:[%s4272_s23 + $0xf0] sm:$0xff]  }
 0x5df   : > { %v4796_v27 = vpop.f32.mrf.mxu1  ;;  %3627 = vmatprep.subr.bf16.mxu0 %v3909_v39 }
 0x5e0   : > { %5214 = vst [vmem:[#allocation46_spill] sm:$0xff] %v4796_v27  ;;  %3628 = vmatpush3.bf16.msra.mxu0 %v3909_v39 }
 0x5e1   : > { %v4798_v60 = vpop.f32.mrf.mxu1  ;;  %3629 = vmatprep.subr.bf16.mxu0 %v3910_v33 }
 0x5e2   : > { %5215 = vst [vmem:[#allocation47_spill] sm:$0xff] %v4798_v60 }
 0x5e3   : > { %v4800_v28 = vpop.f32.mrf.mxu1 }
 0x5e4   : > { %5216 = vst [vmem:[#allocation48_spill] sm:$0xff] %v4800_v28  ;;  %3630 = vmatpush3.bf16.msra.mxu0 %v3910_v33  ;;  %v3912_v33 = vld [vmem:[%s4272_s23 + $0xd8] sm:$0xff]  }
 0x5e5   : > { %v4802_v29 = vpop.f32.mrf.mxu1  ;;  %3631 = vmatprep.subr.bf16.mxu0 %v3911_v15 }
 0x5e6   : > { %5217 = vst [vmem:[#allocation49_spill] sm:$0xff] %v4802_v29 }
 0x5e7   : > { %v4804_v34 = vpop.f32.mrf.mxu1 }
 0x5e8   : > { %5218 = vst [vmem:[#allocation50_spill] sm:$0xff] %v4804_v34  ;;  %3632 = vmatpush3.bf16.msra.mxu0 %v3911_v15  ;;  %v3914_v15 = vld [vmem:[%s4272_s23 + $0xc8] sm:$0xff]  }
 0x5e9   : > { %3633 = vmatprep.subr.bf16.mxu0 %v3912_v33 }
 0x5ec   : > { %3634 = vmatpush3.bf16.msra.mxu0 %v3912_v33 }
 0x609   : > { %v4806_v4 = vpop.f32.mrf.mxu1 }
 0x60b   : > { %v4808_v25 = vpop.f32.mrf.mxu1 }
 0x60c   : > { %2205 = vmax.xlane.f32.xlu0 %v4808_v25 }
 0x60d   : > { %v4812_v30 = vpop.f32.mrf.mxu1 }
 0x60f   : > { %v4815_v27 = vpop.f32.mrf.mxu1 }
 0x610   : > { %2209 = vmax.xlane.f32.xlu0 %v4806_v4  ;;  %2207 = vmax.xlane.f32.xlu1 %v4815_v27 }
 0x611   : > { %v4819_v29 = vpop.f32.mrf.mxu1 }
 0x613   : > { %v4821_v60 = vpop.f32.mrf.mxu1 }
 0x614   : > { %2211 = vmax.xlane.f32.xlu1 %v4812_v30  ;;  %2213 = vmax.xlane.f32.xlu0 %v4821_v60 }
 0x615   : > { %v4825_v34 = vpop.f32.mrf.mxu1 }
 0x617   : > { %v4827_v28 = vpop.f32.mrf.mxu1 }
 0x618   : > { %2217 = vmax.xlane.f32.xlu0 %v4819_v29  ;;  %2215 = vmax.xlane.f32.xlu1 %v4827_v28 }
 0x619   : > { %v4832_v48 = vpop.f32.mrf.mxu1 }
 0x61a   : > { %5219 = vst [vmem:[#allocation51_spill] sm:$0xff] %v4832_v48 }
 0x61b   : > { %v4834_v16 = vpop.f32.mrf.mxu1 }
 0x61c   : > { %5220 = vst [vmem:[#allocation52_spill] sm:$0xff] %v4834_v16  ;;  %2219 = vmax.xlane.f32.xlu1 %v4825_v34  ;;  %2221 = vmax.xlane.f32.xlu0 %v4834_v16  ;;  %v3913_v16 = vld [vmem:[%s4272_s23 + $0xd0] sm:$0xff]  }
 0x61d   : > { %v4838_v39 = vpop.f32.mrf.mxu1  ;;  %3635 = vmatprep.subr.bf16.mxu0 %v3913_v16 }
 0x61e   : > { %3636 = vmatpush3.bf16.msra.mxu0 %v3913_v16 }
 0x61f   : > { %v4841_v31 = vpop.f32.mrf.mxu1  ;;  %3637 = vmatprep.subr.bf16.mxu0 %v3914_v15 }
 0x620   : > { %2225 = vmax.xlane.f32.xlu0 %v4832_v48  ;;  %2223 = vmax.xlane.f32.xlu1 %v4841_v31 }
 0x621   : > { %v4845_v24 = vpop.f32.mrf.mxu1 }
 0x622   : > { %3638 = vmatpush3.bf16.msra.mxu0 %v3914_v15 }
 0x623   : > { %v4848_v40 = vpop.f32.mrf.mxu1 }
 0x624   : > { %5221 = vst [vmem:[#allocation53_spill] sm:$0xff] %v4848_v40  ;;  %2227 = vmax.xlane.f32.xlu1 %v4838_v39  ;;  %2229 = vmax.xlane.f32.xlu0 %v4848_v40  ;;  %v3915_v40 = vld [vmem:[%s4272_s23 + $0xc0] sm:$0xff]  }
 0x625   : > { %v4852_v23 = vpop.f32.mrf.mxu1  ;;  %3639 = vmatprep.subr.bf16.mxu0 %v3915_v40 }
 0x626   : > { %3640 = vmatpush3.bf16.msra.mxu0 %v3915_v40 }
 0x627   : > { %v4855_v48 = vpop.f32.mrf.mxu1 }
 0x628   : > { %2233 = vmax.xlane.f32.xlu0 %v4845_v24  ;;  %2231 = vmax.xlane.f32.xlu1 %v4855_v48 }
 0x62c   : > { %566 = vadd.xlane.f32.xlu0 %v4321_v11  ;;  %2235 = vmax.xlane.f32.xlu1 %v4852_v23  ;;  %v5222_v11 = vld [vmem:[#allocation18_spill] sm:$0xff] }
 0x630   : > { %570 = vadd.xlane.f32.xlu0 %v4329_v19  ;;  %568 = vadd.xlane.f32.xlu1 %v4327_v18 }
 0x634   : > { %574 = vadd.xlane.f32.xlu0 %v4342_v36  ;;  %572 = vadd.xlane.f32.xlu1 %v4323_v14 }
 0x638   : > { %578 = vadd.xlane.f32.xlu0 %v4350_v47  ;;  %576 = vadd.xlane.f32.xlu1 %v4344_v37 }
 0x63c   : > { %582 = vadd.xlane.f32.xlu0 %v4358_v50  ;;  %580 = vadd.xlane.f32.xlu1 %v4353_v46 }
 0x640   : > { %586 = vadd.xlane.f32.xlu0 %v4366_v54  ;;  %584 = vadd.xlane.f32.xlu1 %v4360_v51 }
 0x644   : > { %590 = vadd.xlane.f32.xlu0 %v4373_v57  ;;  %588 = vadd.xlane.f32.xlu1 %v4368_v55 }
 0x648   : > { %594 = vadd.xlane.f32.xlu0 %v4381_v62  ;;  %592 = vadd.xlane.f32.xlu1 %v4375_v58 }
 0x64c   : > { %1139 = vadd.xlane.f32.xlu0 %v4503_v44  ;;  %596 = vadd.xlane.f32.xlu1 %v4383_v63 }
 0x650   : > { %1143 = vadd.xlane.f32.xlu0 %v4509_v3  ;;  %1141 = vadd.xlane.f32.xlu1 %v4505_v21 }
 0x654   : > { %1147 = vadd.xlane.f32.xlu0 %v4521_v13  ;;  %1145 = vadd.xlane.f32.xlu1 %v4513_v61 }
 0x658   : > { %1151 = vadd.xlane.f32.xlu0 %v4528_v17  ;;  %1149 = vadd.xlane.f32.xlu1 %v4523_v43 }
 0x65c   : > { %1155 = vadd.xlane.f32.xlu0 %v4537_v49  ;;  %1153 = vadd.xlane.f32.xlu1 %v4531_v5 }
 0x660   : > { %1159 = vadd.xlane.f32.xlu0 %v4544_v56  ;;  %1157 = vadd.xlane.f32.xlu1 %v4539_v59  ;;  %v5223_v59 = vld [vmem:[#allocation52_spill] sm:$0xff] }
 0x664   : > { %1163 = vadd.xlane.f32.xlu0 %v4552_v42  ;;  %1161 = vadd.xlane.f32.xlu1 %v4546_v0 }
 0x668   : > { %1167 = vadd.xlane.f32.xlu0 %v4559_v45  ;;  %1165 = vadd.xlane.f32.xlu1 %v4554_v9 }
 0x66c   : > { %1712 = vadd.xlane.f32.xlu0 %v4683_v10  ;;  %1169 = vadd.xlane.f32.xlu1 %v5222_v11 }
 0x670   : > { %1716 = vadd.xlane.f32.xlu0 %v4689_v12  ;;  %1714 = vadd.xlane.f32.xlu1 %v4685_v8  ;;  %v5224_v8 = vld [vmem:[#allocation51_spill] sm:$0xff] }
 0x674   : > { %1720 = vadd.xlane.f32.xlu0 %v4701_v6  ;;  %1718 = vadd.xlane.f32.xlu1 %v4693_v22 }
 0x678   : > { %1724 = vadd.xlane.f32.xlu0 %v4708_v20  ;;  %1722 = vadd.xlane.f32.xlu1 %v4703_v38 }
 0x67c   : > { %1728 = vadd.xlane.f32.xlu0 %v4717_v32  ;;  %1726 = vadd.xlane.f32.xlu1 %v4711_v7 }
 0x680   : > { %1732 = vadd.xlane.f32.xlu0 %v4724_v26  ;;  %1730 = vadd.xlane.f32.xlu1 %v4719_v53 }
 0x684   : > { %1736 = vadd.xlane.f32.xlu0 %v4732_v35  ;;  %1734 = vadd.xlane.f32.xlu1 %v4726_v2  ;;  %v5225_v35 = vld [vmem:[#allocation53_spill] sm:$0xff] }
 0x688   : > { %1740 = vadd.xlane.f32.xlu0 %v4739_v1  ;;  %1738 = vadd.xlane.f32.xlu1 %v4734_v52 }
 0x68c   : > { %1742 = vadd.xlane.f32.xlu1 %v4741_v41 }
 0x695   : > { %v2206_v14 = vpop.xlane.xlu0 %2205 }
 0x696   : > { %v2237_v18 = vsub.f32 %v4808_v25, %v2206_v14 }
 0x698   : > { %v2253_v19 = vmul.f32 1.442695, %v2237_v18 }
 0x699   : > { %v2210_v36 = vpop.xlane.xlu0 %2209  ;;  %v2208_v37 = vpop.xlane.xlu1 %2207 }
 0x69a   : > { %v2239_v47 = vsub.f32 %v4806_v4, %v2210_v36  ;;  %v2238_v46 = vsub.f32 %v4815_v27, %v2208_v37  ;;  %4012 = vpow2.f32 %v2253_v19 }
 0x69c   : > { %v2257_v50 = vmul.f32 1.442695, %v2239_v47  ;;  %v2255_v51 = vmul.f32 1.442695, %v2238_v46 }
 0x69d   : > { %v2212_v54 = vpop.xlane.xlu1 %2211  ;;  %v2214_v55 = vpop.xlane.xlu0 %2213 }
 0x69e   : > { %4014 = vpow2.f32 %v2257_v50  ;;  %v2240_v57 = vsub.f32 %v4812_v30, %v2212_v54  ;;  %v2241_v58 = vsub.f32 %v4821_v60, %v2214_v55 }
 0x69f   : > { %4016 = vpow2.f32 %v2255_v51 }
 0x6a0   : > { %v2259_v62 = vmul.f32 1.442695, %v2240_v57  ;;  %v2261_v63 = vmul.f32 1.442695, %v2241_v58 }
 0x6a1   : > { %v2218_v44 = vpop.xlane.xlu0 %2217  ;;  %v2216_v21 = vpop.xlane.xlu1 %2215 }
 0x6a2   : > { %4018 = vpow2.f32 %v2259_v62  ;;  %v2243_v3 = vsub.f32 %v4819_v29, %v2218_v44  ;;  %v2242_v61 = vsub.f32 %v4827_v28, %v2216_v21 }
 0x6a3   : > { %4020 = vpow2.f32 %v2261_v63 }
 0x6a4   : > { %v2265_v13 = vmul.f32 1.442695, %v2243_v3  ;;  %v2263_v43 = vmul.f32 1.442695, %v2242_v61 }
 0x6a5   : > { %v2220_v17 = vpop.xlane.xlu1 %2219  ;;  %v2222_v5 = vpop.xlane.xlu0 %2221 }
 0x6a6   : > { %4022 = vpow2.f32 %v2265_v13  ;;  %v2244_v49 = vsub.f32 %v4825_v34, %v2220_v17  ;;  %v2245_v56 = vsub.f32 %v5223_v59, %v2222_v5 }
 0x6a7   : > { %4024 = vpow2.f32 %v2263_v43  ;;  %v4013_v10 = vpop.eup %4012 }
 0x6a8   : > { %v2267_v0 = vmul.f32 1.442695, %v2244_v49  ;;  %v2269_v42 = vmul.f32 1.442695, %v2245_v56 }
 0x6a9   : > { %v2226_v9 = vpop.xlane.xlu0 %2225  ;;  %v2224_v45 = vpop.xlane.xlu1 %2223 }
 0x6aa   : > { %4026 = vpow2.f32 %v2267_v0  ;;  %v2247_v12 = vsub.f32 %v5224_v8, %v2226_v9  ;;  %v2246_v22 = vsub.f32 %v4841_v31, %v2224_v45 }
 0x6ab   : > { %v4015_v6 = vpop.eup %4014  ;;  %4028 = vpow2.f32 %v2269_v42 }
 0x6ac   : > { %v4017_v38 = vpop.eup %4016  ;;  %v2273_v20 = vmul.f32 1.442695, %v2247_v12  ;;  %v2271_v7 = vmul.f32 1.442695, %v2246_v22  ;;  %2289 = vadd.xlane.f32.xlu0 %v4015_v6 }
 0x6ad   : > { %v2228_v32 = vpop.xlane.xlu1 %2227  ;;  %v2230_v53 = vpop.xlane.xlu0 %2229  ;;  %v2317_v26 = vpack.c.bf16 %v4017_v38, %v4013_v10 }
 0x6ae   : > { %4030 = vpow2.f32 %v2273_v20  ;;  %v2248_v2 = vsub.f32 %v4838_v39, %v2228_v32  ;;  %v2249_v52 = vsub.f32 %v5225_v35, %v2230_v53  ;;  %v5227_v35 = vld [vmem:[#allocation22_spill] sm:$0xff] }
 0x6af   : > { %v4019_v1 = vpop.eup %4018  ;;  %4032 = vpow2.f32 %v2271_v7  ;;  %3641 = vmatprep.mubr.bf16.mxu0 %v2317_v26  ;;  %v5226_v26 = vld [vmem:[#allocation20_spill] sm:$0xff] }
 0x6b0   : > { %v2275_v41 = vmul.f32 1.442695, %v2248_v2  ;;  %2285 = vadd.xlane.f32.xlu0 %v4013_v10  ;;  %2291 = vadd.xlane.f32.xlu1 %v4019_v1  ;;  %v2318_v31 = vpack.c.bf16 %v4019_v1, %v4015_v6  ;;  %v4021_v16 = vpop.eup %4020  ;;  %v2277_v30 = vmul.f32 1.442695, %v2249_v52 }
 0x6b1   : > { %v2234_v40 = vpop.xlane.xlu0 %2233  ;;  %v2232_v25 = vpop.xlane.xlu1 %2231 }
 0x6b2   : > { %4034 = vpow2.f32 %v2275_v41  ;;  %v2251_v27 = vsub.f32 %v4845_v24, %v2234_v40  ;;  %v2250_v60 = vsub.f32 %v4855_v48, %v2232_v25  ;;  %3642 = vmatmul.mubr.bf16.vlgmr.msra.gmra.mxu0 %v2318_v31 }
 0x6b3   : > { %v4023_v28 = vpop.eup %4022  ;;  %4036 = vpow2.f32 %v2277_v30 }
 0x6b4   : > { %v4025_v29 = vpop.eup %4024  ;;  %v2279_v34 = vmul.f32 1.442695, %v2250_v60  ;;  %2297 = vadd.xlane.f32.xlu0 %v4023_v28  ;;  %2287 = vadd.xlane.f32.xlu1 %v4017_v38  ;;  %v2281_v4 = vmul.f32 1.442695, %v2251_v27  ;;  %v5229_v27 = vld [vmem:[#allocation21_spill] sm:$0xff] }
 0x6b5   : > { %v4925_v39 = vpop.xlane.xlu0 %566  ;;  %v2236_v33 = vpop.xlane.xlu1 %2235  ;;  %v2319_v15 = vpack.c.bf16 %v4025_v29, %v4021_v16 }
 0x6b6   : > { %v2252_v11 = vsub.f32 %v4852_v23, %v2236_v33  ;;  %4038 = vpow2.f32 %v2279_v34 }
 0x6b7   : > { %v4027_v14 = vpop.eup %4026  ;;  %3645 = vmatprep.mubr.bf16.mxu0 %v2319_v15  ;;  %4040 = vpow2.f32 %v2281_v4  ;;  %v5230_v15 = vld [vmem:[#allocation24_spill] sm:$0xff] }
 0x6b8   : > { %v2283_v24 = vmul.f32 1.442695, %v2252_v11  ;;  %2293 = vadd.xlane.f32.xlu0 %v4021_v16  ;;  %2299 = vadd.xlane.f32.xlu1 %v4027_v14  ;;  %v2320_v48 = vpack.c.bf16 %v4027_v14, %v4023_v28  ;;  %v4029_v36 = vpop.eup %4028  ;;  %v5228_v16 = vld [vmem:[#allocation19_spill] sm:$0xff]  ;;  %v5231_v14 = vld [vmem:[#allocation26_spill] sm:$0xff] }
 0x6b9   : > { %v4928_v18 = vpop.xlane.xlu0 %570  ;;  %v4930_v19 = vpop.xlane.xlu1 %568 }
 0x6ba   : > { %4042 = vpow2.f32 %v2283_v24  ;;  %3646 = vmatmul.mubr.bf16.gmra.mxu0 %v2320_v48 }
 0x6bb   : > { %v4031_v37 = vpop.eup %4030 }
 0x6bc   : > { %v4033_v47 = vpop.eup %4032  ;;  %2305 = vadd.xlane.f32.xlu0 %v4031_v37  ;;  %2295 = vadd.xlane.f32.xlu1 %v4025_v29 }
 0x6bd   : > { %v4932_v23 = vpop.xlane.xlu0 %574  ;;  %v4934_v46 = vpop.xlane.xlu1 %572  ;;  %v2321_v50 = vpack.c.bf16 %v4033_v47, %v4029_v36 }
 0x6bf   : > { %v4035_v51 = vpop.eup %4034  ;;  %3649 = vmatprep.mubr.bf16.mxu0 %v2321_v50 }
 0x6c0   : > { %2301 = vadd.xlane.f32.xlu0 %v4029_v36  ;;  %2307 = vadd.xlane.f32.xlu1 %v4035_v51  ;;  %v2322_v54 = vpack.c.bf16 %v4035_v51, %v4031_v37  ;;  %v4037_v58 = vpop.eup %4036  ;;  %v5232_v51 = vld [vmem:[#allocation23_spill] sm:$0xff] }
 0x6c1   : > { %v4936_v55 = vpop.xlane.xlu0 %578  ;;  %v4938_v57 = vpop.xlane.xlu1 %576 }
 0x6c2   : > { %3650 = vmatmul.mubr.bf16.gmra.mxu0 %v2322_v54 }
 0x6c3   : > { %v4039_v62 = vpop.eup %4038 }
 0x6c4   : > { %2309 = vadd.xlane.f32.xlu0 %v4037_v58  ;;  %2303 = vadd.xlane.f32.xlu1 %v4033_v47  ;;  %v2323_v21 = vpack.c.bf16 %v4039_v62, %v4037_v58  ;;  %v4041_v3 = vpop.eup %4040  ;;  %v5233_v58 = vld [vmem:[#allocation25_spill] sm:$0xff] }
 0x6c5   : > { %v4940_v63 = vpop.xlane.xlu0 %582  ;;  %v4942_v44 = vpop.xlane.xlu1 %580 }
 0x6c6   : > { %3653 = vmatprep.mubr.bf16.mxu0 %v2323_v21 }
 0x6c7   : > { %v4043_v61 = vpop.eup %4042 }
 0x6c8   : > { %2313 = vadd.xlane.f32.xlu0 %v4041_v3  ;;  %2311 = vadd.xlane.f32.xlu1 %v4039_v62  ;;  %v2324_v13 = vpack.c.bf16 %v4043_v61, %v4041_v3 }
 0x6c9   : > { %v4944_v43 = vpop.xlane.xlu0 %586  ;;  %v4946_v17 = vpop.xlane.xlu1 %584 }
 0x6ca   : > { %3654 = vmatmul.mubr.bf16.gmra.mxu0 %v2324_v13 }
 0x6cc   : > { %2315 = vadd.xlane.f32.xlu1 %v4043_v61 }
 0x6cd   : > { %v4948_v5 = vpop.xlane.xlu0 %590  ;;  %v4950_v49 = vpop.xlane.xlu1 %588 }
 0x6d1   : > { %v4952_v59 = vpop.xlane.xlu0 %594  ;;  %v4954_v56 = vpop.xlane.xlu1 %592 }
 0x6d5   : > { %v1140_v0 = vpop.xlane.xlu0 %1139  ;;  %v4956_v42 = vpop.xlane.xlu1 %596 }
 0x6d6   : > { %4044 = vrcp.f32 %v1140_v0 }
 0x6d9   : > { %v1144_v9 = vpop.xlane.xlu0 %1143  ;;  %v1142_v45 = vpop.xlane.xlu1 %1141 }
 0x6da   : > { %4046 = vrcp.f32 %v1142_v45 }
 0x6db   : > { %4048 = vrcp.f32 %v1144_v9  ;;  %v5234_v9 = vld [vmem:[#allocation28_spill] sm:$0xff] }
 0x6dd   : > { %v1148_v10 = vpop.xlane.xlu0 %1147  ;;  %v1146_v8 = vpop.xlane.xlu1 %1145 }
 0x6de   : > { %4050 = vrcp.f32 %v1146_v8 }
 0x6df   : > { %4052 = vrcp.f32 %v1148_v10  ;;  %v5235_v10 = vld [vmem:[#allocation30_spill] sm:$0xff] }
 0x6e1   : > { %v1152_v12 = vpop.xlane.xlu0 %1151  ;;  %v1150_v22 = vpop.xlane.xlu1 %1149 }
 0x6e2   : > { %4054 = vrcp.f32 %v1150_v22 }
 0x6e3   : > { %4056 = vrcp.f32 %v1152_v12  ;;  %v4045_v20 = vpop.eup %4044 }
 0x6e4   : > { %v1340_v2 = vmul.f32 %v4045_v20, %v5226_v26 }
 0x6e5   : > { %v1156_v6 = vpop.xlane.xlu0 %1155  ;;  %v1154_v38 = vpop.xlane.xlu1 %1153 }
 0x6e6   : > { %4058 = vrcp.f32 %v1154_v38 }
 0x6e7   : > { %v4047_v7 = vpop.eup %4046  ;;  %4060 = vrcp.f32 %v1156_v6 }
 0x6e8   : > { %v1341_v52 = vmul.f32 %v4047_v7, %v5227_v35  ;;  %v4049_v1 = vpop.eup %4048  ;;  %v5236_v7 = vld [vmem:[#allocation27_spill] sm:$0xff] }
 0x6e9   : > { %v1160_v32 = vpop.xlane.xlu0 %1159  ;;  %v1158_v53 = vpop.xlane.xlu1 %1157  ;;  %v1342_v30 = vmul.f32 %v4049_v1, %v5228_v16 }
 0x6ea   : > { %4062 = vrcp.f32 %v1158_v53  ;;  %v3700_v41 = vpack.i.bf16 %v1341_v52, %v1340_v2  ;;  %v5237_v53 = vld [vmem:[#allocation29_spill] sm:$0xff] }
 0x6eb   : > { %v4051_v31 = vpop.eup %4050  ;;  %4064 = vrcp.f32 %v1160_v32 }
 0x6ec   : > { %3701 = vrot.lane.b32.xlu0 %v3700_v41, %s4180_s24  ;;  %v1343_v60 = vmul.f32 %v4051_v31, %v5229_v27  ;;  %v4053_v28 = vpop.eup %4052  ;;  %v5238_v31 = vld [vmem:[#allocation32_spill] sm:$0xff] }
 0x6ed   : > { %v1164_v40 = vpop.xlane.xlu0 %1163  ;;  %v1162_v25 = vpop.xlane.xlu1 %1161  ;;  %v1344_v11 = vmul.f32 %v4053_v28, %v5230_v15 }
 0x6ee   : > { %4066 = vrcp.f32 %v1162_v25  ;;  %v3705_v29 = vpack.i.bf16 %v1343_v60, %v1342_v30  ;;  %v5239_v25 = vld [vmem:[#allocation34_spill] sm:$0xff] }
 0x6ef   : > { %v4055_v34 = vpop.eup %4054  ;;  %4068 = vrcp.f32 %v1164_v40 }
 0x6f0   : > { %3706 = vrot.lane.b32.xlu1 %v3705_v29, %s4180_s24  ;;  %v1345_v24 = vmul.f32 %v4055_v34, %v5231_v14  ;;  %v4057_v48 = vpop.eup %4056  ;;  %v5240_v34 = vld [vmem:[#allocation31_spill] sm:$0xff] }
 0x6f1   : > { %v1168_v4 = vpop.xlane.xlu0 %1167  ;;  %v1166_v33 = vpop.xlane.xlu1 %1165  ;;  %v1346_v54 = vmul.f32 %v4057_v48, %v5232_v51 }
 0x6f2   : > { %4070 = vrcp.f32 %v1166_v33  ;;  %v3710_v36 = vpack.i.bf16 %v1345_v24, %v1344_v11  ;;  %v5241_v33 = vld [vmem:[#allocation33_spill] sm:$0xff] }
 0x6f3   : > { %v4059_v37 = vpop.eup %4058  ;;  %4072 = vrcp.f32 %v1168_v4 }
 0x6f4   : > { %3711 = vrot.lane.b32.xlu1 %v3710_v36, %s4180_s24  ;;  %v1347_v62 = vmul.f32 %v4059_v37, %v5233_v58  ;;  %v4061_v21 = vpop.eup %4060  ;;  %v5242_v37 = vld [vmem:[#allocation36_spill] sm:$0xff] }
 0x6f5   : > { %v1713_v47 = vpop.xlane.xlu0 %1712  ;;  %v1170_v50 = vpop.xlane.xlu1 %1169  ;;  %v1348_v45 = vmul.f32 %v4061_v21, %v5234_v9 }
 0x6f6   : > { %4074 = vrcp.f32 %v1170_v50  ;;  %v3715_v3 = vpack.i.bf16 %v1347_v62, %v1346_v54  ;;  %v5243_v50 = vld [vmem:[#allocation38_spill] sm:$0xff] }
 0x6f7   : > { %v4063_v61 = vpop.eup %4062  ;;  %4076 = vrcp.f32 %v1713_v47 }
 0x6f8   : > { %3716 = vrot.lane.b32.xlu1 %v3715_v3, %s4180_s24  ;;  %v1349_v8 = vmul.f32 %v4063_v61, %v5235_v10  ;;  %v4065_v12 = vpop.eup %4064  ;;  %v5244_v61 = vld [vmem:[#allocation35_spill] sm:$0xff] }
 0x6f9   : > { %v1717_v13 = vpop.xlane.xlu0 %1716  ;;  %v1715_v0 = vpop.xlane.xlu1 %1714  ;;  %v1350_v32 = vmul.f32 %v4065_v12, %v5236_v7 }
 0x6fa   : > { %4078 = vrcp.f32 %v1715_v0  ;;  %v3720_v22 = vpack.i.bf16 %v1349_v8, %v1348_v45  ;;  %v5245_v0 = vld [vmem:[#allocation37_spill] sm:$0xff] }
 0x6fb   : > { %v4067_v6 = vpop.eup %4066  ;;  %4080 = vrcp.f32 %v1717_v13 }
 0x6fc   : > { %3721 = vrot.lane.b32.xlu0 %v3720_v22, %s4180_s24  ;;  %v1351_v26 = vmul.f32 %v4067_v6, %v5237_v53  ;;  %v4069_v2 = vpop.eup %4068  ;;  %v5246_v6 = vld [vmem:[#allocation40_spill] sm:$0xff] }
 0x6fd   : > { %v1721_v38 = vpop.xlane.xlu0 %1720  ;;  %v1719_v20 = vpop.xlane.xlu1 %1718  ;;  %v1352_v40 = vmul.f32 %v4069_v2, %v5238_v31 }
 0x6fe   : > { %4082 = vrcp.f32 %v1719_v20  ;;  %v3725_v35 = vpack.i.bf16 %v1351_v26, %v1350_v32  ;;  %v5247_v20 = vld [vmem:[#allocation42_spill] sm:$0xff] }
 0x6ff   : > { %v4071_v52 = vpop.eup %4070  ;;  %4084 = vrcp.f32 %v1721_v38 }
 0x700   : > { %3726 = vrot.lane.b32.xlu1 %v3725_v35, %s4180_s24  ;;  %v1353_v16 = vmul.f32 %v4071_v52, %v5239_v25  ;;  %v4073_v30 = vpop.eup %4072  ;;  %v5248_v35 = vld [vmem:[#allocation39_spill] sm:$0xff] }
 0x701   : > { %v1725_v1 = vpop.xlane.xlu0 %1724  ;;  %v1723_v41 = vpop.xlane.xlu1 %1722  ;;  %v1354_v4 = vmul.f32 %v4073_v30, %v5240_v34 }
 0x702   : > { %4086 = vrcp.f32 %v1723_v41  ;;  %v3730_v27 = vpack.i.bf16 %v1353_v16, %v1352_v40  ;;  %v5250_v16 = vld [vmem:[#allocation44_spill] sm:$0xff] }
 0x703   : > { %v4075_v60 = vpop.eup %4074  ;;  %4088 = vrcp.f32 %v1725_v1  ;;  %v5249_v1 = vld [vmem:[#allocation41_spill] sm:$0xff] }
 0x704   : > { %3731 = vrot.lane.b32.xlu0 %v3730_v27, %s4180_s24  ;;  %v1355_v15 = vmul.f32 %v4075_v60, %v5241_v33  ;;  %v4077_v11 = vpop.eup %4076  ;;  %v5251_v27 = vld [vmem:[#allocation46_spill] sm:$0xff] }
 0x705   : > { %v1729_v28 = vpop.xlane.xlu0 %1728  ;;  %v1727_v29 = vpop.xlane.xlu1 %1726  ;;  %v1913_v47 = vmul.f32 %v4077_v11, %v5242_v37  ;;  %v5254_v37 = vld [vmem:[#allocation48_spill] sm:$0xff] }
 0x706   : > { %4090 = vrcp.f32 %v1727_v29  ;;  %v3735_v14 = vpack.i.bf16 %v1355_v15, %v1354_v4  ;;  %v5252_v4 = vld [vmem:[#allocation43_spill] sm:$0xff]  ;;  %v5253_v15 = vld [vmem:[#allocation45_spill] sm:$0xff] }
 0x707   : > { %v4079_v24 = vpop.eup %4078  ;;  %4092 = vrcp.f32 %v1729_v28 }
 0x708   : > { %3736 = vrot.lane.b32.xlu1 %v3735_v14, %s4180_s24  ;;  %v1914_v51 = vmul.f32 %v4079_v24, %v5243_v50  ;;  %v4081_v54 = vpop.eup %4080  ;;  %v5255_v50 = vld [vmem:[#allocation50_spill] sm:$0xff] }
 0x709   : > { %v1733_v48 = vpop.xlane.xlu0 %1732  ;;  %v1731_v36 = vpop.xlane.xlu1 %1730  ;;  %v1915_v13 = vmul.f32 %v4081_v54, %v5244_v61 }
 0x70a   : > { %4094 = vrcp.f32 %v1731_v36  ;;  %v3740_v58 = vpack.i.bf16 %v1914_v51, %v1913_v47 }
 0x70b   : > { %v4083_v62 = vpop.eup %4082  ;;  %4096 = vrcp.f32 %v1733_v48 }
 0x70c   : > { %3741 = vrot.lane.b32.xlu0 %v3740_v58, %s4181_s25  ;;  %v1916_v9 = vmul.f32 %v4083_v62, %v5245_v0  ;;  %v4085_v45 = vpop.eup %4084  ;;  %v5256_v62 = vld [vmem:[#allocation47_spill] sm:$0xff] }
 0x70d   : > { %v1737_v21 = vpop.xlane.xlu0 %1736  ;;  %v1735_v3 = vpop.xlane.xlu1 %1734  ;;  %v1917_v38 = vmul.f32 %v4085_v45, %v5246_v6 }
 0x70e   : > { %4098 = vrcp.f32 %v1735_v3  ;;  %v3745_v10 = vpack.i.bf16 %v1916_v9, %v1915_v13  ;;  %v5257_v3 = vld [vmem:[#allocation49_spill] sm:$0xff] }
 0x70f   : > { %v4087_v8 = vpop.eup %4086  ;;  %4100 = vrcp.f32 %v1737_v21 }
 0x710   : > { %3746 = vrot.lane.b32.xlu1 %v3745_v10, %s4181_s25  ;;  %v1918_v7 = vmul.f32 %v4087_v8, %v5247_v20  ;;  %v4089_v32 = vpop.eup %4088 }
 0x711   : > { %v1741_v12 = vpop.xlane.xlu0 %1740  ;;  %v1739_v22 = vpop.xlane.xlu1 %1738  ;;  %v1919_v52 = vmul.f32 %v4089_v32, %v5248_v35 }
 0x712   : > { %4102 = vrcp.f32 %v1739_v22  ;;  %v3750_v53 = vpack.i.bf16 %v1918_v7, %v1917_v38 }
 0x713   : > { %v4091_v26 = vpop.eup %4090  ;;  %4104 = vrcp.f32 %v1741_v12 }
 0x714   : > { %3751 = vrot.lane.b32.xlu0 %v3750_v53, %s4181_s25  ;;  %v1920_v41 = vmul.f32 %v4091_v26, %v5249_v1  ;;  %v4093_v31 = vpop.eup %4092 }
 0x715   : > { %v1743_v2 = vpop.xlane.xlu1 %1742  ;;  %v1921_v30 = vmul.f32 %v4093_v31, %v5250_v16 }
 0x716   : > { %4106 = vrcp.f32 %v1743_v2  ;;  %v3755_v40 = vpack.i.bf16 %v1920_v41, %v1919_v52 }
 0x717   : > { %v4095_v25 = vpop.eup %4094 }
 0x718   : > { %3756 = vrot.lane.b32.xlu1 %v3755_v40, %s4181_s25  ;;  %v1922_v60 = vmul.f32 %v4095_v25, %v5251_v27  ;;  %v4097_v28 = vpop.eup %4096 }
 0x719   : > { %v1923_v33 = vmul.f32 %v4097_v28, %v5252_v4 }
 0x71a   : > { %v3760_v29 = vpack.i.bf16 %v1922_v60, %v1921_v30 }
 0x71b   : > { %v4099_v34 = vpop.eup %4098 }
 0x71c   : > { %3761 = vrot.lane.b32.xlu0 %v3760_v29, %s4181_s25  ;;  %v1924_v11 = vmul.f32 %v4099_v34, %v5253_v15  ;;  %v4101_v14 = vpop.eup %4100 }
 0x71d   : > { %v1925_v47 = vmul.f32 %v4101_v14, %v5254_v37 }
 0x71e   : > { %v3765_v24 = vpack.i.bf16 %v1924_v11, %v1923_v33 }
 0x71f   : > { %v4103_v48 = vpop.eup %4102 }
 0x720   : > { %v4105_v36 = vpop.eup %4104  ;;  %3766 = vrot.lane.b32.xlu1 %v3765_v24, %s4181_s25  ;;  %v1926_v51 = vmul.f32 %v4103_v48, %v5255_v50 }
 0x721   : > { %v1927_v21 = vmul.f32 %v4105_v36, %v5256_v62 }
 0x722   : > { %v3770_v58 = vpack.i.bf16 %v1926_v51, %v1925_v47 }
 0x723   : > { %v4107_v54 = vpop.eup %4106 }
 0x724   : > { %v1928_v61 = vmul.f32 %v4107_v54, %v5257_v3  ;;  %3771 = vrot.lane.b32.xlu0 %v3770_v58, %s4181_s25 }
 0x726   : > { %v3775_v13 = vpack.i.bf16 %v1928_v61, %v1927_v21 }
 0x728   : > { %3776 = vrot.lane.b32.xlu1 %v3775_v13, %s4181_s25 }
 0x735   : > { %v2290_v0 = vpop.xlane.xlu0 %2289 }
 0x736   : > { %4108 = vrcp.f32 %v2290_v0 }
 0x739   : > { %v2292_v9 = vpop.xlane.xlu1 %2291  ;;  %v2286_v45 = vpop.xlane.xlu0 %2285 }
 0x73a   : > { %4110 = vrcp.f32 %v2292_v9 }
 0x73b   : > { %4112 = vrcp.f32 %v2286_v45 }
 0x73d   : > { %v2288_v10 = vpop.xlane.xlu1 %2287  ;;  %v2298_v8 = vpop.xlane.xlu0 %2297 }
 0x73e   : > { %4114 = vrcp.f32 %v2288_v10 }
 0x73f   : > { %4116 = vrcp.f32 %v2298_v8 }
 0x741   : > { %v2300_v12 = vpop.xlane.xlu1 %2299  ;;  %v2294_v22 = vpop.xlane.xlu0 %2293 }
 0x742   : > { %4118 = vrcp.f32 %v2300_v12 }
 0x743   : > { %4120 = vrcp.f32 %v2294_v22  ;;  %v4109_v2 = vpop.eup %4108 }
 0x745   : > { %v2296_v6 = vpop.xlane.xlu1 %2295  ;;  %v2306_v38 = vpop.xlane.xlu0 %2305 }
 0x746   : > { %4122 = vrcp.f32 %v2296_v6 }
 0x747   : > { %v4111_v35 = vpop.eup %4110  ;;  %4124 = vrcp.f32 %v2306_v38 }
 0x748   : > { %v4113_v1 = vpop.eup %4112 }
 0x749   : > { %v2308_v20 = vpop.xlane.xlu1 %2307  ;;  %v2302_v7 = vpop.xlane.xlu0 %2301 }
 0x74a   : > { %4126 = vrcp.f32 %v2308_v20 }
 0x74b   : > { %v4115_v25 = vpop.eup %4114  ;;  %4128 = vrcp.f32 %v2302_v7 }
 0x74c   : > { %v4117_v33 = vpop.eup %4116 }
 0x74d   : > { %v2304_v32 = vpop.xlane.xlu1 %2303  ;;  %v2310_v41 = vpop.xlane.xlu0 %2309 }
 0x74e   : > { %4130 = vrcp.f32 %v2304_v32 }
 0x74f   : > { %v4119_v11 = vpop.eup %4118 }
 0x750   : > { %v4121_v48 = vpop.eup %4120 }
 0x751   : > { %v2312_v16 = vpop.xlane.xlu1 %2311  ;;  %v2314_v15 = vpop.xlane.xlu0 %2313 }
 0x752   : > { %4132 = vrcp.f32 %v2314_v15 }
 0x753   : > { %v4123_v47 = vpop.eup %4122 }
 0x754   : > { %v4125_v61 = vpop.eup %4124 }
 0x755   : > { %v2316_v14 = vpop.xlane.xlu1 %2315 }
 0x756   : > { %4134 = vrcp.f32 %v2316_v14 }
 0x757   : > { %4136 = vrcp.f32 %v2310_v41  ;;  %v4127_v13 = vpop.eup %4126 }
 0x758   : > { %4138 = vrcp.f32 %v2312_v16  ;;  %v4129_v9 = vpop.eup %4128 }
 0x759   : > { %4140 = vrcp.f32 %v4925_v39 }
 0x75a   : > { %4142 = vrcp.f32 %v4928_v18 }
 0x75b   : > { %v4131_v8 = vpop.eup %4130  ;;  %4144 = vrcp.f32 %v4930_v19 }
 0x75c   : > { %4146 = vrcp.f32 %v4934_v46 }
 0x75d   : > { %4148 = vrcp.f32 %v4932_v23 }
 0x75e   : > { %4150 = vrcp.f32 %v4936_v55 }
 0x75f   : > { %4152 = vrcp.f32 %v4942_v44 }
 0x760   : > { %4154 = vrcp.f32 %v4938_v57  ;;  %v5258_v57 = vld [vmem:[#allocation3_spill] sm:$0xff] }
 0x761   : > { %4156 = vrcp.f32 %v4940_v63 }
 0x762   : > { %4158 = vrcp.f32 %v4944_v43 }
 0x763   : > { %4160 = vrcp.f32 %v4946_v17  ;;  %v5259_v17 = vld [vmem:[#allocation5_spill] sm:$0xff] }
 0x764   : > { %4162 = vrcp.f32 %v4948_v5  ;;  %v5260_v5 = vld [vmem:[#allocation2_spill] sm:$0xff] }
 0x772   : > { %v3643_v53 = vpop.f32.mrf.mxu0 }
 0x773   : > { %v2488_v31 = vmul.f32 %v4109_v2, %v3643_v53  ;;  %v4133_v53 = vpop.eup %4132  ;;  %4164 = vrcp.f32 %v4950_v49 }
 0x774   : > { %v2407_v26 = vpop.f32.mrf.mxu0 }
 0x775   : > { %v2486_v27 = vmul.f32 %v4113_v1, %v2407_v26  ;;  %v4135_v26 = vpop.eup %4134  ;;  %4166 = vrcp.f32 %v4952_v59 }
 0x776   : > { %v3644_v52 = vpop.f32.mrf.mxu0 }
 0x777   : > { %v2489_v40 = vmul.f32 %v4111_v35, %v3644_v52  ;;  %v4137_v35 = vpop.eup %4136  ;;  %4168 = vrcp.f32 %v4956_v42 }
 0x778   : > { %v2410_v30 = vpop.f32.mrf.mxu0  ;;  %v4139_v41 = vpop.eup %4138  ;;  %4170 = vrcp.f32 %v4954_v56 }
 0x779   : > { %v3780_v60 = vpack.i.bf16 %v2489_v40, %v2488_v31  ;;  %v2487_v28 = vmul.f32 %v4115_v25, %v2410_v30  ;;  %v4141_v18 = vpop.eup %4140 }
 0x77a   : > { %v3647_v29 = vpop.f32.mrf.mxu0  ;;  %v4143_v19 = vpop.eup %4142  ;;  %v767_v44 = vmul.f32 %v4141_v18, %v5258_v57 }
 0x77b   : > { %v3785_v34 = vpack.i.bf16 %v2487_v28, %v2486_v27  ;;  %3781 = vrot.lane.b32.xlu1 %v3780_v60, %s4182_s26  ;;  %v2492_v36 = vmul.f32 %v4117_v33, %v3647_v29  ;;  %v3707_v27 = vpop.permute.xlu1 %3706  ;;  %v3702_v29 = vpop.permute.xlu0 %3701 }
 0x77c   : > { %v2423_v4 = vpop.f32.mrf.mxu0  ;;  %v3708_v63 = vunpack.i.l.bf16 %v3707_v27 }
 0x77d   : > { %3786 = vrot.lane.b32.xlu0 %v3785_v34, %s4182_s26  ;;  %v2490_v51 = vmul.f32 %v4121_v48, %v2423_v4 }
 0x77e   : > { %v3648_v24 = vpop.f32.mrf.mxu0 }
 0x77f   : > { %v2493_v37 = vmul.f32 %v4119_v11, %v3648_v24  ;;  %v5014_v60 = vpop.permute.xlu1 %3711  ;;  %v5020_v4 = vpop.permute.xlu0 %3721 }
 0x780   : > { %v2426_v50 = vpop.f32.mrf.mxu0 }
 0x781   : > { %v3790_v54 = vpack.i.bf16 %v2493_v37, %v2492_v36  ;;  %v2491_v58 = vmul.f32 %v4123_v47, %v2426_v50  ;;  %v4145_v36 = vpop.eup %4144  ;;  %v3709_v37 = vunpack.i.h.bf16 %v3707_v27  ;;  %v3704_v47 = vunpack.i.h.bf16 %v3702_v29 }
 0x782   : > { %v3651_v62 = vpop.f32.mrf.mxu0  ;;  %v4147_v23 = vpop.eup %4146  ;;  %v3703_v50 = vunpack.i.l.bf16 %v3702_v29  ;;  %v3713_v29 = vunpack.i.l.bf16 %v5014_v60 }
 0x783   : > { %v3795_v21 = vpack.i.bf16 %v2491_v58, %v2490_v51  ;;  %3791 = vrot.lane.b32.xlu1 %v3790_v54, %s4182_s26  ;;  %v2496_v45 = vmul.f32 %v4125_v61, %v3651_v62  ;;  %v5016_v28 = vpop.permute.xlu1 %3716  ;;  %v5027_v15 = vpop.permute.xlu0 %3731  ;;  %v768_v58 = vmul.f32 %v4145_v36, %v5259_v17  ;;  %v769_v62 = vmul.f32 %v4143_v19, %v5260_v5  ;;  %v5262_v36 = vld [vmem:[#allocation7_spill] sm:$0xff] }
 0x784   : > { %v2439_v3 = vpop.f32.mrf.mxu0 }
 0x785   : > { %3796 = vrot.lane.b32.xlu0 %v3795_v21, %s4182_s26  ;;  %v2494_v22 = vmul.f32 %v4129_v9, %v2439_v3  ;;  %v5261_v21 = vld [vmem:[#allocation4_spill] sm:$0xff]  ;;  %v2696_v9 = vsel %vm340_vm0, %v769_v62, %v3708_v63  ;;  %v2695_v59 = vsel %vm340_vm0, %v768_v58, %v3704_v47  ;;  %v5265_v47 = vld [vmem:[#allocation9_spill] sm:$0xff] }
 0x786   : > { %v3652_v0 = vpop.f32.mrf.mxu0  ;;  %v770_v3 = vmul.f32 %v4147_v23, %v5261_v21 }
 0x787   : > { %v2497_v10 = vmul.f32 %v4127_v13, %v3652_v0  ;;  %v5018_v34 = vpop.permute.xlu1 %3726  ;;  %v3742_v14 = vpop.permute.xlu0 %3741 }
 0x788   : > { %v2442_v12 = vpop.f32.mrf.mxu0  ;;  %v3744_v49 = vunpack.i.h.bf16 %v3742_v14  ;;  %v3743_v61 = vunpack.i.l.bf16 %v3742_v14  ;;  %v2697_v0 = vsel %vm340_vm0, %v770_v3, %v3709_v37 }
 0x789   : > { %v3800_v6 = vpack.i.bf16 %v2497_v10, %v2496_v45  ;;  %v2495_v38 = vmul.f32 %v4131_v8, %v2442_v12  ;;  %v4149_v8 = vpop.eup %4148  ;;  %v2694_v12 = vsel %vm340_vm0, %v767_v44, %v3703_v50  ;;  %v5264_v44 = vld [vmem:[#allocation8_spill] sm:$0xff] }
 0x78a   : > { %v3655_v20 = vpop.f32.mrf.mxu0  ;;  %v771_v23 = vmul.f32 %v4149_v8, %v5262_v36 }
 0x78b   : > { %v3805_v7 = vpack.i.bf16 %v2495_v38, %v2494_v22  ;;  %3801 = vrot.lane.b32.xlu1 %v3800_v6, %s4182_s26  ;;  %v2500_v52 = vmul.f32 %v4133_v53, %v3655_v20  ;;  %v5023_v33 = vpop.permute.xlu1 %3736  ;;  %v5034_v48 = vpop.permute.xlu0 %3751 }
 0x78c   : > { %v2455_v32 = vpop.f32.mrf.mxu0  ;;  %v4151_v20 = vpop.eup %4150  ;;  %v3754_v50 = vunpack.i.h.bf16 %v5034_v48  ;;  %v2698_v56 = vsel %vm340_vm0, %v771_v23, %v3713_v29 }
 0x78d   : > { %3806 = vrot.lane.b32.xlu0 %v3805_v7, %s4182_s26  ;;  %v2498_v40 = vmul.f32 %v4137_v35, %v2455_v32  ;;  %v3714_v35 = vunpack.i.h.bf16 %v5014_v60 }
 0x78e   : > { %v3656_v2 = vpop.f32.mrf.mxu0 }
 0x78f   : > { %v2501_v1 = vmul.f32 %v4135_v26, %v3656_v2  ;;  %v3747_v11 = vpop.permute.xlu1 %3746  ;;  %v5042_v46 = vpop.permute.xlu0 %3761 }
 0x790   : > { %v2458_v31 = vpop.f32.mrf.mxu0  ;;  %v3749_v43 = vunpack.i.h.bf16 %v3747_v11  ;;  %v3748_v51 = vunpack.i.l.bf16 %v3747_v11  ;;  %v4153_v2 = vpop.eup %4152 }
 0x791   : > { %v3815_v25 = vpack.i.bf16 %v2501_v1, %v2500_v52  ;;  %v2499_v16 = vmul.f32 %v4139_v41, %v2458_v31  ;;  %v2712_v52 = vsel %vm2710_vm1, %v2695_v59, %v3744_v49  ;;  %v2711_v1 = vsel %vm2710_vm1, %v2694_v12, %v3743_v61  ;;  %v4155_v31 = vpop.eup %4154 }
 0x792   : > { %v2713_v22 = vsel %vm2710_vm1, %v2696_v9, %v3748_v51  ;;  %v2714_v6 = vsel %vm2710_vm1, %v2697_v0, %v3749_v43  ;;  %v4157_v27 = vpop.eup %4156  ;;  %v774_v37 = vmul.f32 %v4153_v2, %v5264_v44  ;;  %v772_v60 = vmul.f32 %v4155_v31, %v5265_v47  ;;  %v5266_v2 = vld [vmem:[#allocation10_spill] sm:$0xff] }
 0x793   : > { %v3810_v30 = vpack.i.bf16 %v2499_v16, %v2498_v40  ;;  %3816 = vrot.lane.b32.xlu1 %v3815_v25, %s4182_s26  ;;  %v5030_v24 = vpop.permute.xlu1 %3756  ;;  %v3719_v40 = vunpack.i.h.bf16 %v5016_v28  ;;  %v3718_v25 = vunpack.i.l.bf16 %v5016_v28  ;;  %v4159_v19 = vpop.eup %4158  ;;  %v5263_v28 = vld [vmem:[#allocation6_spill] sm:$0xff] }
 0x794   : > { %v3759_v11 = vunpack.i.h.bf16 %v5030_v24  ;;  %v3758_v14 = vunpack.i.l.bf16 %v5030_v24  ;;  %v773_v57 = vmul.f32 %v4151_v20, %v5263_v28  ;;  %v4161_v63 = vpop.eup %4160  ;;  %v3753_v24 = vunpack.i.l.bf16 %v5034_v48 }
 0x795   : > { %3811 = vrot.lane.b32.xlu0 %v3810_v30, %s4182_s26  ;;  %v5090_v51 = vpop.eup %4162  ;;  %v2701_v42 = vsel %vm340_vm0, %v774_v37, %v3719_v40  ;;  %v2699_v21 = vsel %vm340_vm0, %v772_v60, %v3714_v35  ;;  %v777_v35 = vmul.f32 %v4159_v19, %v5266_v2  ;;  %v5269_v40 = vld [vmem:[#allocation13_spill] sm:$0xff]  ;;  %v3734_v37 = vunpack.i.h.bf16 %v5027_v15 }
 0x796   : > { %v5050_v54 = vpop.permute.xlu0 %3771  ;;  %v2700_v17 = vsel %vm340_vm0, %v773_v57, %v3718_v25  ;;  %v4165_v62 = vpop.eup %4164  ;;  %v2718_v49 = vsel %vm2710_vm1, %v2701_v42, %v3759_v11  ;;  %v2715_v8 = vsel %vm2710_vm1, %v2698_v56, %v3753_v24  ;;  %v2716_v59 = vsel %vm2710_vm1, %v2699_v21, %v3754_v50  ;;  %v5270_v56 = vld [vmem:[#allocation14_spill] sm:$0xff] }
 0x797   : > { %v5038_v39 = vpop.permute.xlu1 %3766  ;;  %v2717_v3 = vsel %vm2710_vm1, %v2700_v17, %v3758_v14  ;;  %v3764_v25 = vunpack.i.h.bf16 %v5042_v46  ;;  %v3739_v24 = vunpack.i.h.bf16 %v5023_v33 }
 0x79b   : > { %v5046_v55 = vpop.permute.xlu1 %3776 }
 0x7ed   : > { %v3782_v13 = vpop.permute.xlu1 %3781 }
 0x7ee   : > { %v3784_v45 = vunpack.i.h.bf16 %v3782_v13  ;;  %v3783_v10 = vunpack.i.l.bf16 %v3782_v13 }
 0x7ef   : > { %v3787_v38 = vpop.permute.xlu0 %3786 }
 0x7f0   : > { %v2730_v7 = vsel %vm2727_vm2, %v2713_v22, %v3783_v10  ;;  %v2731_v32 = vsel %vm2727_vm2, %v2714_v6, %v3784_v45  ;;  %v3789_v53 = vunpack.i.h.bf16 %v3787_v38  ;;  %v3788_v26 = vunpack.i.l.bf16 %v3787_v38  ;;  %v4167_v45 = vpop.eup %4166 }
 0x7f1   : > { %v3234_v41 = vpack.c.bf16 %v2731_v32, %v2730_v7  ;;  %v3724_v10 = vunpack.i.h.bf16 %v5020_v4  ;;  %v3729_v22 = vunpack.i.h.bf16 %v5018_v34  ;;  %v3728_v6 = vunpack.i.l.bf16 %v5018_v34  ;;  %v4169_v44 = vpop.eup %4168 }
 0x7f2   : > { %v2729_v16 = vsel %vm2727_vm2, %v2712_v52, %v3789_v53  ;;  %v2728_v30 = vsel %vm2727_vm2, %v2711_v1, %v3788_v26  ;;  %v3723_v7 = vunpack.i.l.bf16 %v5020_v4  ;;  %v3769_v32 = vunpack.i.h.bf16 %v5038_v39  ;;  %v5267_v52 = vld [vmem:[#allocation12_spill] sm:$0xff]  ;;  %v4171_v50 = vpop.eup %4170 }
 0x7f3   : > { %3266 = vst [vmem:[%s5066_s30 + $0x8] sm:$0xff] %v3234_v41   ;;  %v3229_v18 = vpack.c.bf16 %v2729_v16, %v2728_v30  ;;  %v3768_v53 = vunpack.i.l.bf16 %v5038_v39  ;;  %v778_v1 = vmul.f32 %v4165_v62, %v5267_v52  ;;  %v5268_v41 = vld [vmem:[#allocation11_spill] sm:$0xff]  ;;  %v776_v34 = vmul.f32 %v4161_v63, %v5269_v40 }
 0x7f4   : > { %v775_v31 = vmul.f32 %v4157_v27, %v5268_v41  ;;  %v3763_v16 = vunpack.i.l.bf16 %v5042_v46  ;;  %v2704_v39 = vsel %vm340_vm0, %v777_v35, %v3728_v6  ;;  %v3778_v62 = vunpack.i.l.bf16 %v5046_v55 }
 0x7f5   : > { %3230 = vst [vmem:[%s5066_s30] sm:$0xff] %v3229_v18   ;;  %v3792_v43 = vpop.permute.xlu1 %3791  ;;  %v2705_v30 = vsel %vm340_vm0, %v778_v1, %v3729_v22  ;;  %v2703_v14 = vsel %vm340_vm0, %v776_v34, %v3724_v10  ;;  %v2721_v27 = vsel %vm2710_vm1, %v2704_v39, %v3768_v53  ;;  %v3773_v10 = vunpack.i.l.bf16 %v5050_v54 }
 0x7f6   : > { %v3794_v58 = vunpack.i.h.bf16 %v3792_v43  ;;  %v3793_v5 = vunpack.i.l.bf16 %v3792_v43  ;;  %v2702_v18 = vsel %vm340_vm0, %v775_v31, %v3723_v7  ;;  %v2722_v19 = vsel %vm2710_vm1, %v2705_v30, %v3769_v32 }
 0x7f7   : > { %v3797_v48 = vpop.permute.xlu0 %3796  ;;  %v2720_v63 = vsel %vm2710_vm1, %v2703_v14, %v3764_v25  ;;  %v2719_v47 = vsel %vm2710_vm1, %v2702_v18, %v3763_v16  ;;  %v3738_v43 = vunpack.i.l.bf16 %v5023_v33  ;;  %v5273_v33 = vld [vmem:[#allocation17_spill] sm:$0xff] }
 0x7f8   : > { %v2734_v61 = vsel %vm2727_vm2, %v2717_v3, %v3793_v5  ;;  %v2735_v13 = vsel %vm2727_vm2, %v2718_v49, %v3794_v58  ;;  %v3799_v0 = vunpack.i.h.bf16 %v3797_v48  ;;  %v3798_v9 = vunpack.i.l.bf16 %v3797_v48  ;;  %v5271_v49 = vld [vmem:[#allocation16_spill] sm:$0xff] }
 0x7f9   : > { %v3244_v12 = vpack.c.bf16 %v2735_v13, %v2734_v61  ;;  %v3733_v58 = vunpack.i.l.bf16 %v5027_v15  ;;  %v3779_v5 = vunpack.i.h.bf16 %v5046_v55  ;;  %v781_v3 = vmul.f32 %v4167_v45, %v5270_v56  ;;  %v5272_v61 = vld [vmem:[#allocation15_spill] sm:$0xff] }
 0x7fa   : > { %v2732_v38 = vsel %vm2727_vm2, %v2715_v8, %v3798_v9  ;;  %v2733_v20 = vsel %vm2727_vm2, %v2716_v59, %v3799_v0  ;;  %v782_v48 = vmul.f32 %v4169_v44, %v5271_v49  ;;  %v779_v13 = vmul.f32 %v5090_v51, %v5272_v61 }
 0x7fb   : > { %3268 = vst [vmem:[%s5066_s30 + $0x18] sm:$0xff] %v3244_v12   ;;  %v3239_v26 = vpack.c.bf16 %v2733_v20, %v2732_v38  ;;  %v780_v0 = vmul.f32 %v4171_v50, %v5273_v33  ;;  %v3774_v9 = vunpack.i.h.bf16 %v5050_v54  ;;  %v2708_v55 = vsel %vm340_vm0, %v781_v3, %v3738_v43 }
 0x7fc   : > { %v2709_v8 = vsel %vm340_vm0, %v782_v48, %v3739_v24  ;;  %v2706_v51 = vsel %vm340_vm0, %v779_v13, %v3733_v58  ;;  %v2725_v22 = vsel %vm2710_vm1, %v2708_v55, %v3778_v62 }
 0x7fd   : > { %3267 = vst [vmem:[%s5066_s30 + $0x10] sm:$0xff] %v3239_v26   ;;  %v3802_v4 = vpop.permute.xlu1 %3801  ;;  %v2707_v12 = vsel %vm340_vm0, %v780_v0, %v3734_v37  ;;  %v2726_v6 = vsel %vm2710_vm1, %v2709_v8, %v3779_v5  ;;  %v2723_v26 = vsel %vm2710_vm1, %v2706_v51, %v3773_v10 }
 0x7fe   : > { %v3804_v29 = vunpack.i.h.bf16 %v3802_v4  ;;  %v3803_v11 = vunpack.i.l.bf16 %v3802_v4  ;;  %v2724_v53 = vsel %vm2710_vm1, %v2707_v12, %v3774_v9 }
 0x7ff   : > { %v3807_v36 = vpop.permute.xlu0 %3806 }
 0x800   : > { %v2738_v23 = vsel %vm2727_vm2, %v2721_v27, %v3803_v11  ;;  %v2739_v46 = vsel %vm2727_vm2, %v2722_v19, %v3804_v29  ;;  %v3809_v28 = vunpack.i.h.bf16 %v3807_v36  ;;  %v3808_v57 = vunpack.i.l.bf16 %v3807_v36 }
 0x801   : > { %v3254_v60 = vpack.c.bf16 %v2739_v46, %v2738_v23 }
 0x802   : > { %v2737_v42 = vsel %vm2727_vm2, %v2720_v63, %v3809_v28  ;;  %v2736_v17 = vsel %vm2727_vm2, %v2719_v47, %v3808_v57 }
 0x803   : > { %3270 = vst [vmem:[%s5066_s30 + $0x28] sm:$0xff] %v3254_v60   ;;  %v3249_v21 = vpack.c.bf16 %v2737_v42, %v2736_v17 }
 0x805   : > { %3269 = vst [vmem:[%s5066_s30 + $0x20] sm:$0xff] %v3249_v21   ;;  %v3817_v15 = vpop.permute.xlu1 %3816 }
 0x806   : > { %v3819_v59 = vunpack.i.h.bf16 %v3817_v15  ;;  %v3818_v45 = vunpack.i.l.bf16 %v3817_v15 }
 0x807   : > { %v3812_v38 = vpop.permute.xlu0 %3811 }
 0x808   : > { %v2742_v54 = vsel %vm2727_vm2, %v2725_v22, %v3818_v45  ;;  %v2743_v20 = vsel %vm2727_vm2, %v2726_v6, %v3819_v59  ;;  %v3814_v7 = vunpack.i.h.bf16 %v3812_v38  ;;  %v3813_v32 = vunpack.i.l.bf16 %v3812_v38 }
 0x809   : > { %v3264_v2 = vpack.c.bf16 %v2743_v20, %v2742_v54 }
 0x80a   : > { %v2741_v35 = vsel %vm2727_vm2, %v2724_v53, %v3814_v7  ;;  %v2740_v52 = vsel %vm2727_vm2, %v2723_v26, %v3813_v32 }
 0x80b   : > { %3272 = vst [vmem:[%s5066_s30 + $0x38] sm:$0xff] %v3264_v2   ;;  %v3259_v1 = vpack.c.bf16 %v2741_v35, %v2740_v52 }
 0x80d   : > { %3271 = vst [vmem:[%s5066_s30 + $0x30] sm:$0xff] %v3259_v1  }
 0x80e PF: > { %s13_s12 = sadd.s32 1, %s4178_s12  }
 0x80f   : > { %p10_p4 = scmp.ge.s32.totalorder %s13_s12, 4  }
 0x811   :  { %12 = sbr.rel (!%p10_p4) target bundleno = 1 (0x1), region = 77 }

</bundles_post_ra>
